<compile_context>
chip_gen: v7x
topology: tpu7x:2x2x1
jax: 0.10.0
libtpu: 0.0.40
codegen_flags: <defaults>
</compile_context>

<pallas_src>
import jax
import jax.numpy as jnp
from jax.experimental import pallas as pl
from jax.experimental.pallas import tpu as pltpu


# ----------------------------------------------------------------------------
# Fused Pallas kernel: Rot_green + Rot_red + Pose_Ts
#   3x (1x1 conv + BN + ReLU) -> max over points -> final 1x1 conv (4/4/6)
# all three heads fused via block-structured / block-diagonal weights.
# ----------------------------------------------------------------------------
def _posenet_heads_kernel(x_ref, w1_ref, b1_ref, w2_ref, b2_ref,
                          w3_ref, b3_ref, w4_ref, b4_ref, out_ref):
    """x_ref  : (Bb*N, C_in)  packed [clip_r | clip_t | centered-xyz]
       w1     : (C_in, 3*H1)  block-structured layer-1 of all three heads
       w2, w3 : block-diagonal layers 2/3 across the three heads
       w4     : (3*H3, 128)   lane-padded final convs (green 0:4, red 4:8, ts 8:14)
       out    : (Bb, 1, 128)  per-batch head vectors (single lane-dense store)
    """
    bb = out_ref.shape[0]
    n = x_ref.shape[0] // bb

    x = x_ref[...].astype(jnp.bfloat16)                        # (Bb*N, C_in)

    # Layers 1-3: one fat MXU pass each (bf16 operands, f32 accumulate).
    h = jnp.dot(x, w1_ref[...], preferred_element_type=jnp.float32) + b1_ref[...]
    h = jnp.maximum(h, 0.0).astype(jnp.bfloat16)
    h = jnp.dot(h, w2_ref[...], preferred_element_type=jnp.float32) + b2_ref[...]
    h = jnp.maximum(h, 0.0).astype(jnp.bfloat16)
    h = jnp.dot(h, w3_ref[...], preferred_element_type=jnp.float32) + b3_ref[...]
    h = jnp.maximum(h, 0.0)                                    # (Bb*N, 3*H3) f32

    # torch.max(x, 2)[0]: per-batch max over points (static unroll, Bb is 1/2).
    pooled = jnp.concatenate(
        [jnp.max(h[b * n:(b + 1) * n, :], axis=0, keepdims=True)
         for b in range(bb)], axis=0)                          # (Bb, 3*H3)

    # Final (H3 -> 4/4/6) convs as one lane-padded matmul (kept f32: tiny,
    # better precision for the head outputs).
    vec = jnp.dot(pooled, w4_ref[...],
                  preferred_element_type=jnp.float32) + b4_ref[...]   # (Bb, 128)
    out_ref[:, 0, :] = vec


_PARAM_ORDER = ("w1", "b1", "w2", "b2", "w3", "b3", "w4", "b4")


def _num_grid_steps(batch):
    # v7x has 2 TensorCores/chip -> keep a 2-way "parallel" grid there.
    # v5e/v6e are single-TC: a serial grid only adds ~0.35us/step of pipeline
    # overhead, so collapse to one fat block (M = B*N feeds the 256-row MXU).
    try:
        kind = jax.devices()[0].device_kind.lower()
    except Exception:
        kind = ""
    if "v7" in kind and batch >= 2 and batch % 2 == 0:
        return 2
    return 1


def fused_heads_forward(x_packed, params, grid_steps=None):
    """x_packed: (B, N, C_in) f32 -> (B, 128) packed head vectors."""
    B, N, C = x_packed.shape
    out_w = params["w4"].shape[1]
    G = _num_grid_steps(B) if grid_steps is None else grid_steps
    assert B % G == 0
    Bb = B // G

    x_flat = x_packed.reshape(B * N, C)        # free, contiguous reshape in XLA
    weights = [params[k] for k in _PARAM_ORDER]

    def full_spec(arr):
        nd = arr.ndim
        # constant index_map -> weight blocks stay VMEM-resident across steps
        return pl.BlockSpec(arr.shape, lambda g, _nd=nd: (0,) * _nd)

    out = pl.pallas_call(
        _posenet_heads_kernel,
        out_shape=jax.ShapeDtypeStruct((B, 1, out_w), jnp.float32),
        grid=(G,),
        in_specs=[pl.BlockSpec((Bb * N, C), lambda g: (g, 0))]
                 + [full_spec(w) for w in weights],
        out_specs=pl.BlockSpec((Bb, 1, out_w), lambda g: (g, 0, 0)),
        compiler_params=pltpu.CompilerParams(
            dimension_semantics=("parallel",)),
    )(x_flat, *weights)
    return out[:, 0, :]


# ----------------------------------------------------------------------------
# Parameter construction (glue).
# ----------------------------------------------------------------------------
def fold_bn(w, b, gamma, beta, mean, var, eps=1e-5):
    """Fold eval-mode BatchNorm1d into the preceding per-point linear."""
    scale = gamma / jnp.sqrt(var + eps)
    return w * scale[None, :], beta + (b - mean) * scale


def init_head_params(key, c_in, h1, h2, h3, k_out):
    ks = jax.random.split(key, 8)

    def conv(kw, kb, cin, cout):
        w = 0.02 * jax.random.normal(kw, (cin, cout), jnp.float32)
        b = 0.02 * jax.random.normal(kb, (cout,), jnp.float32)
        return w, b

    w1, b1 = conv(ks[0], ks[1], c_in, h1)
    w2, b2 = conv(ks[2], ks[3], h1, h2)
    w3, b3 = conv(ks[4], ks[5], h2, h3)
    w4, b4 = conv(ks[6], ks[7], h3, k_out)

    def default_bn(c):   # untrained eval stats; trained stats fold identically
        return (jnp.ones((c,), jnp.float32), jnp.zeros((c,), jnp.float32),
                jnp.zeros((c,), jnp.float32), jnp.ones((c,), jnp.float32))

    w1, b1 = fold_bn(w1, b1, *default_bn(h1))
    w2, b2 = fold_bn(w2, b2, *default_bn(h2))
    w3, b3 = fold_bn(w3, b3, *default_bn(h3))
    return dict(w1=w1, b1=b1, w2=w2, b2=b2, w3=w3, b3=b3, w4=w4, b4=b4)


def _block_diag(a, b, c):
    rows = a.shape[0] + b.shape[0] + c.shape[0]
    cols = a.shape[1] + b.shape[1] + c.shape[1]
    m = jnp.zeros((rows, cols), jnp.float32)
    m = m.at[:a.shape[0], :a.shape[1]].set(a)
    m = m.at[a.shape[0]:a.shape[0] + b.shape[0],
             a.shape[1]:a.shape[1] + b.shape[1]].set(b)
    m = m.at[a.shape[0] + b.shape[0]:, a.shape[1] + b.shape[1]:].set(c)
    return m


def pack_posenet_params(green, red, ts, c_r, c_t, out_lanes=128):
    """Build the fused block-structured weights consumed by the kernel."""
    H1 = green["w1"].shape[1]
    H3 = green["w3"].shape[1]
    kg, kr, kt = green["w4"].shape[1], red["w4"].shape[1], ts["w4"].shape[1]
    c_ts = ts["w1"].shape[0]
    assert c_ts == c_t + 3, "Pose_Ts conv1 expects cat([clip_t_feat, xyz], dim=2)"
    c_in = c_r + c_ts

    bf = lambda a: a.astype(jnp.bfloat16)
    row = lambda b: b.reshape(1, -1)

    # Layer 1: block-structured (C_in, 3*H1).  Rows 0:C_r feed both rotation
    # heads (shared input), rows C_r: feed Pose_Ts (clip_t ++ centered xyz).
    w1 = jnp.zeros((c_in, 3 * H1), jnp.float32)
    w1 = w1.at[:c_r, :H1].set(green["w1"])
    w1 = w1.at[:c_r, H1:2 * H1].set(red["w1"])
    w1 = w1.at[c_r:, 2 * H1:].set(ts["w1"])
    b1 = row(jnp.concatenate([green["b1"], red["b1"], ts["b1"]]))

    # Layers 2/3: block-diagonal across the three heads.
    w2 = _block_diag(green["w2"], red["w2"], ts["w2"])
    b2 = row(jnp.concatenate([green["b2"], red["b2"], ts["b2"]]))
    w3 = _block_diag(green["w3"], red["w3"], ts["w3"])
    b3 = row(jnp.concatenate([green["b3"], red["b3"], ts["b3"]]))

    # Final 1x1 convs (H3 -> 4/4/6), lane-padded to one 128-wide matmul.
    assert kg + kr + kt <= out_lanes
    w4 = jnp.zeros((3 * H3, out_lanes), jnp.float32)
    w4 = w4.at[:H3, :kg].set(green["w4"])
    w4 = w4.at[H3:2 * H3, kg:kg + kr].set(red["w4"])
    w4 = w4.at[2 * H3:, kg + kr:kg + kr + kt].set(ts["w4"])
    b4 = jnp.zeros((1, out_lanes), jnp.float32)
    b4 = b4.at[0, :kg].set(green["b4"])
    b4 = b4.at[0, kg:kg + kr].set(red["b4"])
    b4 = b4.at[0, kg + kr:kg + kr + kt].set(ts["b4"])

    return dict(w1=bf(w1), b1=b1, w2=bf(w2), b2=b2, w3=bf(w3), b3=b3,
                w4=w4, b4=b4, k_green=kg, k_red=kr, k_ts=kt)


# ----------------------------------------------------------------------------
# PoseNet9D.forward, inference path (FLAGS.train == False)
# ----------------------------------------------------------------------------
def posenet9d_forward(points, obj_id, clip_r_feat, clip_t_feat, params):
    del obj_id  # only consumed by FaceRecon, whose eval-path outputs are None
    # TODO(synk): CLIPModel_rot / CLIPModel_trans / FaceRecon source is not
    # provided; clip_r_feat / clip_t_feat are taken as precomputed per-point
    # features and FaceRecon is skipped (recon / face_* are None at eval).
    pts_mean = jnp.mean(points, axis=1, keepdims=True)       # points.mean(dim=1, keepdim=True)
    pts_centered = points - pts_mean

    # Pack the three per-point streams channels-last: one lane-denser input
    # DMA per grid step and one fused layer-1 matmul inside the kernel.
    x_packed = jnp.concatenate([clip_r_feat, clip_t_feat, pts_centered], axis=2)

    vec = fused_heads_forward(x_packed, params)              # (B, 128)

    kg, kr, kt = params["k_green"], params["k_red"], params["k_ts"]
    green_R_vec = vec[:, :kg]                                # (B, 4)
    red_R_vec = vec[:, kg:kg + kr]                           # (B, 4)
    ts_out = vec[:, kg + kr:kg + kr + kt]                    # (B, 6)

    p_green_R = green_R_vec[:, 1:] / (
        jnp.linalg.norm(green_R_vec[:, 1:], axis=1, keepdims=True) + 1e-6)
    p_red_R = red_R_vec[:, 1:] / (
        jnp.linalg.norm(red_R_vec[:, 1:], axis=1, keepdims=True) + 1e-6)
    f_green_R = jax.nn.sigmoid(green_R_vec[:, 0])
    f_red_R = jax.nn.sigmoid(red_R_vec[:, 0])

    T, s = ts_out[:, 0:3], ts_out[:, 3:6]
    Pred_T = T + pts_mean[:, 0, :]                           # T + points.mean(dim=1)
    Pred_s = s

    recon = face_normal = face_dis = face_f = None
    return (recon, face_normal, face_dis, face_f,
            p_green_R, p_red_R, f_green_R, f_red_R, Pred_T, Pred_s)


# ----------------------------------------------------------------------------
if __name__ == "__main__":
    key = jax.random.PRNGKey(0)
    k_pts, k_r, k_t, k_pg, k_pr, k_pt = jax.random.split(key, 6)

    # Small shapes consistent with the module: B=2 point clouds of N=128
    # points, per-point CLIP rot features (feat_c_R=32), per-point CLIP trans
    # features (29 channels, + 3 centered-xyz -> feat_c_ts=32).
    B, N = 2, 128
    FEAT_C_R = 32
    CLIP_T_C = 29
    FEAT_C_TS = CLIP_T_C + 3
    H1, H2, H3 = 256, 128, 128
    R_C, TS_C = 4, 6

    points = jax.random.normal(k_pts, (B, N, 3), jnp.float32)
    obj_id = jnp.zeros((B,), jnp.int32)
    clip_r_feat = jax.random.normal(k_r, (B, N, FEAT_C_R), jnp.float32)
    clip_t_feat = jax.random.normal(k_t, (B, N, CLIP_T_C), jnp.float32)

    green_p = init_head_params(k_pg, FEAT_C_R, H1, H2, H3, R_C)
    red_p = init_head_params(k_pr, FEAT_C_R, H1, H2, H3, R_C)
    ts_p = init_head_params(k_pt, FEAT_C_TS, H1, H2, H3, TS_C)
    params = pack_posenet_params(green_p, red_p, ts_p, FEAT_C_R, CLIP_T_C)

    outs = posenet9d_forward(points, obj_id, clip_r_feat, clip_t_feat, params)
    (recon, face_normal, face_dis, face_f,
     p_green_R, p_red_R, f_green_R, f_red_R, Pred_T, Pred_s) = outs

    for o in (p_green_R, p_red_R, f_green_R, f_red_R, Pred_T, Pred_s):
        jax.block_until_ready(o)

    assert p_green_R.shape == (B, 3) and p_red_R.shape == (B, 3)
    assert f_green_R.shape == (B,) and f_red_R.shape == (B,)
    assert Pred_T.shape == (B, 3) and Pred_s.shape == (B, 3)
    assert bool(jnp.all(jnp.isfinite(p_green_R)))
    assert bool(jnp.all(jnp.isfinite(p_red_R)))
    assert bool(jnp.all(jnp.isfinite(Pred_T)))
    assert bool(jnp.all(jnp.isfinite(Pred_s)))
    print("KERNEL_OK")
</pallas_src>

<mosaic_0001>
module attributes {stable_mosaic.version = 11 : i64} {
  func.func @_posenet_heads_kernel(%arg0: i32, %arg1: memref<256x64xf32, #tpu.memory_space<vmem>>, %arg2: memref<64x768xbf16, #tpu.memory_space<vmem>>, %arg3: memref<1x768xf32, #tpu.memory_space<vmem>>, %arg4: memref<768x384xbf16, #tpu.memory_space<vmem>>, %arg5: memref<1x384xf32, #tpu.memory_space<vmem>>, %arg6: memref<384x384xbf16, #tpu.memory_space<vmem>>, %arg7: memref<1x384xf32, #tpu.memory_space<vmem>>, %arg8: memref<384x128xf32, #tpu.memory_space<vmem>>, %arg9: memref<1x128xf32, #tpu.memory_space<vmem>>, %arg10: memref<2x1x128xf32, #tpu.memory_space<vmem>>) attributes {dimension_semantics = [#tpu.dimension_semantics<parallel>], iteration_bounds = array<i64: 1>, scalar_prefetch = 0 : i64, scratch_operands = 0 : i64, tpu.core_type = #tpu.core_type<tc>, window_params = [{transform_indices = @transform_0, window_bounds = array<i64: 256, 64>}, {pipeline_mode = #tpu.pipeline_mode<synchronous>, transform_indices = @transform_1, window_bounds = array<i64: 64, 768>}, {pipeline_mode = #tpu.pipeline_mode<synchronous>, transform_indices = @transform_2, window_bounds = array<i64: 1, 768>}, {pipeline_mode = #tpu.pipeline_mode<synchronous>, transform_indices = @transform_3, window_bounds = array<i64: 768, 384>}, {pipeline_mode = #tpu.pipeline_mode<synchronous>, transform_indices = @transform_4, window_bounds = array<i64: 1, 384>}, {pipeline_mode = #tpu.pipeline_mode<synchronous>, transform_indices = @transform_5, window_bounds = array<i64: 384, 384>}, {pipeline_mode = #tpu.pipeline_mode<synchronous>, transform_indices = @transform_6, window_bounds = array<i64: 1, 384>}, {pipeline_mode = #tpu.pipeline_mode<synchronous>, transform_indices = @transform_7, window_bounds = array<i64: 384, 128>}, {pipeline_mode = #tpu.pipeline_mode<synchronous>, transform_indices = @transform_8, window_bounds = array<i64: 1, 128>}, {transform_indices = @transform_9, window_bounds = array<i64: 2, 1, 128>}]} {
    %c0 = arith.constant 0 : index
    %c0_0 = arith.constant 0 : index
    %0 = vector.load %arg1[%c0, %c0_0] : memref<256x64xf32, #tpu.memory_space<vmem>>, vector<256x64xf32>
    %1 = arith.truncf %0 : vector<256x64xf32> to vector<256x64xbf16>
    %c0_1 = arith.constant 0 : index
    %c0_2 = arith.constant 0 : index
    %2 = vector.load %arg2[%c0_1, %c0_2] : memref<64x768xbf16, #tpu.memory_space<vmem>>, vector<64x768xbf16>
    %cst = arith.constant dense<0.000000e+00> : vector<256x768xf32>
    %3 = tpu.matmul %1, %2, %cst {dimension_numbers = #tpu.dot_dimension_numbers<[1], [0], [0], [1], [0, 0, 1, 1], [], []>} : vector<256x64xbf16>, vector<64x768xbf16>, vector<256x768xf32> -> vector<256x768xf32>
    %c0_3 = arith.constant 0 : index
    %c0_4 = arith.constant 0 : index
    %4 = vector.load %arg3[%c0_3, %c0_4] : memref<1x768xf32, #tpu.memory_space<vmem>>, vector<1x768xf32>
    %5 = vector.broadcast %4 : vector<1x768xf32> to vector<256x768xf32>
    %6 = arith.addf %3, %5 : vector<256x768xf32>
    %cst_5 = arith.constant 0.000000e+00 : f32
    %7 = vector.broadcast %cst_5 : f32 to vector<256x768xf32>
    %8 = arith.maximumf %6, %7 : vector<256x768xf32>
    %9 = arith.truncf %8 : vector<256x768xf32> to vector<256x768xbf16>
    %c0_6 = arith.constant 0 : index
    %c0_7 = arith.constant 0 : index
    %10 = vector.load %arg4[%c0_6, %c0_7] : memref<768x384xbf16, #tpu.memory_space<vmem>>, vector<768x384xbf16>
    %cst_8 = arith.constant dense<0.000000e+00> : vector<256x384xf32>
    %11 = tpu.matmul %9, %10, %cst_8 {dimension_numbers = #tpu.dot_dimension_numbers<[1], [0], [0], [1], [0, 0, 1, 1], [], []>} : vector<256x768xbf16>, vector<768x384xbf16>, vector<256x384xf32> -> vector<256x384xf32>
    %c0_9 = arith.constant 0 : index
    %c0_10 = arith.constant 0 : index
    %12 = vector.load %arg5[%c0_9, %c0_10] : memref<1x384xf32, #tpu.memory_space<vmem>>, vector<1x384xf32>
    %13 = vector.broadcast %12 : vector<1x384xf32> to vector<256x384xf32>
    %14 = arith.addf %11, %13 : vector<256x384xf32>
    %cst_11 = arith.constant 0.000000e+00 : f32
    %15 = vector.broadcast %cst_11 : f32 to vector<256x384xf32>
    %16 = arith.maximumf %14, %15 : vector<256x384xf32>
    %17 = arith.truncf %16 : vector<256x384xf32> to vector<256x384xbf16>
    %c0_12 = arith.constant 0 : index
    %c0_13 = arith.constant 0 : index
    %18 = vector.load %arg6[%c0_12, %c0_13] : memref<384x384xbf16, #tpu.memory_space<vmem>>, vector<384x384xbf16>
    %cst_14 = arith.constant dense<0.000000e+00> : vector<256x384xf32>
    %19 = tpu.matmul %17, %18, %cst_14 {dimension_numbers = #tpu.dot_dimension_numbers<[1], [0], [0], [1], [0, 0, 1, 1], [], []>} : vector<256x384xbf16>, vector<384x384xbf16>, vector<256x384xf32> -> vector<256x384xf32>
    %c0_15 = arith.constant 0 : index
    %c0_16 = arith.constant 0 : index
    %20 = vector.load %arg7[%c0_15, %c0_16] : memref<1x384xf32, #tpu.memory_space<vmem>>, vector<1x384xf32>
    %21 = vector.broadcast %20 : vector<1x384xf32> to vector<256x384xf32>
    %22 = arith.addf %19, %21 : vector<256x384xf32>
    %cst_17 = arith.constant 0.000000e+00 : f32
    %23 = vector.broadcast %cst_17 : f32 to vector<256x384xf32>
    %24 = arith.maximumf %22, %23 : vector<256x384xf32>
    %25 = vector.extract_strided_slice %24 {offsets = [0, 0], sizes = [128, 384], strides = [1, 1]} : vector<256x384xf32> to vector<128x384xf32>
    %cst_18 = arith.constant dense<0xFF800000> : vector<384xf32>
    %26 = vector.multi_reduction <maximumf>, %25, %cst_18 [0] : vector<128x384xf32> to vector<384xf32>
    %27 = vector.shape_cast %26 : vector<384xf32> to vector<1x384xf32>
    %28 = vector.extract_strided_slice %24 {offsets = [128, 0], sizes = [128, 384], strides = [1, 1]} : vector<256x384xf32> to vector<128x384xf32>
    %cst_19 = arith.constant dense<0xFF800000> : vector<384xf32>
    %29 = vector.multi_reduction <maximumf>, %28, %cst_19 [0] : vector<128x384xf32> to vector<384xf32>
    %30 = vector.shape_cast %29 : vector<384xf32> to vector<1x384xf32>
    %31 = tpu.concatenate %27, %30 in 0 : vector<1x384xf32>, vector<1x384xf32> -> vector<2x384xf32>
    %c0_20 = arith.constant 0 : index
    %c0_21 = arith.constant 0 : index
    %32 = vector.load %arg8[%c0_20, %c0_21] : memref<384x128xf32, #tpu.memory_space<vmem>>, vector<384x128xf32>
    %cst_22 = arith.constant dense<0.000000e+00> : vector<2x128xf32>
    %33 = tpu.matmul %31, %32, %cst_22 {dimension_numbers = #tpu.dot_dimension_numbers<[1], [0], [0], [1], [0, 0, 1, 1], [], []>} : vector<2x384xf32>, vector<384x128xf32>, vector<2x128xf32> -> vector<2x128xf32>
    %c0_23 = arith.constant 0 : index
    %c0_24 = arith.constant 0 : index
    %34 = vector.load %arg9[%c0_23, %c0_24] : memref<1x128xf32, #tpu.memory_space<vmem>>, vector<1x128xf32>
    %35 = vector.broadcast %34 : vector<1x128xf32> to vector<2x128xf32>
    %36 = arith.addf %33, %35 : vector<2x128xf32>
    %c0_25 = arith.constant 0 : index
    %c0_26 = arith.constant 0 : index
    %c0_27 = arith.constant 0 : index
    %37 = vector.load %arg10[%c0_25, %c0_26, %c0_27] : memref<2x1x128xf32, #tpu.memory_space<vmem>>, vector<2x1x128xf32>
    %38 = vector.shape_cast %37 : vector<2x1x128xf32> to vector<2x128xf32>
    %39 = vector.shape_cast %36 : vector<2x128xf32> to vector<2x1x128xf32>
    tpu.vector_store %arg10[%c0_25, %c0_26, %c0_27], %39 {strides = array<i32>} : memref<2x1x128xf32, #tpu.memory_space<vmem>>, vector<2x1x128xf32>,
    return
  }
  func.func @transform_0(%arg0: i32) -> (i32, i32) {
    %c0_i32 = arith.constant 0 : i32
    %c0_i32_0 = arith.constant 0 : i32
    return %arg0, %c0_i32 : i32, i32
  }
  func.func @transform_1(%arg0: i32) -> (i32, i32) {
    %c0_i32 = arith.constant 0 : i32
    %c0_i32_0 = arith.constant 0 : i32
    %c0_i32_1 = arith.constant 0 : i32
    return %c0_i32, %c0_i32_0 : i32, i32
  }
  func.func @transform_2(%arg0: i32) -> (i32, i32) {
    %c0_i32 = arith.constant 0 : i32
    %c0_i32_0 = arith.constant 0 : i32
    %c0_i32_1 = arith.constant 0 : i32
    return %c0_i32, %c0_i32_0 : i32, i32
  }
  func.func @transform_3(%arg0: i32) -> (i32, i32) {
    %c0_i32 = arith.constant 0 : i32
    %c0_i32_0 = arith.constant 0 : i32
    %c0_i32_1 = arith.constant 0 : i32
    return %c0_i32, %c0_i32_0 : i32, i32
  }
  func.func @transform_4(%arg0: i32) -> (i32, i32) {
    %c0_i32 = arith.constant 0 : i32
    %c0_i32_0 = arith.constant 0 : i32
    %c0_i32_1 = arith.constant 0 : i32
    return %c0_i32, %c0_i32_0 : i32, i32
  }
  func.func @transform_5(%arg0: i32) -> (i32, i32) {
    %c0_i32 = arith.constant 0 : i32
    %c0_i32_0 = arith.constant 0 : i32
    %c0_i32_1 = arith.constant 0 : i32
    return %c0_i32, %c0_i32_0 : i32, i32
  }
  func.func @transform_6(%arg0: i32) -> (i32, i32) {
    %c0_i32 = arith.constant 0 : i32
    %c0_i32_0 = arith.constant 0 : i32
    %c0_i32_1 = arith.constant 0 : i32
    return %c0_i32, %c0_i32_0 : i32, i32
  }
  func.func @transform_7(%arg0: i32) -> (i32, i32) {
    %c0_i32 = arith.constant 0 : i32
    %c0_i32_0 = arith.constant 0 : i32
    %c0_i32_1 = arith.constant 0 : i32
    return %c0_i32, %c0_i32_0 : i32, i32
  }
  func.func @transform_8(%arg0: i32) -> (i32, i32) {
    %c0_i32 = arith.constant 0 : i32
    %c0_i32_0 = arith.constant 0 : i32
    %c0_i32_1 = arith.constant 0 : i32
    return %c0_i32, %c0_i32_0 : i32, i32
  }
  func.func @transform_9(%arg0: i32) -> (i32, i32, i32) {
    %c0_i32 = arith.constant 0 : i32
    %c0_i32_0 = arith.constant 0 : i32
    %c0_i32_1 = arith.constant 0 : i32
    return %arg0, %c0_i32, %c0_i32_0 : i32, i32, i32
  }
}

</mosaic_0001>

<bundles_post_ra>
// kernel: tpu_custom_call.1
= control target key start
LH: loop header
LB: loop body
LE: loop exit
PB: predicated region body
PF: predicated region fallthrough
CT: control target
= control target key end

     0   :  { %14 = vsyncpa [#allocation3], 0  ;;  %s8546_s0 = inlined_call_operand.vmem [shape: f32[256,64], index: 0, kind: input, shape index: {}]   ;;  %s8547_s1 = inlined_call_operand.hbm [shape: bf16[64,768], index: 1, kind: input, shape index: {}]   ;;  %s8548_s2 = inlined_call_operand.vmem [shape: f32[1,768], index: 2, kind: input, shape index: {}]   ;;  %s8549_s3 = inlined_call_operand.hbm [shape: bf16[768,384], index: 3, kind: input, shape index: {}]   ;;  %s8550_s4 = inlined_call_operand.vmem [shape: f32[1,384], index: 4, kind: input, shape index: {}]   ;;  %s8551_s5 = inlined_call_operand.hbm [shape: bf16[384,384], index: 5, kind: input, shape index: {}]   ;;  %s8552_s6 = inlined_call_operand.vmem [shape: f32[1,384], index: 6, kind: input, shape index: {}]   ;;  %s8553_s7 = inlined_call_operand.vmem [shape: f32[384,128], index: 7, kind: input, shape index: {}]   ;;  %s8554_s8 = inlined_call_operand.vmem [shape: f32[1,128], index: 8, kind: input, shape index: {}]   ;;  %s8555_s9 = inlined_call_operand.hbm [shape: f32[2,1,128], index: 9, kind: output, shape index: {}]  }
   0x1   :  { %15 = vsyncpa [#allocation6], 0 }
   0x2   :  { %16 = vsyncpa [#allocation4], 0  ;;  %s6777_s30 = smov [#allocation5]   ;;  %s6683_s13 = scalar_lea.hbm %s8549_s3, 18432 }
   0x3   :  { %s38_s10 = sshll.u32 %s6777_s30, 4  ;;  %p6684_p0 = scmp.ne.s32.totalorder %s8549_s3, %s6683_s13  ;;  %s39_s10 = int_to_ptr.vmem [resolvable:$true] %s38_s10 }
   0x4   :  { %p6687_p1 = scmp.lt.u32.totalorder %s6683_s13, %s8549_s3 }
   0x6   :  { %p6689_p2 = pnand %p6687_p1, %p6684_p0 }
   0x8   :  { %6692 = shalt.err (!%p6689_p2)
}
   0x9   :  { %s6693_s18 = scalar_lea.vmem %s39_s10, 18432  ;;  %p6698_p4 = scmp.lt.s32.totalorder %s39_s10, %s39_s10 }
   0xa   :  { %p6694_p3 = scmp.ne.s32.totalorder %s39_s10, %s6693_s18  ;;  %p6699_p5 = scmp.lt.s32.totalorder %s6693_s18, %s6693_s18 }
   0xc   :  { %p6700_p6 = por %p6699_p5, %p6698_p4 }
   0xe   :  { %p6701_p7 = pnand %p6700_p6, %p6694_p3 }
  0x10   :  { %6704 = shalt.err (!%p6701_p7)
}
  0x11   :  { %s6778_s19 = smov 192   ;;  %s6779_s20 = smov 12  }
  0x12   :  { %44 = dma.hbm_to_vmem [thread:$0]  %s8549_s3, 18432, %s39_s10, [#allocation6], %s6778_s19, %s6778_s19, %s6779_s20  }
  0x13   :  { %s6780_s23 = smov [#allocation2]   ;;  %s6705_s27 = scalar_lea.hbm %s8547_s1, 3072 }
  0x14   :  { %s24_s24 = sshll.u32 %s6780_s23, 4  ;;  %p6706_p8 = scmp.ne.s32.totalorder %s8547_s1, %s6705_s27  ;;  %s25_s24 = int_to_ptr.vmem [resolvable:$true] %s24_s24 }
  0x15   :  { %p6709_p9 = scmp.lt.u32.totalorder %s6705_s27, %s8547_s1 }
  0x17   :  { %p6711_p10 = pnand %p6709_p9, %p6706_p8 }
  0x19   :  { %6714 = shalt.err (!%p6711_p10)
}
  0x1a   :  { %s6715_s12 = scalar_lea.vmem %s25_s24, 3072  ;;  %p6720_p12 = scmp.lt.s32.totalorder %s25_s24, %s25_s24 }
  0x1b   :  { %p6716_p11 = scmp.ne.s32.totalorder %s25_s24, %s6715_s12  ;;  %p6721_p13 = scmp.lt.s32.totalorder %s6715_s12, %s6715_s12 }
  0x1d   :  { %p6722_p0 = por %p6721_p13, %p6720_p12 }
  0x1f   :  { %p6723_p1 = pnand %p6722_p0, %p6716_p11 }
  0x21   :  { %6726 = shalt.err (!%p6723_p1)
}
  0x22   :  { %s6781_s3 = smov 384   ;;  %s6782_s10 = smov 24  }
  0x23   :  { %30 = dma.hbm_to_vmem [thread:$0]  %s8547_s1, 3072, %s25_s24, [#allocation3], %s6781_s3, %s6781_s3, %s6782_s10  }
  0x24   :  { %s6783_s15 = smov [#allocation7]   ;;  %s6727_s21 = scalar_lea.hbm %s8551_s5, 9216 }
  0x25   :  { %s52_s16 = sshll.u32 %s6783_s15, 4  ;;  %p6728_p2 = scmp.ne.s32.totalorder %s8551_s5, %s6727_s21  ;;  %s53_s16 = int_to_ptr.vmem [resolvable:$true] %s52_s16 }
  0x26   :  { %p6731_p3 = scmp.lt.u32.totalorder %s6727_s21, %s8551_s5 }
  0x28   :  { %p6733_p4 = pnand %p6731_p3, %p6728_p2 }
  0x2a   :  { %6736 = shalt.err (!%p6733_p4)
}
  0x2b   :  { %s6737_s27 = scalar_lea.vmem %s53_s16, 9216  ;;  %p6742_p6 = scmp.lt.s32.totalorder %s53_s16, %s53_s16 }
  0x2c   :  { %p6738_p5 = scmp.ne.s32.totalorder %s53_s16, %s6737_s27  ;;  %p6743_p7 = scmp.lt.s32.totalorder %s6737_s27, %s6737_s27 }
  0x2e   :  { %p6744_p8 = por %p6743_p7, %p6742_p6 }
  0x30   :  { %p6745_p9 = pnand %p6744_p8, %p6738_p5 }
  0x32   :  { %6748 = shalt.err (!%p6745_p9)
}
  0x33   :  { %58 = dma.hbm_to_vmem [thread:$0]  %s8551_s5, 9216, %s53_s16, [#allocation6], %s6778_s19, %s6778_s19, %s6779_s20  }
  0x34   :  { %6771 = dma.done.wait [#allocation3], 3072  }
  0x35   :  { %6772 = vsyncadd [#allocation3], 4294964224 }
  0x36   :  { %6773 = dma.done.wait [#allocation6], 27648  }
  0x37   :  { %6774 = vsyncadd [#allocation6], 4294939648  ;;  %v8556_v0 = vmov 0   ;;  %v6358_v1 = vld [vmem:[#allocation2 + $0x4] ss:$24 sps:$4 sm:$0xff]   ;;  %v76_v10 = vld [vmem:[%s8546_s0 + $0x8] sm:$0xff] }
  0x38   :  { %380 = vmatprep.mubr.bf16.mxu0 %v8556_v0  ;;  %573 = vmatprep.mubr.bf16.mxu1 %v8556_v0  ;;  %v6360_v2 = vld [vmem:[#allocation2] ss:$24 sps:$4 sm:$0xff]   ;;  %v6361_v3 = vld [vmem:[#allocation2 + $0x34] ss:$24 sps:$4 sm:$0xff]   ;;  %v6363_v4 = vld [vmem:[#allocation2 + $0x30] ss:$24 sps:$4 sm:$0xff]  }
  0x39   :  { %348 = vmatprep.subr.bf16.mxu0 %v6358_v1  ;;  %v6364_v5 = vld [vmem:[#allocation2 + $0x64] ss:$24 sps:$4 sm:$0xff]   ;;  %v6366_v6 = vld [vmem:[#allocation2 + $0x60] ss:$24 sps:$4 sm:$0xff]   ;;  %v6367_v7 = vld [vmem:[#allocation2 + $0x94] ss:$24 sps:$4 sm:$0xff]  }
  0x3a   :  { %349 = vmatpush1.bf16.msra.mxu0 %v6360_v2  ;;  %v6369_v8 = vld [vmem:[#allocation2 + $0x90] ss:$24 sps:$4 sm:$0xff]   ;;  %v75_v9 = vld [vmem:[%s8546_s0] sm:$0xff]  ;;  %v6373_v14 = vld [vmem:[#allocation2 + $0x3c] ss:$24 sps:$4 sm:$0xff]   ;;  %vm299_vm0 = vcmask 523264  }
  0x3b   :  { %350 = vmatprep.subr.bf16.mxu0 %v6361_v3  ;;  %v6370_v11 = vld [vmem:[#allocation2 + $0xc] ss:$24 sps:$4 sm:$0xff]   ;;  %v6372_v12 = vld [vmem:[#allocation2 + $0x8] ss:$24 sps:$4 sm:$0xff]   ;;  %v6892_v13 = vpack.c.bf16 %v76_v10, %v75_v9  ;;  %v6375_v15 = vld [vmem:[#allocation2 + $0x38] ss:$24 sps:$4 sm:$0xff]  }
  0x3c   :  { %541 = vmatprep.subr.bf16.mxu1 %v6370_v11  ;;  %v6376_v16 = vld [vmem:[#allocation2 + $0x6c] ss:$24 sps:$4 sm:$0xff]   ;;  %v77_v17 = vld [vmem:[%s8546_s0 + $0x10] sm:$0xff]  ;;  %v78_v18 = vld [vmem:[%s8546_s0 + $0x18] sm:$0xff]  ;;  %vm4825_vm1 = vcmask 1040384   ;;  %vm6786_vm2 = vmmov 0  }
  0x3d   :  { %542 = vmatpush1.bf16.msra.mxu1 %v6372_v12  ;;  %v6378_v19 = vld [vmem:[#allocation2 + $0x68] ss:$24 sps:$4 sm:$0xff]   ;;  %v6384_v21 = vld [vmem:[#allocation2 + $0x14] ss:$24 sps:$4 sm:$0xff]   ;;  %v6903_v23 = vpack.c.bf16 %v78_v18, %v77_v17  ;;  %v6381_v24 = vld [vmem:[#allocation2 + $0x98] ss:$24 sps:$4 sm:$0xff]  }
  0x3e   :  { %351 = vmatpush1.bf16.msra.mxu0 %v6363_v4  ;;  %543 = vmatprep.subr.bf16.mxu1 %v6373_v14  ;;  %v6382_v20 = vld [vmem:[#allocation2 + $0x10] ss:$24 sps:$4 sm:$0xff]   ;;  %v6379_v22 = vld [vmem:[#allocation2 + $0x9c] ss:$24 sps:$4 sm:$0xff]   ;;  %v79_v26 = vld [vmem:[%s8546_s0 + $0x20] sm:$0xff] }
  0x3f   :  { %352 = vmatprep.subr.bf16.mxu0 %v6364_v5  ;;  %v6387_v25 = vld [vmem:[#allocation5 + $0x4] ss:$12 sps:$4 sm:$0xff]   ;;  %v80_v27 = vld [vmem:[%s8546_s0 + $0x28] sm:$0xff]  ;;  %v6394_v29 = vld [vmem:[#allocation2 + $0x40] ss:$24 sps:$4 sm:$0xff]  }
  0x40   :  { %v6385_v28 = vld [vmem:[#allocation5] ss:$12 sps:$4 sm:$0xff]   ;;  %v6396_v30 = vld [vmem:[#allocation2 + $0x44] ss:$24 sps:$4 sm:$0xff]   ;;  %v6914_v32 = vpack.c.bf16 %v80_v27, %v79_v26  ;;  %v6400_v36 = vld [vmem:[#allocation2 + $0x70] ss:$24 sps:$4 sm:$0xff]  }
  0x41   :  { %544 = vmatpush1.bf16.msra.mxu1 %v6375_v15  ;;  %v6390_v31 = vld [vmem:[#allocation5 + $0x1c] ss:$12 sps:$4 sm:$0xff]   ;;  %v6402_v33 = vld [vmem:[#allocation2 + $0x74] ss:$24 sps:$4 sm:$0xff]   ;;  %v6388_v34 = vld [vmem:[#allocation5 + $0x18] ss:$12 sps:$4 sm:$0xff]  }
  0x42   :  { %353 = vmatpush1.bf16.msra.mxu0 %v6366_v6  ;;  %545 = vmatprep.subr.bf16.mxu1 %v6376_v16  ;;  %v6393_v35 = vld [vmem:[#allocation5 + $0x34] ss:$12 sps:$4 sm:$0xff]   ;;  %v6405_v37 = vld [vmem:[#allocation2 + $0xa4] ss:$24 sps:$4 sm:$0xff]   ;;  %v6399_v41 = vld [vmem:[#allocation5 + $0x4c] ss:$12 sps:$4 sm:$0xff]  }
  0x43   :  { %354 = vmatprep.subr.bf16.mxu0 %v6367_v7  ;;  %v81_v38 = vld [vmem:[%s8546_s0 + $0x30] sm:$0xff]  ;;  %v82_v39 = vld [vmem:[%s8546_s0 + $0x38] sm:$0xff]  ;;  %v83_v46 = vld [vmem:[%s8546_s0 + $0x40] sm:$0xff] }
  0x44   :  { %v6391_v40 = vld [vmem:[#allocation5 + $0x30] ss:$12 sps:$4 sm:$0xff]   ;;  %v6403_v42 = vld [vmem:[#allocation2 + $0xa0] ss:$24 sps:$4 sm:$0xff]   ;;  %v6397_v43 = vld [vmem:[#allocation5 + $0x48] ss:$12 sps:$4 sm:$0xff]   ;;  %v6928_v44 = vpack.c.bf16 %v82_v39, %v81_v38 }
  0x45   :  { %546 = vmatpush1.bf16.msra.mxu1 %v6378_v19  ;;  %v6408_v45 = vld [vmem:[#allocation5 + $0x64] ss:$12 sps:$4 sm:$0xff]   ;;  %v84_v47 = vld [vmem:[%s8546_s0 + $0x48] sm:$0xff]  ;;  %v6414_v52 = vld [vmem:[#allocation5 + $0x94] ss:$12 sps:$4 sm:$0xff]  }
  0x46   :  { %355 = vmatpush1.bf16.msra.mxu0 %v6369_v8  ;;  %547 = vmatprep.subr.bf16.mxu1 %v6379_v22  ;;  %v6406_v48 = vld [vmem:[#allocation5 + $0x60] ss:$12 sps:$4 sm:$0xff]   ;;  %v6411_v49 = vld [vmem:[#allocation5 + $0x7c] ss:$12 sps:$4 sm:$0xff]   ;;  %v6409_v50 = vld [vmem:[#allocation5 + $0x78] ss:$12 sps:$4 sm:$0xff]   ;;  %v6942_v51 = vpack.c.bf16 %v84_v47, %v83_v46 }
  0x47   :  { %734 = vmatprep.subr.bf16.mxu0 %v6384_v21  ;;  %v85_v53 = vld [vmem:[%s8546_s0 + $0x50] sm:$0xff]  ;;  %v86_v54 = vld [vmem:[%s8546_s0 + $0x58] sm:$0xff]  ;;  %v87_v60 = vld [vmem:[%s8546_s0 + $0x60] sm:$0xff] }
  0x48   :  { %v6412_v55 = vld [vmem:[#allocation5 + $0x90] ss:$12 sps:$4 sm:$0xff]   ;;  %v6417_v56 = vld [vmem:[#allocation5 + $0xac] ss:$12 sps:$4 sm:$0xff]   ;;  %v6415_v57 = vld [vmem:[#allocation5 + $0xa8] ss:$12 sps:$4 sm:$0xff]   ;;  %v6956_v58 = vpack.c.bf16 %v86_v54, %v85_v53 }
  0x49   :  { %5093 = vmatmul.mubr.msk.bf16.vlgmr.msra.gmra.mrb[0].mxu0 %vm299_vm0, %v6892_v13  ;;  %548 = vmatpush1.bf16.msra.mxu1 %v6381_v24  ;;  %v6420_v59 = vld [vmem:[#allocation5 + $0xc4] ss:$12 sps:$4 sm:$0xff]   ;;  %v88_v61 = vld [vmem:[%s8546_s0 + $0x68] sm:$0xff]  ;;  %v6426_v3 = vld [vmem:[#allocation5 + $0xf4] ss:$12 sps:$4 sm:$0xff]  }
  0x4a   :  { %390 = vmatprep.mubr.bf16.mxu0 %v8556_v0  ;;  %735 = vmatpush1.bf16.msra.mxu0 %v6382_v20  ;;  %v6418_v62 = vld [vmem:[#allocation5 + $0xc0] ss:$12 sps:$4 sm:$0xff]   ;;  %v6423_v63 = vld [vmem:[#allocation5 + $0xdc] ss:$12 sps:$4 sm:$0xff]   ;;  %v6421_v1 = vld [vmem:[#allocation5 + $0xd8] ss:$12 sps:$4 sm:$0xff]   ;;  %v6970_v2 = vpack.c.bf16 %v88_v61, %v87_v60 }
  0x4b   :  { %2192 = vmatprep.subr.bf16.mxu1 %v6387_v25  ;;  %736 = vmatprep.subr.bf16.mxu0 %v6396_v30  ;;  %v89_v4 = vld [vmem:[%s8546_s0 + $0x70] sm:$0xff]  ;;  %v90_v5 = vld [vmem:[%s8546_s0 + $0x78] sm:$0xff]  ;;  %v91_v10 = vld [vmem:[%s8546_s0 + $0x80] sm:$0xff] }
  0x4c   :  { %5109 = vmatmul.mubr.msk.bf16.vlgmr.msra.gmra.mrb[0].mxu1 %vm299_vm0, %v6892_v13  ;;  %v6424_v6 = vld [vmem:[#allocation5 + $0xf0] ss:$12 sps:$4 sm:$0xff]   ;;  %v6429_v7 = vld [vmem:[#allocation5 + $0x10c] ss:$12 sps:$4 sm:$0xff]   ;;  %v6427_v8 = vld [vmem:[#allocation5 + $0x108] ss:$12 sps:$4 sm:$0xff]   ;;  %v6984_v9 = vpack.c.bf16 %v90_v5, %v89_v4 }
  0x4d   :  { %2193 = vmatpush1.bf16.msra.mxu1 %v6385_v28  ;;  %583 = vmatprep.mubr.bf16.mxu1 %v8556_v0  ;;  %v92_v11 = vld [vmem:[%s8546_s0 + $0x88] sm:$0xff]  ;;  %v6432_v14 = vld [vmem:[#allocation5 + $0x124] ss:$12 sps:$4 sm:$0xff]   ;;  %v94_v17 = vld [vmem:[%s8546_s0 + $0x98] sm:$0xff] }
  0x4e   :  { %737 = vmatpush1.bf16.msra.mxu0 %v6394_v29  ;;  %2194 = vmatprep.subr.bf16.mxu1 %v6390_v31  ;;  %v6430_v12 = vld [vmem:[#allocation5 + $0x120] ss:$12 sps:$4 sm:$0xff]   ;;  %v6998_v15 = vpack.c.bf16 %v92_v11, %v91_v10  ;;  %v93_v16 = vld [vmem:[%s8546_s0 + $0x90] sm:$0xff]  ;;  %v6433_v18 = vld [vmem:[#allocation5 + $0x138] ss:$12 sps:$4 sm:$0xff]  }
  0x4f   :  { %738 = vmatprep.subr.bf16.mxu0 %v6402_v33  ;;  %v6435_v19 = vld [vmem:[#allocation5 + $0x13c] ss:$12 sps:$4 sm:$0xff]   ;;  %v7012_v20 = vpack.c.bf16 %v94_v17, %v93_v16  ;;  %v95_v21 = vld [vmem:[%s8546_s0 + $0xa0] sm:$0xff]  ;;  %v97_v27 = vld [vmem:[%s8546_s0 + $0xb0] sm:$0xff] }
  0x50   :  { %v96_v22 = vld [vmem:[%s8546_s0 + $0xa8] sm:$0xff]  ;;  %v6436_v24 = vld [vmem:[#allocation5 + $0x150] ss:$12 sps:$4 sm:$0xff]   ;;  %v6438_v25 = vld [vmem:[#allocation5 + $0x154] ss:$12 sps:$4 sm:$0xff]  }
  0x51   :  { %5094 = vmatmul.mubr.msk.bf16.gmra.mrb[4].mxu0 %vm299_vm0, %v6903_v23  ;;  %2195 = vmatpush1.bf16.msra.mxu1 %v6388_v34  ;;  %v7026_v26 = vpack.c.bf16 %v96_v22, %v95_v21  ;;  %v98_v28 = vld [vmem:[%s8546_s0 + $0xb8] sm:$0xff]  ;;  %v99_v30 = vld [vmem:[%s8546_s0 + $0xc0] sm:$0xff]  ;;  %v100_v31 = vld [vmem:[%s8546_s0 + $0xc8] sm:$0xff] }
  0x52   :  { %400 = vmatprep.mubr.bf16.mxu0 %v8556_v0  ;;  %2196 = vmatprep.subr.bf16.mxu1 %v6393_v35  ;;  %v7040_v29 = vpack.c.bf16 %v98_v28, %v97_v27  ;;  %v6441_v33 = vld [vmem:[#allocation5 + $0x16c] ss:$12 sps:$4 sm:$0xff]   ;;  %v6439_v34 = vld [vmem:[#allocation5 + $0x168] ss:$12 sps:$4 sm:$0xff]   ;;  %v7054_v35 = vpack.c.bf16 %v100_v31, %v99_v30  ;;  %v6445_v39 = vld [vmem:[#allocation5 + $0x184] ss:$12 sps:$4 sm:$0xff]  }
  0x53   :  { %739 = vmatpush1.bf16.msra.mxu0 %v6400_v36  ;;  %v6442_v36 = vld [vmem:[#allocation5 + $0xc8] ss:$12 sps:$4 sm:$0xff]   ;;  %v102_v38 = vld [vmem:[%s8546_s0 + $0xd8] sm:$0xff]  ;;  %v6443_v22 = vld [vmem:[#allocation5 + $0x180] ss:$12 sps:$4 sm:$0xff]  }
  0x54   :  { %740 = vmatprep.subr.bf16.mxu0 %v6405_v37  ;;  %5110 = vmatmul.mubr.msk.bf16.gmra.mrb[4].mxu1 %vm299_vm0, %v6903_v23  ;;  %v101_v37 = vld [vmem:[%s8546_s0 + $0xd0] sm:$0xff]  ;;  %v106_v46 = vld [vmem:[%s8546_s0 + $0xf8] sm:$0xff] }
  0x55   :  { %593 = vmatprep.mubr.bf16.mxu1 %v8556_v0  ;;  %2197 = vmatpush1.bf16.msra.mxu1 %v6391_v40  ;;  %v7068_v40 = vpack.c.bf16 %v102_v38, %v101_v37  ;;  %v6453_v53 = vld [vmem:[#allocation5 + $0x38] ss:$12 sps:$4 sm:$0xff]   ;;  %v6454_v54 = vld [vmem:[#allocation5 + $0x110] ss:$12 sps:$4 sm:$0xff]  }
  0x56   :  { %2198 = vmatprep.subr.bf16.mxu1 %v6399_v41  ;;  %v103_v41 = vld [vmem:[%s8546_s0 + $0xe0] sm:$0xff]  ;;  %v6468_v61 = vld [vmem:[#allocation5 + $0x170] ss:$12 sps:$4 sm:$0xff]  }
  0x57   :  { %741 = vmatpush1.bf16.msra.mxu0 %v6403_v42  ;;  %v104_v42 = vld [vmem:[%s8546_s0 + $0xe8] sm:$0xff]  ;;  %v6466_v60 = vld [vmem:[#allocation5 + $0x158] ss:$12 sps:$4 sm:$0xff]  }
  0x58   :  { %5360 = vmatprep.subr.bf16.mxu0 %v6442_v36  ;;  %v6448_v36 = vld [vmem:[#allocation5 + $0x198] ss:$12 sps:$4 sm:$0xff]  }
  0x59   :  { %5095 = vmatmul.mubr.msk.bf16.gmra.mrb[8].mxu0 %vm299_vm0, %v6914_v32  ;;  %2199 = vmatpush1.bf16.msra.mxu1 %v6397_v43  ;;  %v7082_v43 = vpack.c.bf16 %v104_v42, %v103_v41  ;;  %v6457_v41 = vld [vmem:[#allocation5 + $0x1b4] ss:$12 sps:$4 sm:$0xff]  }
  0x5a   :  { %410 = vmatprep.mubr.bf16.mxu0 %v8556_v0  ;;  %2200 = vmatprep.subr.bf16.mxu1 %v6408_v45  ;;  %v105_v45 = vld [vmem:[%s8546_s0 + $0xf0] sm:$0xff] }
  0x5b   :  { %v7096_v47 = vpack.c.bf16 %v106_v46, %v105_v45 }
  0x5c   :  { %5111 = vmatmul.mubr.msk.bf16.gmra.mrb[8].mxu1 %vm299_vm0, %v6914_v32 }
  0x5d   :  { %603 = vmatprep.mubr.bf16.mxu1 %v8556_v0  ;;  %2201 = vmatpush1.bf16.msra.mxu1 %v6406_v48  ;;  %v6446_v48 = vld [vmem:[#allocation5 + $0x8] ss:$12 sps:$4 sm:$0xff]  }
  0x5e   :  { %2202 = vmatprep.subr.bf16.mxu1 %v6411_v49  ;;  %v6447_v49 = vld [vmem:[#allocation5 + $0xe0] ss:$12 sps:$4 sm:$0xff]  }
  0x61   :  { %5096 = vmatmul.mubr.msk.bf16.gmra.mrb[12].mxu0 %vm299_vm0, %v6928_v44  ;;  %2203 = vmatpush1.bf16.msra.mxu1 %v6409_v50  ;;  %v6451_v50 = vld [vmem:[#allocation5 + $0x20] ss:$12 sps:$4 sm:$0xff]  }
  0x62   :  { %420 = vmatprep.mubr.bf16.mxu0 %v8556_v0  ;;  %2204 = vmatprep.subr.bf16.mxu1 %v6414_v52  ;;  %v6452_v52 = vld [vmem:[#allocation5 + $0xf8] ss:$12 sps:$4 sm:$0xff]  }
  0x64   :  { %5112 = vmatmul.mubr.msk.bf16.gmra.mrb[12].mxu1 %vm299_vm0, %v6928_v44 }
  0x65   :  { %613 = vmatprep.mubr.bf16.mxu1 %v8556_v0  ;;  %2205 = vmatpush1.bf16.msra.mxu1 %v6412_v55  ;;  %v6459_v55 = vld [vmem:[#allocation5 + $0x128] ss:$12 sps:$4 sm:$0xff]  }
  0x66   :  { %2206 = vmatprep.subr.bf16.mxu1 %v6417_v56  ;;  %v6460_v56 = vld [vmem:[#allocation5 + $0x68] ss:$12 sps:$4 sm:$0xff]  }
  0x69   :  { %5097 = vmatmul.mubr.msk.bf16.gmra.mrb[16].mxu0 %vm299_vm0, %v6942_v51  ;;  %2207 = vmatpush1.bf16.msra.mxu1 %v6415_v57  ;;  %v6461_v57 = vld [vmem:[#allocation5 + $0x140] ss:$12 sps:$4 sm:$0xff]  }
  0x6a   :  { %430 = vmatprep.mubr.bf16.mxu0 %v8556_v0  ;;  %2208 = vmatprep.subr.bf16.mxu1 %v6420_v59  ;;  %v6465_v59 = vld [vmem:[#allocation5 + $0x80] ss:$12 sps:$4 sm:$0xff]  }
  0x6c   :  { %5113 = vmatmul.mubr.msk.bf16.gmra.mrb[16].mxu1 %vm299_vm0, %v6942_v51 }
  0x6d   :  { %623 = vmatprep.mubr.bf16.mxu1 %v8556_v0  ;;  %2209 = vmatpush1.bf16.msra.mxu1 %v6418_v62  ;;  %v6472_v62 = vld [vmem:[#allocation5 + $0xb0] ss:$12 sps:$4 sm:$0xff]  }
  0x6e   :  { %2210 = vmatprep.subr.bf16.mxu1 %v6423_v63 }
  0x71   :  { %5098 = vmatmul.mubr.msk.bf16.gmra.mrb[20].mxu0 %vm299_vm0, %v6956_v58  ;;  %2211 = vmatpush1.bf16.msra.mxu1 %v6421_v1 }
  0x72   :  { %440 = vmatprep.mubr.bf16.mxu0 %v8556_v0  ;;  %2212 = vmatprep.subr.bf16.mxu1 %v6426_v3 }
  0x74   :  { %5114 = vmatmul.mubr.msk.bf16.gmra.mrb[20].mxu1 %vm299_vm0, %v6956_v58 }
  0x75   :  { %633 = vmatprep.mubr.bf16.mxu1 %v8556_v0  ;;  %2213 = vmatpush1.bf16.msra.mxu1 %v6424_v6 }
  0x76   :  { %2214 = vmatprep.subr.bf16.mxu1 %v6429_v7 }
  0x79   :  { %5099 = vmatmul.mubr.msk.bf16.gmra.mrb[24].mxu0 %vm299_vm0, %v6970_v2  ;;  %2215 = vmatpush1.bf16.msra.mxu1 %v6427_v8 }
  0x7a   :  { %450 = vmatprep.mubr.bf16.mxu0 %v8556_v0  ;;  %2216 = vmatprep.subr.bf16.mxu1 %v6432_v14 }
  0x7c   :  { %5115 = vmatmul.mubr.msk.bf16.gmra.mrb[24].mxu1 %vm299_vm0, %v6970_v2 }
  0x7d   :  { %643 = vmatprep.mubr.bf16.mxu1 %v8556_v0  ;;  %2217 = vmatpush1.bf16.msra.mxu1 %v6430_v12 }
  0x7e   :  { %2218 = vmatprep.subr.bf16.mxu1 %v6435_v19 }
  0x81   :  { %5100 = vmatmul.mubr.msk.bf16.gmra.mrb[28].mxu0 %vm299_vm0, %v6984_v9  ;;  %2219 = vmatpush1.bf16.msra.mxu1 %v6433_v18  ;;  %v6506_v18 = vld [vmem:[#allocation5 + $0x248] ss:$12 sps:$4 sm:$0xff]  }
  0x82   :  { %460 = vmatprep.mubr.bf16.mxu0 %v8556_v0  ;;  %2220 = vmatprep.subr.bf16.mxu1 %v6438_v25 }
  0x84   :  { %5116 = vmatmul.mubr.msk.bf16.gmra.mrb[28].mxu1 %vm299_vm0, %v6984_v9 }
  0x85   :  { %653 = vmatprep.mubr.bf16.mxu1 %v8556_v0  ;;  %2221 = vmatpush1.bf16.msra.mxu1 %v6436_v24 }
  0x86   :  { %2222 = vmatprep.subr.bf16.mxu1 %v6441_v33 }
  0x89   :  { %5101 = vmatmul.mubr.msk.bf16.gmra.mrb[32].mxu0 %vm299_vm0, %v6998_v15  ;;  %2223 = vmatpush1.bf16.msra.mxu1 %v6439_v34 }
  0x8a   :  { %470 = vmatprep.mubr.bf16.mxu0 %v8556_v0  ;;  %2385 = vmatprep.subr.bf16.mxu1 %v6445_v39 }
  0x8c   :  { %5117 = vmatmul.mubr.msk.bf16.gmra.mrb[32].mxu1 %vm299_vm0, %v6998_v15 }
  0x8d   :  { %663 = vmatprep.mubr.bf16.mxu1 %v8556_v0 }
  0x91   :  { %5102 = vmatmul.mubr.msk.bf16.gmra.mrb[36].mxu0 %vm299_vm0, %v7012_v20 }
  0x92   :  { %480 = vmatprep.mubr.bf16.mxu0 %v8556_v0 }
  0x94   :  { %5118 = vmatmul.mubr.msk.bf16.gmra.mrb[36].mxu1 %vm299_vm0, %v7012_v20 }
  0x95   :  { %673 = vmatprep.mubr.bf16.mxu1 %v8556_v0 }
  0x99   :  { %5103 = vmatmul.mubr.msk.bf16.gmra.mrb[40].mxu0 %vm299_vm0, %v7026_v26 }
  0x9a   :  { %490 = vmatprep.mubr.bf16.mxu0 %v8556_v0 }
  0x9c   :  { %5119 = vmatmul.mubr.msk.bf16.gmra.mrb[40].mxu1 %vm299_vm0, %v7026_v26 }
  0x9d   :  { %683 = vmatprep.mubr.bf16.mxu1 %v8556_v0 }
  0xa1   :  { %5104 = vmatmul.mubr.msk.bf16.gmra.mrb[44].mxu0 %vm299_vm0, %v7040_v29 }
  0xa2   :  { %500 = vmatprep.mubr.bf16.mxu0 %v8556_v0 }
  0xa4   :  { %5120 = vmatmul.mubr.msk.bf16.gmra.mrb[44].mxu1 %vm299_vm0, %v7040_v29 }
  0xa5   :  { %693 = vmatprep.mubr.bf16.mxu1 %v8556_v0 }
  0xa9   :  { %5105 = vmatmul.mubr.msk.bf16.gmra.mrb[48].mxu0 %vm299_vm0, %v7054_v35 }
  0xaa   :  { %510 = vmatprep.mubr.bf16.mxu0 %v8556_v0 }
  0xac   :  { %5121 = vmatmul.mubr.msk.bf16.gmra.mrb[48].mxu1 %vm299_vm0, %v7054_v35 }
  0xad   :  { %703 = vmatprep.mubr.bf16.mxu1 %v8556_v0 }
  0xb1   :  { %5106 = vmatmul.mubr.msk.bf16.gmra.mrb[52].mxu0 %vm299_vm0, %v7068_v40 }
  0xb2   :  { %520 = vmatprep.mubr.bf16.mxu0 %v8556_v0 }
  0xb4   :  { %5122 = vmatmul.mubr.msk.bf16.gmra.mrb[52].mxu1 %vm299_vm0, %v7068_v40 }
  0xb5   :  { %713 = vmatprep.mubr.bf16.mxu1 %v8556_v0 }
  0xb9   :  { %5107 = vmatmul.mubr.msk.bf16.gmra.mrb[56].mxu0 %vm299_vm0, %v7082_v43 }
  0xba   :  { %530 = vmatprep.mubr.bf16.mxu0 %v8556_v0 }
  0xbc   :  { %5123 = vmatmul.mubr.msk.bf16.gmra.mrb[56].mxu1 %vm299_vm0, %v7082_v43 }
  0xbd   :  { %723 = vmatprep.mubr.bf16.mxu1 %v8556_v0 }
  0xc1   :  { %5108 = vmatmul.mubr.msk.bf16.gmra.mrb[60].mxu0 %vm299_vm0, %v7096_v47 }
  0xc2   :  { %766 = vmatprep.mubr.bf16.mxu0 %v8556_v0 }
  0xc4   :  { %5124 = vmatmul.mubr.msk.bf16.gmra.mrb[60].mxu1 %vm299_vm0, %v7096_v47 }
  0xc9   :  { %5125 = vmatmul.mubr.msk.bf16.vlgmr.msra.gmra.mrb[64].mxu0 %vm299_vm0, %v6892_v13  ;;  %v6458_v13 = vld [vmem:[#allocation5 + $0x50] ss:$12 sps:$4 sm:$0xff]  }
  0xca   :  { %776 = vmatprep.mubr.bf16.mxu0 %v8556_v0  ;;  %5361 = vmatpush3.bf16.msra.mxu0 %v6446_v48 }
  0xcb   :  { %5362 = vmatprep.subr.bf16.mxu0 %v6447_v49 }
  0xce   :  { %5363 = vmatpush3.bf16.msra.mxu0 %v6451_v50 }
  0xcf   :  { %5364 = vmatprep.subr.bf16.mxu0 %v6452_v52 }
  0xd1   :  { %5126 = vmatmul.mubr.msk.bf16.gmra.mrb[68].mxu0 %vm299_vm0, %v6903_v23  ;;  %v6467_v23 = vld [vmem:[#allocation5 + $0x98] ss:$12 sps:$4 sm:$0xff]  }
  0xd2   :  { %786 = vmatprep.mubr.bf16.mxu0 %v8556_v0  ;;  %5365 = vmatpush3.bf16.msra.mxu0 %v6453_v53 }
  0xd3   :  { %5366 = vmatprep.subr.bf16.mxu0 %v6454_v54 }
  0xd6   :  { %5367 = vmatpush3.bf16.msra.mxu0 %v6458_v13 }
  0xd7   :  { %5368 = vmatprep.subr.bf16.mxu0 %v6459_v55 }
  0xd9   :  { %5127 = vmatmul.mubr.msk.bf16.gmra.mrb[72].mxu0 %vm299_vm0, %v6914_v32  ;;  %v149_v32 = vlaneseq }
  0xda   :  { %796 = vmatprep.mubr.bf16.mxu0 %v8556_v0  ;;  %5369 = vmatpush3.bf16.msra.mxu0 %v6460_v56  ;;  %v6455_v56 = vld [vmem:[#allocation5 + $0x1b0] ss:$12 sps:$4 sm:$0xff]  }
  0xdb   :  { %5370 = vmatprep.subr.bf16.mxu0 %v6461_v57 }
  0xde   :  { %5371 = vmatpush3.bf16.msra.mxu0 %v6465_v59 }
  0xdf   :  { %5372 = vmatprep.subr.bf16.mxu0 %v6466_v60 }
  0xe1   :  { %5128 = vmatmul.mubr.msk.bf16.gmra.mrb[76].mxu0 %vm299_vm0, %v6928_v44  ;;  %v7138_v44 = vshrl.u32 %v149_v32, 7 }
  0xe2   :  { %806 = vmatprep.mubr.bf16.mxu0 %v8556_v0  ;;  %5373 = vmatpush3.bf16.msra.mxu0 %v6467_v23 }
  0xe3   :  { %5374 = vmatprep.subr.bf16.mxu0 %v6468_v61  ;;  %8563 = vst [vmem:[#allocation12_spill] sm:$0xff] %v7138_v44  ;;  %v7148_v63 = vsub.s32 1, %v7138_v44  ;;  %v7166_v14 = vsub.s32 2, %v7138_v44  ;;  %v163_v17 = vsub.s32 3, %v7138_v44  ;;  %v6464_v61 = vld [vmem:[#allocation5 + $0x1cc] ss:$12 sps:$4 sm:$0xff]  }
  0xe5   :  { %8565 = vst [vmem:[#allocation14_spill] sm:$0xff] %v7148_v63 }
  0xe6   :  { %5375 = vmatpush3.bf16.msra.mxu0 %v6472_v62 }
  0xe7   :  { %5472 = vmatprep.subr.bf16.mxu0 %v6506_v18 }
  0xe9   :  { %5129 = vmatmul.mubr.msk.bf16.gmra.mrb[80].mxu0 %vm299_vm0, %v6942_v51  ;;  %v7142_v51 = vsub.s32 0, %v7138_v44 }
  0xea   :  { %816 = vmatprep.mubr.bf16.mxu0 %v8556_v0 }
  0xeb   :  { %8564 = vst [vmem:[#allocation13_spill] sm:$0xff] %v7142_v51 }
  0xf1   :  { %5130 = vmatmul.mubr.msk.bf16.gmra.mrb[84].mxu0 %vm299_vm0, %v6956_v58  ;;  %v147_v58 = vld [vmem:[%s8548_s2] sm:$0x3f] }
  0xf2   :  { %826 = vmatprep.mubr.bf16.mxu0 %v8556_v0  ;;  %v7153_v1 = vrot.slane %v147_v58, %v7142_v51  ;;  %v7176_v27 = vrot.slane %v147_v58, %v7166_v14  ;;  %v7180_v30 = vrot.slane %v147_v58, %v163_v17 }
  0xf9   :  { %5131 = vmatmul.mubr.msk.bf16.gmra.mrb[88].mxu0 %vm299_vm0, %v6970_v2  ;;  %v7156_v2 = vrot.slane %v147_v58, %v7148_v63 }
  0xfa   :  { %836 = vmatprep.mubr.bf16.mxu0 %v8556_v0 }
 0x101   :  { %5132 = vmatmul.mubr.msk.bf16.gmra.mrb[92].mxu0 %vm299_vm0, %v6984_v9 }
 0x102   :  { %846 = vmatprep.mubr.bf16.mxu0 %v8556_v0 }
 0x109   :  { %5133 = vmatmul.mubr.msk.bf16.gmra.mrb[96].mxu0 %vm299_vm0, %v6998_v15 }
 0x10a   :  { %856 = vmatprep.mubr.bf16.mxu0 %v8556_v0 }
 0x111   :  { %5134 = vmatmul.mubr.msk.bf16.gmra.mrb[100].mxu0 %vm299_vm0, %v7012_v20 }
 0x112   :  { %866 = vmatprep.mubr.bf16.mxu0 %v8556_v0 }
 0x119   :  { %5135 = vmatmul.mubr.msk.bf16.gmra.mrb[104].mxu0 %vm299_vm0, %v7026_v26  ;;  %v6450_v26 = vld [vmem:[#allocation5 + $0x19c] ss:$12 sps:$4 sm:$0xff]  }
 0x11a   :  { %876 = vmatprep.mubr.bf16.mxu0 %v8556_v0 }
 0x11c   :  { %v382_v3 = vpop.f32.mrb[0].mxu0 }
 0x11d   :  { %v383_v4 = vadd.f32 %v382_v3, %v7153_v1  ;;  %v384_v5 = vpop.f32.mrb[1].mxu0 }
 0x11e   :  { %v385_v6 = vadd.f32 %v384_v5, %v7156_v2  ;;  %v386_v7 = vpop.f32.mrb[2].mxu0 }
 0x11f   :  { %v387_v8 = vadd.f32 %v386_v7, %v7153_v1  ;;  %v388_v9 = vpop.f32.mrb[3].mxu0  ;;  %v927_v11 = vmax.f32 %v383_v4, 0.0  ;;  %v575_v37 = vpop.f32.mrb[0].mxu1 }
 0x120   :  { %v389_v10 = vadd.f32 %v388_v9, %v7156_v2  ;;  %v928_v15 = vmax.f32 %v385_v6, 0.0  ;;  %v576_v42 = vadd.f32 %v575_v37, %v7176_v27  ;;  %v577_v45 = vpop.f32.mrb[1].mxu1 }
 0x121   :  { %v933_v12 = vmax.f32 %v387_v8, 0.0  ;;  %5136 = vmatmul.mubr.msk.bf16.gmra.mrb[108].mxu0 %vm299_vm0, %v7040_v29  ;;  %v578_v49 = vadd.f32 %v577_v45, %v7180_v30  ;;  %v579_v50 = vpop.f32.mrb[2].mxu1  ;;  %v6462_v8 = vld [vmem:[#allocation5 + $0x1c8] ss:$12 sps:$4 sm:$0xff]  }
 0x122   :  { %v934_v16 = vmax.f32 %v389_v10, 0.0  ;;  %886 = vmatprep.mubr.bf16.mxu0 %v8556_v0  ;;  %v929_v53 = vmax.f32 %v576_v42, 0.0  ;;  %v580_v54 = vadd.f32 %v579_v50, %v7176_v27  ;;  %v581_v13 = vpop.f32.mrb[3].mxu1 }
 0x123   :  { %v7170_v19 = vpack.c.bf16 %v933_v12, %v927_v11  ;;  %v930_v57 = vmax.f32 %v578_v49, 0.0  ;;  %v582_v59 = vadd.f32 %v581_v13, %v7180_v30 }
 0x124   :  { %v392_v20 = vpop.f32.mrb[4].mxu0  ;;  %v7172_v21 = vpack.c.bf16 %v934_v16, %v928_v15  ;;  %v935_v62 = vmax.f32 %v580_v54, 0.0  ;;  %v6471_v15 = vld [vmem:[#allocation5 + $0x1e4] ss:$12 sps:$4 sm:$0xff]  }
 0x125   :  { %v393_v24 = vadd.f32 %v392_v20, %v7153_v1  ;;  %v394_v25 = vpop.f32.mrb[5].mxu0  ;;  %v936_v3 = vmax.f32 %v582_v59, 0.0  ;;  %v6473_v54 = vld [vmem:[#allocation5 + $0x1f8] ss:$12 sps:$4 sm:$0xff]   ;;  %v6478_v59 = vld [vmem:[#allocation5 + $0x214] ss:$12 sps:$4 sm:$0xff]  }
 0x126   :  { %v395_v28 = vadd.f32 %v394_v25, %v7156_v2  ;;  %v396_v29 = vpop.f32.mrb[6].mxu0  ;;  %2224 = vmatprep.mubr.bf16.mxu1 %v7172_v21  ;;  %v7201_v6 = vpack.c.bf16 %v935_v62, %v929_v53 }
 0x127   :  { %v397_v31 = vadd.f32 %v396_v29, %v7153_v1  ;;  %v398_v33 = vpop.f32.mrb[7].mxu0  ;;  %2225 = vmatmul.mubr.bf16.vlgmr.msra.gmra.mrb[64].mxu1 %v7170_v19  ;;  %v939_v38 = vmax.f32 %v393_v24, 0.0  ;;  %v7204_v9 = vpack.c.bf16 %v936_v3, %v930_v57  ;;  %v585_v10 = vpop.f32.mrb[4].mxu1 }
 0x128   :  { %v399_v34 = vadd.f32 %v398_v33, %v7156_v2  ;;  %2386 = vmatpush1.bf16.msra.mxu1 %v6443_v22  ;;  %v940_v46 = vmax.f32 %v395_v28, 0.0  ;;  %v586_v16 = vadd.f32 %v585_v10, %v7176_v27  ;;  %v587_v17 = vpop.f32.mrb[5].mxu1  ;;  %v6469_v33 = vld [vmem:[#allocation5 + $0x1e0] ss:$12 sps:$4 sm:$0xff]   ;;  %v6476_v10 = vld [vmem:[#allocation5 + $0x210] ss:$12 sps:$4 sm:$0xff]  }
 0x129   :  { %v945_v39 = vmax.f32 %v397_v31, 0.0  ;;  %5137 = vmatmul.mubr.msk.bf16.gmra.mrb[112].mxu0 %vm299_vm0, %v7054_v35  ;;  %2387 = vmatprep.subr.bf16.mxu1 %v6450_v26  ;;  %v588_v22 = vadd.f32 %v587_v17, %v7180_v30  ;;  %v589_v24 = vpop.f32.mrb[6].mxu1  ;;  %v6481_v17 = vld [vmem:[#allocation5 + $0x22c] ss:$12 sps:$4 sm:$0xff]  }
 0x12a   :  { %v946_v48 = vmax.f32 %v399_v34, 0.0  ;;  %896 = vmatprep.mubr.bf16.mxu0 %v8556_v0  ;;  %v941_v26 = vmax.f32 %v586_v16, 0.0  ;;  %v590_v28 = vadd.f32 %v589_v24, %v7176_v27  ;;  %v591_v29 = vpop.f32.mrb[7].mxu1 }
 0x12b   :  { %v7190_v52 = vpack.c.bf16 %v945_v39, %v939_v38  ;;  %v942_v34 = vmax.f32 %v588_v22, 0.0  ;;  %v6475_v39 = vld [vmem:[#allocation5 + $0x1fc] ss:$12 sps:$4 sm:$0xff]  }
 0x12c   :  { %v402_v55 = vpop.f32.mrb[8].mxu0  ;;  %v7193_v35 = vpack.c.bf16 %v946_v48, %v940_v46  ;;  %2388 = vmatpush1.bf16.msra.mxu1 %v6448_v36  ;;  %v592_v36 = vadd.f32 %v591_v29, %v7180_v30 }
 0x12d   :  { %v403_v60 = vadd.f32 %v402_v55, %v7153_v1  ;;  %v404_v23 = vpop.f32.mrb[9].mxu0  ;;  %2389 = vmatprep.subr.bf16.mxu1 %v6457_v41  ;;  %v947_v41 = vmax.f32 %v590_v28, 0.0 }
 0x12e   :  { %v405_v32 = vadd.f32 %v404_v23, %v7156_v2  ;;  %v406_v58 = vpop.f32.mrb[10].mxu0  ;;  %2234 = vmatprep.mubr.bf16.mxu1 %v7193_v35  ;;  %v948_v46 = vmax.f32 %v592_v36, 0.0 }
 0x12f   :  { %v407_v4 = vadd.f32 %v406_v58, %v7153_v1  ;;  %v408_v5 = vpop.f32.mrb[11].mxu0  ;;  %2235 = vmatmul.mubr.bf16.gmra.mrb[68].mxu1 %v7190_v52  ;;  %v951_v11 = vmax.f32 %v403_v60, 0.0  ;;  %v7222_v50 = vpack.c.bf16 %v947_v41, %v941_v26  ;;  %v595_v55 = vpop.f32.mrb[8].mxu1 }
 0x130   :  { %v409_v7 = vadd.f32 %v408_v5, %v7156_v2  ;;  %2390 = vmatpush1.bf16.msra.mxu1 %v6455_v56  ;;  %v952_v18 = vmax.f32 %v405_v32, 0.0  ;;  %v7225_v13 = vpack.c.bf16 %v948_v46, %v942_v34  ;;  %v596_v60 = vadd.f32 %v595_v55, %v7176_v27  ;;  %v597_v23 = vpop.f32.mrb[9].mxu1 }
 0x131   :  { %v957_v12 = vmax.f32 %v407_v4, 0.0  ;;  %5138 = vmatmul.mubr.msk.bf16.gmra.mrb[116].mxu0 %vm299_vm0, %v7068_v40  ;;  %2391 = vmatprep.subr.bf16.mxu1 %v6464_v61  ;;  %v598_v32 = vadd.f32 %v597_v23, %v7180_v30  ;;  %v599_v58 = vpop.f32.mrb[10].mxu1 }
 0x132   :  { %v958_v20 = vmax.f32 %v409_v7, 0.0  ;;  %906 = vmatprep.mubr.bf16.mxu0 %v8556_v0  ;;  %v953_v4 = vmax.f32 %v596_v60, 0.0  ;;  %v600_v5 = vadd.f32 %v599_v58, %v7176_v27  ;;  %v601_v7 = vpop.f32.mrb[11].mxu1 }
 0x133   :  { %v7211_v25 = vpack.c.bf16 %v957_v12, %v951_v11  ;;  %v954_v11 = vmax.f32 %v598_v32, 0.0  ;;  %v602_v12 = vadd.f32 %v601_v7, %v7180_v30  ;;  %v6510_v7 = vld [vmem:[#allocation5 + $0x188] ss:$12 sps:$4 sm:$0xff]  }
 0x134   :  { %v412_v31 = vpop.f32.mrb[12].mxu0  ;;  %v7214_v40 = vpack.c.bf16 %v958_v20, %v952_v18  ;;  %2392 = vmatpush1.bf16.msra.mxu1 %v6462_v8  ;;  %v959_v18 = vmax.f32 %v600_v5, 0.0 }
 0x135   :  { %v413_v37 = vadd.f32 %v412_v31, %v7153_v1  ;;  %v414_v38 = vpop.f32.mrb[13].mxu0  ;;  %2393 = vmatprep.subr.bf16.mxu1 %v6471_v15  ;;  %v960_v24 = vmax.f32 %v602_v12, 0.0  ;;  %v6511_v12 = vld [vmem:[#allocation5 + $0x260] ss:$12 sps:$4 sm:$0xff]  }
 0x136   :  { %v415_v42 = vadd.f32 %v414_v38, %v7156_v2  ;;  %v416_v45 = vpop.f32.mrb[14].mxu0  ;;  %2244 = vmatprep.mubr.bf16.mxu1 %v7214_v40  ;;  %v7243_v29 = vpack.c.bf16 %v959_v18, %v953_v4 }
 0x137   :  { %v417_v48 = vadd.f32 %v416_v45, %v7153_v1  ;;  %v418_v49 = vpop.f32.mrb[15].mxu0  ;;  %2245 = vmatmul.mubr.bf16.gmra.mrb[72].mxu1 %v7211_v25  ;;  %v963_v56 = vmax.f32 %v413_v37, 0.0  ;;  %v7246_v34 = vpack.c.bf16 %v960_v24, %v954_v11  ;;  %v605_v36 = vpop.f32.mrb[12].mxu1  ;;  %v6490_v24 = vld [vmem:[#allocation5 + $0x274] ss:$12 sps:$4 sm:$0xff]  }
 0x138   :  { %v419_v53 = vadd.f32 %v418_v49, %v7156_v2  ;;  %2394 = vmatpush1.bf16.msra.mxu1 %v6469_v33  ;;  %v964_v61 = vmax.f32 %v415_v42, 0.0  ;;  %v6479_v33 = vld [vmem:[#allocation5 + $0x228] ss:$12 sps:$4 sm:$0xff]   ;;  %v606_v41 = vadd.f32 %v605_v36, %v7176_v27  ;;  %v607_v42 = vpop.f32.mrb[13].mxu1 }
 0x139   :  { %v969_v57 = vmax.f32 %v417_v48, 0.0  ;;  %5139 = vmatmul.mubr.msk.bf16.gmra.mrb[120].mxu0 %vm299_vm0, %v7082_v43  ;;  %2395 = vmatprep.subr.bf16.mxu1 %v6475_v39  ;;  %v6484_v39 = vld [vmem:[#allocation5 + $0x244] ss:$12 sps:$4 sm:$0xff]   ;;  %v608_v48 = vadd.f32 %v607_v42, %v7180_v30  ;;  %v609_v49 = vpop.f32.mrb[14].mxu1 }
 0x13a   :  { %v970_v62 = vmax.f32 %v419_v53, 0.0  ;;  %916 = vmatprep.mubr.bf16.mxu0 %v8556_v0  ;;  %v610_v55 = vadd.f32 %v609_v49, %v7176_v27  ;;  %v6488_v49 = vld [vmem:[#allocation5 + $0x270] ss:$12 sps:$4 sm:$0xff]  }
 0x13b   :  { %v7232_v3 = vpack.c.bf16 %v969_v57, %v963_v56  ;;  %v611_v56 = vpop.f32.mrb[15].mxu1  ;;  %v966_v60 = vmax.f32 %v608_v48, 0.0 }
 0x13c   :  { %v422_v8 = vpop.f32.mrb[16].mxu0  ;;  %v7235_v43 = vpack.c.bf16 %v970_v62, %v964_v61  ;;  %2396 = vmatpush1.bf16.msra.mxu1 %v6473_v54  ;;  %v965_v54 = vmax.f32 %v606_v41, 0.0  ;;  %v612_v23 = vadd.f32 %v611_v56, %v7180_v30  ;;  %v6487_v62 = vld [vmem:[#allocation5 + $0x25c] ss:$12 sps:$4 sm:$0xff]   ;;  %v971_v32 = vmax.f32 %v610_v55, 0.0 }
 0x13d   :  { %v423_v15 = vadd.f32 %v422_v8, %v7153_v1  ;;  %v424_v16 = vpop.f32.mrb[17].mxu0  ;;  %2397 = vmatprep.subr.bf16.mxu1 %v6478_v59  ;;  %v6482_v59 = vld [vmem:[#allocation5 + $0x240] ss:$12 sps:$4 sm:$0xff]  }
 0x13e   :  { %v425_v20 = vadd.f32 %v424_v16, %v7156_v2  ;;  %v426_v22 = vpop.f32.mrb[18].mxu0  ;;  %2254 = vmatprep.mubr.bf16.mxu1 %v7235_v43  ;;  %v972_v5 = vmax.f32 %v612_v23, 0.0  ;;  %v7264_v11 = vpack.c.bf16 %v971_v32, %v965_v54  ;;  %v6485_v16 = vld [vmem:[#allocation5 + $0x258] ss:$12 sps:$4 sm:$0xff]  }
 0x13f   :  { %v427_v26 = vadd.f32 %v426_v22, %v7153_v1  ;;  %v428_v28 = vpop.f32.mrb[19].mxu0  ;;  %2255 = vmatmul.mubr.bf16.gmra.mrb[76].mxu1 %v7232_v3  ;;  %v975_v37 = vmax.f32 %v423_v15, 0.0  ;;  %v615_v18 = vpop.f32.mrb[16].mxu1 }
 0x140   :  { %v429_v31 = vadd.f32 %v428_v28, %v7156_v2  ;;  %2398 = vmatpush1.bf16.msra.mxu1 %v6476_v10  ;;  %v976_v45 = vmax.f32 %v425_v20, 0.0  ;;  %v617_v28 = vpop.f32.mrb[17].mxu1 }
 0x141   :  { %v981_v38 = vmax.f32 %v427_v26, 0.0  ;;  %5140 = vmatmul.mubr.msk.bf16.gmra.mrb[124].mxu0 %vm299_vm0, %v7096_v47  ;;  %2399 = vmatprep.subr.bf16.mxu1 %v6481_v17  ;;  %v7267_v17 = vpack.c.bf16 %v972_v5, %v966_v60  ;;  %v616_v26 = vadd.f32 %v615_v18, %v7176_v27  ;;  %v618_v36 = vadd.f32 %v617_v28, %v7180_v30 }
 0x142   :  { %v982_v46 = vmax.f32 %v429_v31, 0.0  ;;  %2803 = vmatprep.mubr.bf16.mxu0 %v7172_v21 }
 0x143   :  { %v7253_v53 = vpack.c.bf16 %v981_v38, %v975_v37  ;;  %v619_v37 = vpop.f32.mrb[18].mxu1  ;;  %v6515_v38 = vld [vmem:[#allocation5 + $0x1a0] ss:$12 sps:$4 sm:$0xff]   ;;  %v977_v41 = vmax.f32 %v616_v26, 0.0  ;;  %v978_v54 = vmax.f32 %v618_v36, 0.0 }
 0x144   :  { %v432_v57 = vpop.f32.mrb[20].mxu0  ;;  %v7256_v47 = vpack.c.bf16 %v982_v46, %v976_v45  ;;  %2400 = vmatpush1.bf16.msra.mxu1 %v6479_v33  ;;  %v620_v42 = vadd.f32 %v619_v37, %v7176_v27  ;;  %v6516_v45 = vld [vmem:[#allocation5 + $0x278] ss:$12 sps:$4 sm:$0xff]  }
 0x145   :  { %v433_v61 = vadd.f32 %v432_v57, %v7153_v1  ;;  %v434_v21 = vpop.f32.mrb[21].mxu0  ;;  %2401 = vmatprep.subr.bf16.mxu1 %v6484_v39  ;;  %v6493_v57 = vld [vmem:[#allocation5 + $0x28c] ss:$12 sps:$4 sm:$0xff]  }
 0x146   :  { %v435_v58 = vadd.f32 %v434_v21, %v7156_v2  ;;  %v436_v4 = vpop.f32.mrb[22].mxu0  ;;  %2264 = vmatprep.mubr.bf16.mxu1 %v7256_v47  ;;  %v6517_v21 = vld [vmem:[#allocation5 + $0x1b8] ss:$12 sps:$4 sm:$0xff]  }
 0x147   :  { %v437_v8 = vadd.f32 %v436_v4, %v7153_v1  ;;  %v438_v10 = vpop.f32.mrb[23].mxu0  ;;  %2265 = vmatmul.mubr.bf16.gmra.mrb[80].mxu1 %v7253_v53  ;;  %v987_v20 = vmax.f32 %v433_v61, 0.0  ;;  %v6518_v4 = vld [vmem:[#allocation5 + $0x290] ss:$12 sps:$4 sm:$0xff]  }
 0x148   :  { %v439_v15 = vadd.f32 %v438_v10, %v7156_v2  ;;  %2402 = vmatpush1.bf16.msra.mxu1 %v6482_v59  ;;  %v988_v31 = vmax.f32 %v435_v58, 0.0  ;;  %v983_v59 = vmax.f32 %v620_v42, 0.0 }
 0x149   :  { %v993_v22 = vmax.f32 %v437_v8, 0.0  ;;  %2804 = vmatmul.mubr.bf16.vlgmr.msra.gmra.mrb[128].mxu0 %v7170_v19  ;;  %2403 = vmatprep.subr.bf16.mxu1 %v6487_v62  ;;  %v621_v19 = vpop.f32.mrb[19].mxu1 }
 0x14a   :  { %v994_v33 = vmax.f32 %v439_v15, 0.0  ;;  %2811 = vmatprep.mubr.bf16.mxu0 %v7193_v35  ;;  %5473 = vmatpush3.bf16.msra.mxu0 %v6510_v7  ;;  %v622_v35 = vadd.f32 %v621_v19, %v7180_v30  ;;  %v7284_v58 = vpack.c.bf16 %v983_v59, %v977_v41  ;;  %v6491_v7 = vld [vmem:[#allocation5 + $0x288] ss:$12 sps:$4 sm:$0xff]   ;;  %v625_v10 = vpop.f32.mrb[20].mxu1  ;;  %v6494_v19 = vld [vmem:[#allocation5 + $0x2a0] ss:$12 sps:$4 sm:$0xff]  }
 0x14b   :  { %v7273_v39 = vpack.c.bf16 %v993_v22, %v987_v20  ;;  %5474 = vmatprep.subr.bf16.mxu0 %v6511_v12  ;;  %v626_v18 = vadd.f32 %v625_v10, %v7176_v27  ;;  %v627_v20 = vpop.f32.mrb[21].mxu1  ;;  %v6524_v59 = vld [vmem:[#allocation5 + $0x1e8] ss:$12 sps:$4 sm:$0xff]  }
 0x14c   :  { %v442_v46 = vpop.f32.mrb[24].mxu0  ;;  %v7276_v48 = vpack.c.bf16 %v994_v33, %v988_v31  ;;  %2404 = vmatpush1.bf16.msra.mxu1 %v6485_v16  ;;  %v984_v61 = vmax.f32 %v622_v35, 0.0  ;;  %v6496_v16 = vld [vmem:[#allocation5 + $0x2a4] ss:$12 sps:$4 sm:$0xff]   ;;  %v628_v26 = vadd.f32 %v627_v20, %v7180_v30  ;;  %v629_v28 = vpop.f32.mrb[22].mxu1 }
 0x14d   :  { %v443_v55 = vadd.f32 %v442_v46, %v7153_v1  ;;  %v444_v56 = vpop.f32.mrb[25].mxu0  ;;  %2405 = vmatprep.subr.bf16.mxu1 %v6490_v24  ;;  %v6522_v31 = vld [vmem:[#allocation5 + $0x1d0] ss:$12 sps:$4 sm:$0xff]   ;;  %v989_v36 = vmax.f32 %v626_v18, 0.0  ;;  %v630_v37 = vadd.f32 %v629_v28, %v7176_v27 }
 0x14e   :  { %v445_v60 = vadd.f32 %v444_v56, %v7156_v2  ;;  %v446_v23 = vpop.f32.mrb[26].mxu0  ;;  %2274 = vmatprep.mubr.bf16.mxu1 %v7276_v48  ;;  %5475 = vmatpush3.bf16.msra.mxu0 %v6515_v38  ;;  %v7287_v8 = vpack.c.bf16 %v984_v61, %v978_v54  ;;  %v6523_v38 = vld [vmem:[#allocation5 + $0x2a8] ss:$12 sps:$4 sm:$0xff]  }
 0x14f   :  { %v447_v62 = vadd.f32 %v446_v23, %v7153_v1  ;;  %v448_v32 = vpop.f32.mrb[27].mxu0  ;;  %2275 = vmatmul.mubr.bf16.gmra.mrb[84].mxu1 %v7273_v39  ;;  %5476 = vmatprep.subr.bf16.mxu0 %v6516_v45  ;;  %v999_v12 = vmax.f32 %v443_v55, 0.0  ;;  %v990_v45 = vmax.f32 %v628_v26, 0.0  ;;  %v6499_v54 = vld [vmem:[#allocation5 + $0x2bc] ss:$12 sps:$4 sm:$0xff]   ;;  %v995_v35 = vmax.f32 %v630_v37, 0.0 }
 0x150   :  { %v449_v5 = vadd.f32 %v448_v32, %v7156_v2  ;;  %2406 = vmatpush1.bf16.msra.mxu1 %v6488_v49  ;;  %v1000_v22 = vmax.f32 %v445_v60, 0.0  ;;  %v6497_v32 = vld [vmem:[#allocation5 + $0x2b8] ss:$12 sps:$4 sm:$0xff]   ;;  %v6529_v26 = vld [vmem:[#allocation5 + $0x200] ss:$12 sps:$4 sm:$0xff]  }
 0x151   :  { %v1005_v15 = vmax.f32 %v447_v62, 0.0  ;;  %2812 = vmatmul.mubr.bf16.gmra.mrb[132].mxu0 %v7190_v52  ;;  %2407 = vmatprep.subr.bf16.mxu1 %v6493_v57  ;;  %v631_v52 = vpop.f32.mrb[23].mxu1  ;;  %v7304_v61 = vpack.c.bf16 %v995_v35, %v989_v36  ;;  %v6530_v37 = vld [vmem:[#allocation5 + $0x2d8] ss:$12 sps:$4 sm:$0xff]  }
 0x152   :  { %v1006_v24 = vmax.f32 %v449_v5, 0.0  ;;  %2819 = vmatprep.mubr.bf16.mxu0 %v7214_v40  ;;  %5477 = vmatpush3.bf16.msra.mxu0 %v6517_v21  ;;  %v632_v40 = vadd.f32 %v631_v52, %v7180_v30  ;;  %v6525_v21 = vld [vmem:[#allocation5 + $0x2c0] ss:$12 sps:$4 sm:$0xff]   ;;  %v635_v5 = vpop.f32.mrb[24].mxu1 }
 0x153   :  { %v7293_v33 = vpack.c.bf16 %v1005_v15, %v999_v12  ;;  %5478 = vmatprep.subr.bf16.mxu0 %v6518_v4  ;;  %v6502_v12 = vld [vmem:[#allocation5 + $0x2d4] ss:$12 sps:$4 sm:$0xff]   ;;  %v636_v15 = vadd.f32 %v635_v5, %v7176_v27 }
 0x154   :  { %v452_v41 = vpop.f32.mrb[28].mxu0  ;;  %v7296_v42 = vpack.c.bf16 %v1006_v24, %v1000_v22  ;;  %2408 = vmatpush1.bf16.msra.mxu1 %v6491_v7  ;;  %v996_v57 = vmax.f32 %v632_v40, 0.0 }
 0x155   :  { %v453_v46 = vadd.f32 %v452_v41, %v7153_v1  ;;  %v454_v49 = vpop.f32.mrb[29].mxu0  ;;  %2409 = vmatprep.subr.bf16.mxu1 %v6496_v16  ;;  %v637_v16 = vpop.f32.mrb[25].mxu1  ;;  %v6500_v41 = vld [vmem:[#allocation5 + $0x2d0] ss:$12 sps:$4 sm:$0xff]  }
 0x156   :  { %v455_v55 = vadd.f32 %v454_v49, %v7156_v2  ;;  %v456_v56 = vpop.f32.mrb[30].mxu0  ;;  %2284 = vmatprep.mubr.bf16.mxu1 %v7296_v42  ;;  %5479 = vmatpush3.bf16.msra.mxu0 %v6522_v31  ;;  %v7307_v4 = vpack.c.bf16 %v996_v57, %v990_v45  ;;  %v638_v22 = vadd.f32 %v637_v16, %v7180_v30  ;;  %v639_v24 = vpop.f32.mrb[26].mxu1  ;;  %v1001_v31 = vmax.f32 %v636_v15, 0.0 }
 0x157   :  { %v457_v60 = vadd.f32 %v456_v56, %v7153_v1  ;;  %v458_v23 = vpop.f32.mrb[31].mxu0  ;;  %2285 = vmatmul.mubr.bf16.gmra.mrb[88].mxu1 %v7293_v33  ;;  %5480 = vmatprep.subr.bf16.mxu0 %v6523_v38  ;;  %v1011_v7 = vmax.f32 %v453_v46, 0.0  ;;  %v640_v36 = vadd.f32 %v639_v24, %v7176_v27  ;;  %v6505_v46 = vld [vmem:[#allocation5 + $0x2ec] ss:$12 sps:$4 sm:$0xff]  }
 0x158   :  { %v459_v62 = vadd.f32 %v458_v23, %v7156_v2  ;;  %2410 = vmatpush1.bf16.msra.mxu1 %v6494_v19  ;;  %v1012_v18 = vmax.f32 %v455_v55, 0.0  ;;  %v1002_v19 = vmax.f32 %v638_v22, 0.0  ;;  %v6531_v56 = vld [vmem:[#allocation5 + $0x218] ss:$12 sps:$4 sm:$0xff]   ;;  %v6532_v23 = vld [vmem:[#allocation5 + $0x2f0] ss:$12 sps:$4 sm:$0xff]  }
 0x159   :  { %v1017_v10 = vmax.f32 %v457_v60, 0.0  ;;  %2820 = vmatmul.mubr.bf16.gmra.mrb[136].mxu0 %v7211_v25  ;;  %2411 = vmatprep.subr.bf16.mxu1 %v6499_v54  ;;  %v641_v25 = vpop.f32.mrb[27].mxu1  ;;  %v1007_v49 = vmax.f32 %v640_v36, 0.0 }
 0x15a   :  { %v1018_v20 = vmax.f32 %v459_v62, 0.0  ;;  %2827 = vmatprep.mubr.bf16.mxu0 %v7235_v43  ;;  %5481 = vmatpush3.bf16.msra.mxu0 %v6524_v59  ;;  %v642_v43 = vadd.f32 %v641_v25, %v7180_v30  ;;  %v6503_v62 = vld [vmem:[#allocation5 + $0x2e8] ss:$12 sps:$4 sm:$0xff]   ;;  %v645_v5 = vpop.f32.mrb[28].mxu1 }
 0x15b   :  { %v7313_v28 = vpack.c.bf16 %v1017_v10, %v1011_v7  ;;  %5482 = vmatprep.subr.bf16.mxu0 %v6525_v21  ;;  %v7324_v60 = vpack.c.bf16 %v1007_v49, %v1001_v31  ;;  %v646_v15 = vadd.f32 %v645_v5, %v7176_v27  ;;  %v647_v16 = vpop.f32.mrb[29].mxu1 }
 0x15c   :  { %v462_v52 = vpop.f32.mrb[32].mxu0  ;;  %v7316_v38 = vpack.c.bf16 %v1018_v20, %v1012_v18  ;;  %2412 = vmatpush1.bf16.msra.mxu1 %v6497_v32  ;;  %v1008_v55 = vmax.f32 %v642_v43, 0.0  ;;  %v648_v22 = vadd.f32 %v647_v16, %v7180_v30  ;;  %v649_v24 = vpop.f32.mrb[30].mxu1 }
 0x15d   :  { %v463_v45 = vadd.f32 %v462_v52, %v7153_v1  ;;  %v464_v40 = vpop.f32.mrb[33].mxu0  ;;  %2413 = vmatprep.subr.bf16.mxu1 %v6502_v12  ;;  %v6509_v12 = vld [vmem:[#allocation5 + $0x304] ss:$12 sps:$4 sm:$0xff]   ;;  %v1013_v36 = vmax.f32 %v646_v15, 0.0  ;;  %v650_v25 = vadd.f32 %v649_v24, %v7176_v27 }
 0x15e   :  { %v465_v54 = vadd.f32 %v464_v40, %v7156_v2  ;;  %v466_v35 = vpop.f32.mrb[34].mxu0  ;;  %2294 = vmatprep.mubr.bf16.mxu1 %v7316_v38  ;;  %5483 = vmatpush3.bf16.msra.mxu0 %v6529_v26  ;;  %v7327_v32 = vpack.c.bf16 %v1008_v55, %v1002_v19  ;;  %v6536_v26 = vld [vmem:[#allocation5 + $0x230] ss:$12 sps:$4 sm:$0xff]  }
 0x15f   :  { %v467_v57 = vadd.f32 %v466_v35, %v7153_v1  ;;  %v468_v59 = vpop.f32.mrb[35].mxu0  ;;  %2295 = vmatmul.mubr.bf16.gmra.mrb[92].mxu1 %v7313_v28  ;;  %5484 = vmatprep.subr.bf16.mxu0 %v6530_v37  ;;  %v1023_v7 = vmax.f32 %v463_v45, 0.0  ;;  %v1019_v45 = vmax.f32 %v650_v25, 0.0 }
 0x160   :  { %v469_v21 = vadd.f32 %v468_v59, %v7156_v2  ;;  %2414 = vmatpush1.bf16.msra.mxu1 %v6500_v41  ;;  %v1024_v18 = vmax.f32 %v465_v54, 0.0  ;;  %v1014_v41 = vmax.f32 %v648_v22, 0.0 }
 0x161   :  { %v1029_v10 = vmax.f32 %v467_v57, 0.0  ;;  %2828 = vmatmul.mubr.bf16.gmra.mrb[140].mxu0 %v7232_v3  ;;  %2415 = vmatprep.subr.bf16.mxu1 %v6505_v46  ;;  %v651_v3 = vpop.f32.mrb[31].mxu1  ;;  %v7344_v55 = vpack.c.bf16 %v1019_v45, %v1013_v36 }
 0x162   :  { %v1030_v20 = vmax.f32 %v469_v21, 0.0  ;;  %2835 = vmatprep.mubr.bf16.mxu0 %v7256_v47  ;;  %5485 = vmatpush3.bf16.msra.mxu0 %v6531_v56  ;;  %v652_v19 = vadd.f32 %v651_v3, %v7180_v30  ;;  %v655_v59 = vpop.f32.mrb[32].mxu1 }
 0x163   :  { %v7333_v31 = vpack.c.bf16 %v1029_v10, %v1023_v7  ;;  %5486 = vmatprep.subr.bf16.mxu0 %v6532_v23  ;;  %v657_v5 = vpop.f32.mrb[33].mxu1 }
 0x164   :  { %v472_v37 = vpop.f32.mrb[36].mxu0  ;;  %v7336_v52 = vpack.c.bf16 %v1030_v20, %v1024_v18  ;;  %2416 = vmatpush1.bf16.msra.mxu1 %v6503_v62  ;;  %v1020_v49 = vmax.f32 %v652_v19, 0.0  ;;  %v656_v62 = vadd.f32 %v655_v59, %v7176_v27  ;;  %v659_v15 = vpop.f32.mrb[34].mxu1 }
 0x165   :  { %v473_v47 = vadd.f32 %v472_v37, %v7153_v1  ;;  %v474_v43 = vpop.f32.mrb[37].mxu0  ;;  %2578 = vmatprep.subr.bf16.mxu1 %v6509_v12  ;;  %v658_v12 = vadd.f32 %v657_v5, %v7180_v30  ;;  %v660_v20 = vadd.f32 %v659_v15, %v7176_v27  ;;  %v661_v22 = vpop.f32.mrb[35].mxu1 }
 0x166   :  { %v475_v40 = vadd.f32 %v474_v43, %v7156_v2  ;;  %v476_v46 = vpop.f32.mrb[38].mxu0  ;;  %2304 = vmatprep.mubr.bf16.mxu1 %v7336_v52  ;;  %5487 = vmatpush3.bf16.msra.mxu0 %v6536_v26  ;;  %v7347_v57 = vpack.c.bf16 %v1020_v49, %v1014_v41  ;;  %v1025_v18 = vmax.f32 %v656_v62, 0.0  ;;  %v662_v36 = vadd.f32 %v661_v22, %v7180_v30 }
 0x167   :  { %v477_v54 = vadd.f32 %v476_v46, %v7153_v1  ;;  %v478_v35 = vpop.f32.mrb[39].mxu0  ;;  %2305 = vmatmul.mubr.bf16.gmra.mrb[96].mxu1 %v7333_v31  ;;  %v1035_v23 = vmax.f32 %v473_v47, 0.0  ;;  %v1031_v37 = vmax.f32 %v660_v20, 0.0  ;;  %v665_v49 = vpop.f32.mrb[36].mxu1 }
 0x168   :  { %v479_v56 = vadd.f32 %v478_v35, %v7156_v2  ;;  %v1036_v7 = vmax.f32 %v475_v40, 0.0  ;;  %v1032_v19 = vmax.f32 %v662_v36, 0.0  ;;  %v667_v59 = vpop.f32.mrb[37].mxu1 }
 0x169   :  { %v1041_v21 = vmax.f32 %v477_v54, 0.0  ;;  %2836 = vmatmul.mubr.bf16.gmra.mrb[144].mxu0 %v7253_v53  ;;  %v1026_v53 = vmax.f32 %v658_v12, 0.0  ;;  %v7364_v45 = vpack.c.bf16 %v1031_v37, %v1025_v18  ;;  %v668_v62 = vadd.f32 %v667_v59, %v7180_v30  ;;  %v669_v5 = vpop.f32.mrb[38].mxu1 }
 0x16a   :  { %v1042_v10 = vmax.f32 %v479_v56, 0.0  ;;  %2843 = vmatprep.mubr.bf16.mxu0 %v7276_v48  ;;  %v666_v56 = vadd.f32 %v665_v49, %v7176_v27  ;;  %v670_v12 = vadd.f32 %v669_v5, %v7176_v27  ;;  %v671_v15 = vpop.f32.mrb[39].mxu1 }
 0x16b   :  { %v7353_v16 = vpack.c.bf16 %v1041_v21, %v1035_v23  ;;  %v7367_v46 = vpack.c.bf16 %v1032_v19, %v1026_v53  ;;  %v672_v22 = vadd.f32 %v671_v15, %v7180_v30 }
 0x16c   :  { %v482_v24 = vpop.f32.mrb[40].mxu0  ;;  %v7356_v26 = vpack.c.bf16 %v1042_v10, %v1036_v7  ;;  %v1037_v10 = vmax.f32 %v666_v56, 0.0  ;;  %v1043_v36 = vmax.f32 %v670_v12, 0.0 }
 0x16d   :  { %v483_v25 = vadd.f32 %v482_v24, %v7153_v1  ;;  %v484_v3 = vpop.f32.mrb[41].mxu0 }
 0x16e   :  { %v485_v48 = vadd.f32 %v484_v3, %v7156_v2  ;;  %v486_v41 = vpop.f32.mrb[42].mxu0  ;;  %2314 = vmatprep.mubr.bf16.mxu1 %v7356_v26  ;;  %v1044_v3 = vmax.f32 %v672_v22, 0.0 }
 0x16f   :  { %v487_v47 = vadd.f32 %v486_v41, %v7153_v1  ;;  %v488_v43 = vpop.f32.mrb[43].mxu0  ;;  %2315 = vmatmul.mubr.bf16.gmra.mrb[100].mxu1 %v7353_v16  ;;  %v1047_v54 = vmax.f32 %v483_v25, 0.0  ;;  %v7384_v41 = vpack.c.bf16 %v1043_v36, %v1037_v10 }
 0x170   :  { %v489_v40 = vadd.f32 %v488_v43, %v7156_v2  ;;  %v1048_v23 = vmax.f32 %v485_v48, 0.0  ;;  %v675_v43 = vpop.f32.mrb[40].mxu1 }
 0x171   :  { %v1053_v35 = vmax.f32 %v487_v47, 0.0  ;;  %2844 = vmatmul.mubr.bf16.gmra.mrb[148].mxu0 %v7273_v39  ;;  %v1038_v39 = vmax.f32 %v668_v62, 0.0 }
 0x172   :  { %v1054_v21 = vmax.f32 %v489_v40, 0.0  ;;  %2851 = vmatprep.mubr.bf16.mxu0 %v7296_v42 }
 0x173   :  { %v7373_v7 = vpack.c.bf16 %v1053_v35, %v1047_v54  ;;  %v7387_v47 = vpack.c.bf16 %v1044_v3, %v1038_v39  ;;  %v676_v54 = vadd.f32 %v675_v43, %v7176_v27  ;;  %v677_v35 = vpop.f32.mrb[41].mxu1 }
 0x174   :  { %v492_v18 = vpop.f32.mrb[44].mxu0  ;;  %v7376_v20 = vpack.c.bf16 %v1054_v21, %v1048_v23  ;;  %v678_v23 = vadd.f32 %v677_v35, %v7180_v30  ;;  %v679_v21 = vpop.f32.mrb[42].mxu1 }
 0x175   :  { %v493_v24 = vadd.f32 %v492_v18, %v7153_v1  ;;  %v494_v53 = vpop.f32.mrb[45].mxu0  ;;  %v1049_v5 = vmax.f32 %v676_v54, 0.0  ;;  %v680_v10 = vadd.f32 %v679_v21, %v7176_v27  ;;  %v681_v12 = vpop.f32.mrb[43].mxu1 }
 0x176   :  { %v495_v42 = vadd.f32 %v494_v53, %v7156_v2  ;;  %v496_v25 = vpop.f32.mrb[46].mxu0  ;;  %2324 = vmatprep.mubr.bf16.mxu1 %v7376_v20  ;;  %v682_v39 = vadd.f32 %v681_v12, %v7180_v30 }
 0x177   :  { %v497_v37 = vadd.f32 %v496_v25, %v7153_v1  ;;  %v498_v48 = vpop.f32.mrb[47].mxu0  ;;  %2325 = vmatmul.mubr.bf16.gmra.mrb[104].mxu1 %v7373_v7  ;;  %v1059_v40 = vmax.f32 %v493_v24, 0.0  ;;  %v1055_v53 = vmax.f32 %v680_v10, 0.0  ;;  %v685_v43 = vpop.f32.mrb[44].mxu1 }
 0x178   :  { %v499_v19 = vadd.f32 %v498_v48, %v7156_v2  ;;  %v1060_v56 = vmax.f32 %v495_v42, 0.0  ;;  %v1056_v42 = vmax.f32 %v682_v39, 0.0  ;;  %v686_v54 = vadd.f32 %v685_v43, %v7176_v27  ;;  %v687_v35 = vpop.f32.mrb[45].mxu1 }
 0x179   :  { %v1065_v49 = vmax.f32 %v497_v37, 0.0  ;;  %2852 = vmatmul.mubr.bf16.gmra.mrb[152].mxu0 %v7293_v33  ;;  %v1050_v33 = vmax.f32 %v678_v23, 0.0  ;;  %v7404_v37 = vpack.c.bf16 %v1055_v53, %v1049_v5  ;;  %v688_v23 = vadd.f32 %v687_v35, %v7180_v30  ;;  %v689_v21 = vpop.f32.mrb[46].mxu1 }
 0x17a   :  { %v1066_v59 = vmax.f32 %v499_v19, 0.0  ;;  %2859 = vmatprep.mubr.bf16.mxu0 %v7316_v38  ;;  %v1061_v10 = vmax.f32 %v686_v54, 0.0  ;;  %v690_v12 = vadd.f32 %v689_v21, %v7176_v27 }
 0x17b   :  { %v7393_v62 = vpack.c.bf16 %v1065_v49, %v1059_v40  ;;  %v7407_v19 = vpack.c.bf16 %v1056_v42, %v1050_v33 }
 0x17c   :  { %v502_v15 = vpop.f32.mrb[48].mxu0  ;;  %v7396_v18 = vpack.c.bf16 %v1066_v59, %v1060_v56 }
 0x17d   :  { %v503_v22 = vadd.f32 %v502_v15, %v7153_v1  ;;  %v504_v24 = vpop.f32.mrb[49].mxu0  ;;  %v691_v15 = vpop.f32.mrb[47].mxu1 }
 0x17e   :  { %v505_v38 = vadd.f32 %v504_v24, %v7156_v2  ;;  %v506_v36 = vpop.f32.mrb[50].mxu0  ;;  %2334 = vmatprep.mubr.bf16.mxu1 %v7396_v18 }
 0x17f   :  { %v507_v25 = vadd.f32 %v506_v36, %v7153_v1  ;;  %v508_v3 = vpop.f32.mrb[51].mxu0  ;;  %2335 = vmatmul.mubr.bf16.gmra.mrb[108].mxu1 %v7393_v62  ;;  %v1071_v40 = vmax.f32 %v503_v22, 0.0  ;;  %v692_v22 = vadd.f32 %v691_v15, %v7180_v30 }
 0x180   :  { %v509_v48 = vadd.f32 %v508_v3, %v7156_v2  ;;  %v1072_v56 = vmax.f32 %v505_v38, 0.0  ;;  %v1067_v38 = vmax.f32 %v690_v12, 0.0 }
 0x181   :  { %v1077_v49 = vmax.f32 %v507_v25, 0.0  ;;  %2860 = vmatmul.mubr.bf16.gmra.mrb[156].mxu0 %v7313_v28  ;;  %v1062_v28 = vmax.f32 %v688_v23, 0.0  ;;  %v1068_v42 = vmax.f32 %v692_v22, 0.0 }
 0x182   :  { %v1078_v59 = vmax.f32 %v509_v48, 0.0  ;;  %2867 = vmatprep.mubr.bf16.mxu0 %v7336_v52  ;;  %v7424_v48 = vpack.c.bf16 %v1067_v38, %v1061_v10 }
 0x183   :  { %v7413_v5 = vpack.c.bf16 %v1077_v49, %v1071_v40  ;;  %v7427_v40 = vpack.c.bf16 %v1068_v42, %v1062_v28  ;;  %v695_v49 = vpop.f32.mrb[48].mxu1 }
 0x184   :  { %v512_v33 = vpop.f32.mrb[52].mxu0  ;;  %v7416_v39 = vpack.c.bf16 %v1078_v59, %v1072_v56  ;;  %v696_v56 = vadd.f32 %v695_v49, %v7176_v27  ;;  %v697_v59 = vpop.f32.mrb[49].mxu1 }
 0x185   :  { %v513_v24 = vadd.f32 %v512_v33, %v7153_v1  ;;  %v514_v53 = vpop.f32.mrb[53].mxu0  ;;  %v698_v12 = vadd.f32 %v697_v59, %v7180_v30  ;;  %v699_v10 = vpop.f32.mrb[50].mxu1 }
 0x186   :  { %v515_v52 = vadd.f32 %v514_v53, %v7156_v2  ;;  %v516_v36 = vpop.f32.mrb[54].mxu0  ;;  %2344 = vmatprep.mubr.bf16.mxu1 %v7416_v39  ;;  %v1073_v33 = vmax.f32 %v696_v56, 0.0  ;;  %v700_v28 = vadd.f32 %v699_v10, %v7176_v27  ;;  %v701_v22 = vpop.f32.mrb[51].mxu1 }
 0x187   :  { %v517_v25 = vadd.f32 %v516_v36, %v7153_v1  ;;  %v518_v3 = vpop.f32.mrb[55].mxu0  ;;  %2345 = vmatmul.mubr.bf16.gmra.mrb[112].mxu1 %v7413_v5  ;;  %v1083_v54 = vmax.f32 %v513_v24, 0.0  ;;  %v702_v38 = vadd.f32 %v701_v22, %v7180_v30  ;;  %v705_v59 = vpop.f32.mrb[52].mxu1 }
 0x188   :  { %v519_v43 = vadd.f32 %v518_v3, %v7156_v2  ;;  %v1084_v23 = vmax.f32 %v515_v52, 0.0  ;;  %v1079_v42 = vmax.f32 %v700_v28, 0.0  ;;  %v707_v10 = vpop.f32.mrb[53].mxu1 }
 0x189   :  { %v1089_v35 = vmax.f32 %v517_v25, 0.0  ;;  %2868 = vmatmul.mubr.bf16.gmra.mrb[160].mxu0 %v7333_v31  ;;  %v1074_v31 = vmax.f32 %v698_v12, 0.0  ;;  %v1080_v3 = vmax.f32 %v702_v38, 0.0  ;;  %v706_v12 = vadd.f32 %v705_v59, %v7176_v27 }
 0x18a   :  { %v1090_v21 = vmax.f32 %v519_v43, 0.0  ;;  %2875 = vmatprep.mubr.bf16.mxu0 %v7356_v26 }
 0x18b   :  { %v7433_v15 = vpack.c.bf16 %v1089_v35, %v1083_v54  ;;  %v7444_v54 = vpack.c.bf16 %v1079_v42, %v1073_v33  ;;  %v7447_v56 = vpack.c.bf16 %v1080_v3, %v1074_v31  ;;  %v709_v33 = vpop.f32.mrb[54].mxu1 }
 0x18c   :  { %v522_v24 = vpop.f32.mrb[56].mxu0  ;;  %v7436_v53 = vpack.c.bf16 %v1090_v21, %v1084_v23  ;;  %v710_v31 = vadd.f32 %v709_v33, %v7176_v27  ;;  %v711_v42 = vpop.f32.mrb[55].mxu1 }
 0x18d   :  { %v523_v52 = vadd.f32 %v522_v24, %v7153_v1  ;;  %v524_v36 = vpop.f32.mrb[57].mxu0  ;;  %v708_v24 = vadd.f32 %v707_v10, %v7180_v30  ;;  %v712_v3 = vadd.f32 %v711_v42, %v7180_v30 }
 0x18e   :  { %v525_v26 = vadd.f32 %v524_v36, %v7156_v2  ;;  %v526_v25 = vpop.f32.mrb[58].mxu0  ;;  %2354 = vmatprep.mubr.bf16.mxu1 %v7436_v53  ;;  %v1085_v36 = vmax.f32 %v706_v12, 0.0 }
 0x18f   :  { %v527_v43 = vadd.f32 %v526_v25, %v7153_v1  ;;  %v528_v49 = vpop.f32.mrb[59].mxu0  ;;  %2355 = vmatmul.mubr.bf16.gmra.mrb[116].mxu1 %v7433_v15  ;;  %v1095_v23 = vmax.f32 %v523_v52, 0.0  ;;  %v715_v33 = vpop.f32.mrb[56].mxu1 }
 0x190   :  { %v529_v35 = vadd.f32 %v528_v49, %v7156_v2  ;;  %v1096_v28 = vmax.f32 %v525_v26, 0.0  ;;  %v1091_v49 = vmax.f32 %v710_v31, 0.0 }
 0x191   :  { %v1101_v21 = vmax.f32 %v527_v43, 0.0  ;;  %2876 = vmatmul.mubr.bf16.gmra.mrb[164].mxu0 %v7353_v16  ;;  %v1086_v16 = vmax.f32 %v708_v24, 0.0 }
 0x192   :  { %v1102_v22 = vmax.f32 %v529_v35, 0.0  ;;  %2883 = vmatprep.mubr.bf16.mxu0 %v7376_v20  ;;  %v167_v20 = vsub.s32 4, %v7138_v44 }
 0x193   :  { %v7453_v38 = vpack.c.bf16 %v1101_v21, %v1095_v23  ;;  %v171_v23 = vsub.s32 5, %v7138_v44  ;;  %v1092_v21 = vmax.f32 %v712_v3, 0.0 }
 0x194   :  { %v532_v52 = vpop.f32.mrb[60].mxu0  ;;  %v7456_v25 = vpack.c.bf16 %v1102_v22, %v1096_v28  ;;  %v7466_v28 = vpack.c.bf16 %v1091_v49, %v1085_v36 }
 0x195   :  { %v533_v26 = vadd.f32 %v532_v52, %v7153_v1  ;;  %v534_v43 = vpop.f32.mrb[61].mxu0  ;;  %v7469_v24 = vpack.c.bf16 %v1092_v21, %v1086_v16  ;;  %v6682_v52 = vld [vmem:[%s8548_s2] sm:$0x3f] }
 0x196   :  { %v535_v35 = vadd.f32 %v534_v43, %v7156_v2  ;;  %v536_v59 = vpop.f32.mrb[62].mxu0  ;;  %2364 = vmatprep.mubr.bf16.mxu1 %v7456_v25  ;;  %v7475_v3 = vrot.slane %v6682_v52, %v167_v20  ;;  %v717_v43 = vpop.f32.mrb[57].mxu1 }
 0x197   :  { %v537_v12 = vadd.f32 %v536_v59, %v7153_v1  ;;  %v538_v10 = vpop.f32.mrb[63].mxu0  ;;  %2365 = vmatmul.mubr.bf16.gmra.mrb[120].mxu1 %v7453_v38  ;;  %v1107_v31 = vmax.f32 %v533_v26, 0.0  ;;  %v716_v1 = vadd.f32 %v715_v33, %v7176_v27  ;;  %v718_v16 = vadd.f32 %v717_v43, %v7180_v30  ;;  %v719_v26 = vpop.f32.mrb[58].mxu1 }
 0x198   :  { %v539_v22 = vadd.f32 %v538_v10, %v7156_v2  ;;  %v1108_v36 = vmax.f32 %v535_v35, 0.0  ;;  %v7479_v2 = vrot.slane %v6682_v52, %v171_v23  ;;  %v720_v21 = vadd.f32 %v719_v26, %v7176_v27 }
 0x199   :  { %v1113_v42 = vmax.f32 %v537_v12, 0.0  ;;  %2884 = vmatmul.mubr.bf16.gmra.mrb[168].mxu0 %v7373_v7  ;;  %v1097_v7 = vmax.f32 %v716_v1, 0.0  ;;  %v721_v12 = vpop.f32.mrb[59].mxu1  ;;  %v1098_v33 = vmax.f32 %v718_v16, 0.0 }
 0x19a   :  { %v1114_v49 = vmax.f32 %v539_v22, 0.0  ;;  %2891 = vmatprep.mubr.bf16.mxu0 %v7396_v18  ;;  %v722_v35 = vadd.f32 %v721_v12, %v7180_v30  ;;  %v1103_v23 = vmax.f32 %v720_v21, 0.0  ;;  %v725_v12 = vpop.f32.mrb[60].mxu1 }
 0x19b   :  { %v7482_v59 = vpack.c.bf16 %v1113_v42, %v1107_v31 }
 0x19c   :  { %v7485_v20 = vpack.c.bf16 %v1114_v49, %v1108_v36  ;;  %v768_v10 = vpop.f32.mrb[64].mxu0  ;;  %v1104_v42 = vmax.f32 %v722_v35, 0.0  ;;  %v7493_v49 = vpack.c.bf16 %v1103_v23, %v1097_v7  ;;  %v726_v35 = vadd.f32 %v725_v12, %v7176_v27  ;;  %v6514_v12 = vld [vmem:[#allocation5 + $0x31c] ss:$12 sps:$4 sm:$0xff]  }
 0x19d   :  { %v769_v22 = vadd.f32 %v768_v10, %v7475_v3  ;;  %v770_v18 = vpop.f32.mrb[65].mxu0 }
 0x19e   :  { %2374 = vmatprep.mubr.bf16.mxu1 %v7485_v20  ;;  %v771_v52 = vadd.f32 %v770_v18, %v7479_v2  ;;  %v772_v31 = vpop.f32.mrb[66].mxu0  ;;  %v7497_v21 = vpack.c.bf16 %v1104_v42, %v1098_v33  ;;  %v727_v18 = vpop.f32.mrb[61].mxu1  ;;  %v6507_v42 = vld [vmem:[#allocation5 + $0x300] ss:$12 sps:$4 sm:$0xff]  }
 0x19f   :  { %2375 = vmatmul.mubr.bf16.gmra.mrb[124].mxu1 %v7482_v59  ;;  %v931_v1 = vmax.f32 %v769_v22, 0.0  ;;  %v773_v43 = vadd.f32 %v772_v31, %v7475_v3  ;;  %v774_v36 = vpop.f32.mrb[67].mxu0  ;;  %v728_v7 = vadd.f32 %v727_v18, %v7180_v30  ;;  %v729_v23 = vpop.f32.mrb[62].mxu1 }
 0x1a0   :  { %2417 = vmatprep.mubr.bf16.mxu1 %v7204_v9  ;;  %v932_v16 = vmax.f32 %v771_v52, 0.0  ;;  %v775_v26 = vadd.f32 %v774_v36, %v7479_v2  ;;  %v1109_v52 = vmax.f32 %v726_v35, 0.0  ;;  %v730_v36 = vadd.f32 %v729_v23, %v7176_v27  ;;  %v731_v33 = vpop.f32.mrb[63].mxu1  ;;  %v6570_v35 = vld [vmem:[#allocation5 + $0x3c8] ss:$12 sps:$4 sm:$0xff]  }
 0x1a1   :  { %2892 = vmatmul.mubr.bf16.gmra.mrb[172].mxu0 %v7393_v62  ;;  %v937_v10 = vmax.f32 %v773_v43, 0.0  ;;  %v1110_v44 = vmax.f32 %v728_v7, 0.0  ;;  %v732_v62 = vadd.f32 %v731_v33, %v7180_v30  ;;  %v6512_v30 = vld [vmem:[#allocation5 + $0x318] ss:$12 sps:$4 sm:$0xff]   ;;  %5584 = vmatprep.subr.bf16.mxu0 %v6570_v35  ;;  %v6526_v35 = vld [vmem:[#allocation5 + $0x348] ss:$12 sps:$4 sm:$0xff]  }
 0x1a2   :  { %2899 = vmatprep.mubr.bf16.mxu0 %v7416_v39  ;;  %v938_v22 = vmax.f32 %v775_v26, 0.0  ;;  %v1115_v63 = vmax.f32 %v730_v36, 0.0  ;;  %v6521_v36 = vld [vmem:[#allocation5 + $0x334] ss:$12 sps:$4 sm:$0xff]  }
 0x1a3   :  { %v7503_v31 = vpack.c.bf16 %v937_v10, %v931_v1  ;;  %v1116_v10 = vmax.f32 %v732_v62, 0.0 }
 0x1a4   :  { %v778_v0 = vpop.f32.mrb[68].mxu0  ;;  %v7507_v43 = vpack.c.bf16 %v938_v22, %v932_v16  ;;  %v7513_v51 = vpack.c.bf16 %v1115_v63, %v1109_v52  ;;  %v6519_v52 = vld [vmem:[#allocation5 + $0x330] ss:$12 sps:$4 sm:$0xff]  }
 0x1a5   :  { %v779_v39 = vadd.f32 %v778_v0, %v7475_v3  ;;  %v780_v26 = vpop.f32.mrb[69].mxu0  ;;  %v7517_v22 = vpack.c.bf16 %v1116_v10, %v1110_v44 }
 0x1a6   :  { %v781_v18 = vadd.f32 %v780_v26, %v7479_v2  ;;  %v782_v1 = vpop.f32.mrb[70].mxu0  ;;  %v6528_v26 = vld [vmem:[#allocation5 + $0x34c] ss:$12 sps:$4 sm:$0xff]  }
 0x1a7   :  { %2418 = vmatmul.mubr.bf16.vlgmr.msra.gmra.mrb[64].mxu1 %v7201_v6  ;;  %v943_v27 = vmax.f32 %v779_v39, 0.0  ;;  %v783_v23 = vadd.f32 %v782_v1, %v7475_v3  ;;  %v784_v7 = vpop.f32.mrb[71].mxu0 }
 0x1a8   :  { %2579 = vmatpush1.bf16.msra.mxu1 %v6507_v42  ;;  %2427 = vmatprep.mubr.bf16.mxu1 %v7225_v13  ;;  %v944_v0 = vmax.f32 %v781_v18, 0.0  ;;  %v785_v16 = vadd.f32 %v784_v7, %v7479_v2  ;;  %v6535_v7 = vld [vmem:[#allocation5 + $0x364] ss:$12 sps:$4 sm:$0xff]  }
 0x1a9   :  { %2900 = vmatmul.mubr.bf16.gmra.mrb[176].mxu0 %v7413_v5  ;;  %2580 = vmatprep.subr.bf16.mxu1 %v6514_v12  ;;  %v949_v33 = vmax.f32 %v783_v23, 0.0 }
 0x1aa   :  { %2907 = vmatprep.mubr.bf16.mxu0 %v7436_v53  ;;  %v950_v62 = vmax.f32 %v785_v16, 0.0 }
 0x1ab   :  { %v7521_v63 = vpack.c.bf16 %v949_v33, %v943_v27 }
 0x1ac   :  { %2581 = vmatpush1.bf16.msra.mxu1 %v6512_v30  ;;  %v788_v42 = vpop.f32.mrb[72].mxu0  ;;  %v7523_v39 = vpack.c.bf16 %v950_v62, %v944_v0 }
 0x1ad   :  { %2582 = vmatprep.subr.bf16.mxu1 %v6521_v36  ;;  %v789_v44 = vadd.f32 %v788_v42, %v7475_v3  ;;  %v790_v18 = vpop.f32.mrb[73].mxu0  ;;  %v6533_v36 = vld [vmem:[#allocation5 + $0x360] ss:$12 sps:$4 sm:$0xff]  }
 0x1ae   :  { %v791_v5 = vadd.f32 %v790_v18, %v7479_v2  ;;  %v792_v12 = vpop.f32.mrb[74].mxu0 }
 0x1af   :  { %2428 = vmatmul.mubr.bf16.gmra.mrb[68].mxu1 %v7222_v50  ;;  %v955_v53 = vmax.f32 %v789_v44, 0.0  ;;  %v793_v1 = vadd.f32 %v792_v12, %v7475_v3  ;;  %v794_v10 = vpop.f32.mrb[75].mxu0  ;;  %v6537_v12 = vld [vmem:[#allocation5 + $0x378] ss:$12 sps:$4 sm:$0xff]  }
 0x1b0   :  { %2437 = vmatprep.mubr.bf16.mxu1 %v7246_v34  ;;  %2583 = vmatpush1.bf16.msra.mxu1 %v6519_v52  ;;  %v956_v27 = vmax.f32 %v791_v5, 0.0  ;;  %v795_v23 = vadd.f32 %v794_v10, %v7479_v2  ;;  %v6539_v52 = vld [vmem:[#allocation5 + $0x37c] ss:$12 sps:$4 sm:$0xff]   ;;  %v6542_v10 = vld [vmem:[#allocation5 + $0x394] ss:$12 sps:$4 sm:$0xff]  }
 0x1b1   :  { %2908 = vmatmul.mubr.bf16.gmra.mrb[180].mxu0 %v7433_v15  ;;  %2584 = vmatprep.subr.bf16.mxu1 %v6528_v26  ;;  %v961_v30 = vmax.f32 %v793_v1, 0.0 }
 0x1b2   :  { %2915 = vmatprep.mubr.bf16.mxu0 %v7456_v25  ;;  %v962_v0 = vmax.f32 %v795_v23, 0.0 }
 0x1b3   :  { %v7533_v16 = vpack.c.bf16 %v961_v30, %v955_v53 }
 0x1b4   :  { %2585 = vmatpush1.bf16.msra.mxu1 %v6526_v35  ;;  %v798_v33 = vpop.f32.mrb[76].mxu0  ;;  %v7535_v62 = vpack.c.bf16 %v962_v0, %v956_v27 }
 0x1b5   :  { %2586 = vmatprep.subr.bf16.mxu1 %v6535_v7  ;;  %v799_v42 = vadd.f32 %v798_v33, %v7475_v3  ;;  %v800_v44 = vpop.f32.mrb[77].mxu0  ;;  %v6540_v7 = vld [vmem:[#allocation5 + $0x390] ss:$12 sps:$4 sm:$0xff]  }
 0x1b6   :  { %v801_v15 = vadd.f32 %v800_v44, %v7479_v2  ;;  %v802_v26 = vpop.f32.mrb[78].mxu0 }
 0x1b7   :  { %2438 = vmatmul.mubr.bf16.gmra.mrb[72].mxu1 %v7243_v29  ;;  %v967_v18 = vmax.f32 %v799_v42, 0.0  ;;  %v803_v25 = vadd.f32 %v802_v26, %v7475_v3  ;;  %v804_v5 = vpop.f32.mrb[79].mxu0  ;;  %v6543_v26 = vld [vmem:[#allocation5 + $0x3a8] ss:$12 sps:$4 sm:$0xff]  }
 0x1b8   :  { %2447 = vmatprep.mubr.bf16.mxu1 %v7267_v17  ;;  %2587 = vmatpush1.bf16.msra.mxu1 %v6533_v36  ;;  %v968_v53 = vmax.f32 %v801_v15, 0.0  ;;  %v805_v1 = vadd.f32 %v804_v5, %v7479_v2  ;;  %v6545_v36 = vld [vmem:[#allocation5 + $0x3ac] ss:$12 sps:$4 sm:$0xff]   ;;  %v6548_v5 = vld [vmem:[#allocation5 + $0x3c4] ss:$12 sps:$4 sm:$0xff]  }
 0x1b9   :  { %2916 = vmatmul.mubr.bf16.gmra.mrb[184].mxu0 %v7453_v38  ;;  %2588 = vmatprep.subr.bf16.mxu1 %v6539_v52  ;;  %v973_v35 = vmax.f32 %v803_v25, 0.0 }
 0x1ba   :  { %2923 = vmatprep.mubr.bf16.mxu0 %v7485_v20  ;;  %v974_v27 = vmax.f32 %v805_v1, 0.0 }
 0x1bb   :  { %v7545_v23 = vpack.c.bf16 %v973_v35, %v967_v18 }
 0x1bc   :  { %2589 = vmatpush1.bf16.msra.mxu1 %v6537_v12  ;;  %v808_v30 = vpop.f32.mrb[80].mxu0  ;;  %v7547_v0 = vpack.c.bf16 %v974_v27, %v968_v53 }
 0x1bd   :  { %2590 = vmatprep.subr.bf16.mxu1 %v6542_v10  ;;  %v809_v33 = vadd.f32 %v808_v30, %v7475_v3  ;;  %v810_v42 = vpop.f32.mrb[81].mxu0  ;;  %v6546_v10 = vld [vmem:[#allocation5 + $0x3c0] ss:$12 sps:$4 sm:$0xff]  }
 0x1be   :  { %v811_v38 = vadd.f32 %v810_v42, %v7479_v2  ;;  %v812_v52 = vpop.f32.mrb[82].mxu0  ;;  %v6571_v42 = vld [vmem:[#allocation5 + $0x308] ss:$12 sps:$4 sm:$0xff]  }
 0x1bf   :  { %2448 = vmatmul.mubr.bf16.gmra.mrb[76].mxu1 %v7264_v11  ;;  %v979_v44 = vmax.f32 %v809_v33, 0.0  ;;  %v813_v20 = vadd.f32 %v812_v52, %v7475_v3  ;;  %v814_v15 = vpop.f32.mrb[83].mxu0 }
 0x1c0   :  { %2457 = vmatprep.mubr.bf16.mxu1 %v7287_v8  ;;  %2591 = vmatpush1.bf16.msra.mxu1 %v6540_v7  ;;  %v980_v18 = vmax.f32 %v811_v38, 0.0  ;;  %v815_v25 = vadd.f32 %v814_v15, %v7479_v2  ;;  %v6551_v7 = vld [vmem:[#allocation5 + $0x3dc] ss:$12 sps:$4 sm:$0xff]  }
 0x1c1   :  { %2924 = vmatmul.mubr.bf16.gmra.mrb[188].mxu0 %v7482_v59  ;;  %2592 = vmatprep.subr.bf16.mxu1 %v6545_v36  ;;  %v985_v12 = vmax.f32 %v813_v20, 0.0  ;;  %v6549_v20 = vld [vmem:[#allocation5 + $0x3d8] ss:$12 sps:$4 sm:$0xff]  }
 0x1c2   :  { %2964 = vmatprep.mubr.bf16.mxu0 %v7204_v9  ;;  %v986_v53 = vmax.f32 %v815_v25, 0.0  ;;  %v6554_v25 = vld [vmem:[#allocation5 + $0x3f4] ss:$12 sps:$4 sm:$0xff]  }
 0x1c3   :  { %v7557_v1 = vpack.c.bf16 %v985_v12, %v979_v44  ;;  %v6572_v44 = vld [vmem:[#allocation5 + $0x3e0] ss:$12 sps:$4 sm:$0xff]  }
 0x1c4   :  { %2593 = vmatpush1.bf16.msra.mxu1 %v6543_v26  ;;  %v818_v35 = vpop.f32.mrb[84].mxu0  ;;  %v7559_v27 = vpack.c.bf16 %v986_v53, %v980_v18  ;;  %v6573_v12 = vld [vmem:[#allocation5 + $0x320] ss:$12 sps:$4 sm:$0xff]   ;;  %v6574_v53 = vld [vmem:[#allocation5 + $0x3f8] ss:$12 sps:$4 sm:$0xff]  }
 0x1c5   :  { %2594 = vmatprep.subr.bf16.mxu1 %v6548_v5  ;;  %v819_v30 = vadd.f32 %v818_v35, %v7475_v3  ;;  %v820_v33 = vpop.f32.mrb[85].mxu0 }
 0x1c6   :  { %v821_v59 = vadd.f32 %v820_v33, %v7479_v2  ;;  %v822_v36 = vpop.f32.mrb[86].mxu0 }
 0x1c7   :  { %2458 = vmatmul.mubr.bf16.gmra.mrb[80].mxu1 %v7284_v58  ;;  %v991_v9 = vmax.f32 %v819_v30, 0.0  ;;  %v823_v38 = vadd.f32 %v822_v36, %v7475_v3  ;;  %v824_v52 = vpop.f32.mrb[87].mxu0  ;;  %v6552_v30 = vld [vmem:[#allocation5 + $0x3f0] ss:$12 sps:$4 sm:$0xff]  }
 0x1c8   :  { %2467 = vmatprep.mubr.bf16.mxu1 %v7307_v4  ;;  %2595 = vmatpush1.bf16.msra.mxu1 %v6546_v10  ;;  %v992_v15 = vmax.f32 %v821_v59, 0.0  ;;  %v825_v26 = vadd.f32 %v824_v52, %v7479_v2 }
 0x1c9   :  { %2965 = vmatmul.mubr.bf16.vlgmr.msra.gmra.mrb[192].mxu0 %v7201_v6  ;;  %2596 = vmatprep.subr.bf16.mxu1 %v6551_v7  ;;  %v997_v18 = vmax.f32 %v823_v38, 0.0  ;;  %v6557_v7 = vld [vmem:[#allocation5 + $0x40c] ss:$12 sps:$4 sm:$0xff]  }
 0x1ca   :  { %2972 = vmatprep.mubr.bf16.mxu0 %v7225_v13  ;;  %v998_v5 = vmax.f32 %v825_v26, 0.0  ;;  %5585 = vmatpush3.bf16.msra.mxu0 %v6571_v42  ;;  %v6575_v42 = vld [vmem:[#allocation5 + $0x338] ss:$12 sps:$4 sm:$0xff]   ;;  %v6555_v26 = vld [vmem:[#allocation5 + $0x408] ss:$12 sps:$4 sm:$0xff]  }
 0x1cb   :  { %5586 = vmatprep.subr.bf16.mxu0 %v6572_v44  ;;  %v7569_v35 = vpack.c.bf16 %v997_v18, %v991_v9  ;;  %v6576_v44 = vld [vmem:[#allocation5 + $0x410] ss:$12 sps:$4 sm:$0xff]  }
 0x1cc   :  { %2597 = vmatpush1.bf16.msra.mxu1 %v6549_v20  ;;  %v828_v10 = vpop.f32.mrb[88].mxu0  ;;  %v7571_v33 = vpack.c.bf16 %v998_v5, %v992_v15 }
 0x1cd   :  { %v829_v59 = vadd.f32 %v828_v10, %v7475_v3  ;;  %v830_v6 = vpop.f32.mrb[89].mxu0  ;;  %2598 = vmatprep.subr.bf16.mxu1 %v6554_v25  ;;  %v6560_v25 = vld [vmem:[#allocation5 + $0x424] ss:$12 sps:$4 sm:$0xff]  }
 0x1ce   :  { %v831_v36 = vadd.f32 %v830_v6, %v7479_v2  ;;  %v832_v13 = vpop.f32.mrb[90].mxu0  ;;  %5587 = vmatpush3.bf16.msra.mxu0 %v6573_v12  ;;  %v6577_v12 = vld [vmem:[#allocation5 + $0x350] ss:$12 sps:$4 sm:$0xff]   ;;  %v6558_v6 = vld [vmem:[#allocation5 + $0x420] ss:$12 sps:$4 sm:$0xff]  }
 0x1cf   :  { %2468 = vmatmul.mubr.bf16.gmra.mrb[84].mxu1 %v7304_v61  ;;  %v1003_v38 = vmax.f32 %v829_v59, 0.0  ;;  %v833_v9 = vadd.f32 %v832_v13, %v7475_v3  ;;  %v834_v52 = vpop.f32.mrb[91].mxu0  ;;  %5588 = vmatprep.subr.bf16.mxu0 %v6574_v53  ;;  %v6578_v53 = vld [vmem:[#allocation5 + $0x428] ss:$12 sps:$4 sm:$0xff]  }
 0x1d0   :  { %2477 = vmatprep.mubr.bf16.mxu1 %v7327_v32  ;;  %v1004_v20 = vmax.f32 %v831_v36, 0.0  ;;  %v835_v15 = vadd.f32 %v834_v52, %v7479_v2  ;;  %2599 = vmatpush1.bf16.msra.mxu1 %v6552_v30 }
 0x1d1   :  { %2973 = vmatmul.mubr.bf16.gmra.mrb[196].mxu0 %v7222_v50  ;;  %v1009_v18 = vmax.f32 %v833_v9, 0.0  ;;  %2600 = vmatprep.subr.bf16.mxu1 %v6557_v7  ;;  %v6563_v7 = vld [vmem:[#allocation5 + $0x43c] ss:$12 sps:$4 sm:$0xff]  }
 0x1d2   :  { %2980 = vmatprep.mubr.bf16.mxu0 %v7246_v34  ;;  %v1010_v5 = vmax.f32 %v835_v15, 0.0  ;;  %5589 = vmatpush3.bf16.msra.mxu0 %v6575_v42  ;;  %v6579_v42 = vld [vmem:[#allocation5 + $0x368] ss:$12 sps:$4 sm:$0xff]  }
 0x1d3   :  { %5590 = vmatprep.subr.bf16.mxu0 %v6576_v44  ;;  %v7581_v10 = vpack.c.bf16 %v1009_v18, %v1003_v38  ;;  %v6580_v44 = vld [vmem:[#allocation5 + $0x440] ss:$12 sps:$4 sm:$0xff]  }
 0x1d4   :  { %v838_v59 = vpop.f32.mrb[92].mxu0  ;;  %2601 = vmatpush1.bf16.msra.mxu1 %v6555_v26  ;;  %v7583_v36 = vpack.c.bf16 %v1010_v5, %v1004_v20  ;;  %v6561_v26 = vld [vmem:[#allocation5 + $0x438] ss:$12 sps:$4 sm:$0xff]  }
 0x1d5   :  { %v839_v30 = vadd.f32 %v838_v59, %v7475_v3  ;;  %v840_v50 = vpop.f32.mrb[93].mxu0  ;;  %2602 = vmatprep.subr.bf16.mxu1 %v6560_v25  ;;  %v6566_v25 = vld [vmem:[#allocation5 + $0x454] ss:$12 sps:$4 sm:$0xff]  }
 0x1d6   :  { %v841_v13 = vadd.f32 %v840_v50, %v7479_v2  ;;  %v842_v34 = vpop.f32.mrb[94].mxu0  ;;  %5591 = vmatpush3.bf16.msra.mxu0 %v6577_v12  ;;  %v6581_v12 = vld [vmem:[#allocation5 + $0x380] ss:$12 sps:$4 sm:$0xff]   ;;  %v6564_v50 = vld [vmem:[#allocation5 + $0x450] ss:$12 sps:$4 sm:$0xff]  }
 0x1d7   :  { %2478 = vmatmul.mubr.bf16.gmra.mrb[88].mxu1 %v7324_v60  ;;  %v1015_v9 = vmax.f32 %v839_v30, 0.0  ;;  %v843_v38 = vadd.f32 %v842_v34, %v7475_v3  ;;  %v844_v52 = vpop.f32.mrb[95].mxu0  ;;  %5592 = vmatprep.subr.bf16.mxu0 %v6578_v53  ;;  %v6582_v53 = vld [vmem:[#allocation5 + $0x458] ss:$12 sps:$4 sm:$0xff]  }
 0x1d8   :  { %2487 = vmatprep.mubr.bf16.mxu1 %v7347_v57  ;;  %v1016_v20 = vmax.f32 %v841_v13, 0.0  ;;  %v845_v15 = vadd.f32 %v844_v52, %v7479_v2  ;;  %2603 = vmatpush1.bf16.msra.mxu1 %v6558_v6 }
 0x1d9   :  { %2981 = vmatmul.mubr.bf16.gmra.mrb[200].mxu0 %v7243_v29  ;;  %v1021_v18 = vmax.f32 %v843_v38, 0.0  ;;  %2604 = vmatprep.subr.bf16.mxu1 %v6563_v7  ;;  %v6569_v7 = vld [vmem:[#allocation5 + $0x46c] ss:$12 sps:$4 sm:$0xff]  }
 0x1da   :  { %2988 = vmatprep.mubr.bf16.mxu0 %v7267_v17  ;;  %v1022_v5 = vmax.f32 %v845_v15, 0.0  ;;  %5593 = vmatpush3.bf16.msra.mxu0 %v6579_v42  ;;  %v6583_v42 = vld [vmem:[#allocation5 + $0x398] ss:$12 sps:$4 sm:$0xff]  }
 0x1db   :  { %5594 = vmatprep.subr.bf16.mxu0 %v6580_v44  ;;  %v7593_v59 = vpack.c.bf16 %v1021_v18, %v1015_v9  ;;  %v6584_v44 = vld [vmem:[#allocation5 + $0x470] ss:$12 sps:$4 sm:$0xff]  }
 0x1dc   :  { %v848_v30 = vpop.f32.mrb[96].mxu0  ;;  %2605 = vmatpush1.bf16.msra.mxu1 %v6561_v26  ;;  %v7595_v13 = vpack.c.bf16 %v1022_v5, %v1016_v20  ;;  %v6567_v26 = vld [vmem:[#allocation5 + $0x468] ss:$12 sps:$4 sm:$0xff]   ;;  %v6585_v5 = vld [vmem:[#allocation5 + $0x3b0] ss:$12 sps:$4 sm:$0xff]  }
 0x1dd   :  { %v849_v6 = vadd.f32 %v848_v30, %v7475_v3  ;;  %v850_v29 = vpop.f32.mrb[97].mxu0  ;;  %2606 = vmatprep.subr.bf16.mxu1 %v6566_v25 }
 0x1de   :  { %v851_v34 = vadd.f32 %v850_v29, %v7479_v2  ;;  %v852_v17 = vpop.f32.mrb[98].mxu0  ;;  %5595 = vmatpush3.bf16.msra.mxu0 %v6581_v12 }
 0x1df   :  { %2488 = vmatmul.mubr.bf16.gmra.mrb[92].mxu1 %v7344_v55  ;;  %v1027_v38 = vmax.f32 %v849_v6, 0.0  ;;  %v853_v9 = vadd.f32 %v852_v17, %v7475_v3  ;;  %v854_v52 = vpop.f32.mrb[99].mxu0  ;;  %5596 = vmatprep.subr.bf16.mxu0 %v6582_v53 }
 0x1e0   :  { %2497 = vmatprep.mubr.bf16.mxu1 %v7367_v46  ;;  %v1028_v20 = vmax.f32 %v851_v34, 0.0  ;;  %v855_v15 = vadd.f32 %v854_v52, %v7479_v2  ;;  %2607 = vmatpush1.bf16.msra.mxu1 %v6564_v50 }
 0x1e1   :  { %2989 = vmatmul.mubr.bf16.gmra.mrb[204].mxu0 %v7264_v11  ;;  %v1033_v18 = vmax.f32 %v853_v9, 0.0  ;;  %2608 = vmatprep.subr.bf16.mxu1 %v6569_v7 }
 0x1e2   :  { %2996 = vmatprep.mubr.bf16.mxu0 %v7287_v8  ;;  %v1034_v25 = vmax.f32 %v855_v15, 0.0  ;;  %5597 = vmatpush3.bf16.msra.mxu0 %v6583_v42 }
 0x1e3   :  { %5598 = vmatprep.subr.bf16.mxu0 %v6584_v44  ;;  %v7605_v12 = vpack.c.bf16 %v1033_v18, %v1027_v38 }
 0x1e4   :  { %v858_v53 = vpop.f32.mrb[100].mxu0  ;;  %2609 = vmatpush1.bf16.msra.mxu1 %v6567_v26  ;;  %v7607_v30 = vpack.c.bf16 %v1034_v25, %v1028_v20 }
 0x1e5   :  { %v859_v6 = vadd.f32 %v858_v53, %v7475_v3  ;;  %v860_v50 = vpop.f32.mrb[101].mxu0 }
 0x1e6   :  { %v861_v29 = vadd.f32 %v860_v50, %v7479_v2  ;;  %v862_v11 = vpop.f32.mrb[102].mxu0  ;;  %5599 = vmatpush3.bf16.msra.mxu0 %v6585_v5 }
 0x1e7   :  { %2498 = vmatmul.mubr.bf16.gmra.mrb[96].mxu1 %v7364_v45  ;;  %v1039_v8 = vmax.f32 %v859_v6, 0.0  ;;  %v863_v7 = vadd.f32 %v862_v11, %v7475_v3  ;;  %v864_v34 = vpop.f32.mrb[103].mxu0 }
 0x1e8   :  { %2507 = vmatprep.mubr.bf16.mxu1 %v7387_v47  ;;  %v1040_v17 = vmax.f32 %v861_v29, 0.0  ;;  %v865_v42 = vadd.f32 %v864_v34, %v7479_v2 }
 0x1e9   :  { %2997 = vmatmul.mubr.bf16.gmra.mrb[208].mxu0 %v7284_v58  ;;  %v1045_v38 = vmax.f32 %v863_v7, 0.0 }
 0x1ea   :  { %3004 = vmatprep.mubr.bf16.mxu0 %v7307_v4  ;;  %v1046_v9 = vmax.f32 %v865_v42, 0.0 }
 0x1eb   :  { %v7617_v52 = vpack.c.bf16 %v1045_v38, %v1039_v8 }
 0x1ec   :  { %v868_v44 = vpop.f32.mrb[104].mxu0  ;;  %v7619_v20 = vpack.c.bf16 %v1046_v9, %v1040_v17 }
 0x1ed   :  { %v869_v15 = vadd.f32 %v868_v44, %v7475_v3  ;;  %v870_v26 = vpop.f32.mrb[105].mxu0 }
 0x1ee   :  { %v871_v18 = vadd.f32 %v870_v26, %v7479_v2  ;;  %v872_v25 = vpop.f32.mrb[106].mxu0 }
 0x1ef   :  { %2508 = vmatmul.mubr.bf16.gmra.mrb[100].mxu1 %v7384_v41  ;;  %v1051_v5 = vmax.f32 %v869_v15, 0.0  ;;  %v873_v58 = vadd.f32 %v872_v25, %v7475_v3  ;;  %v874_v53 = vpop.f32.mrb[107].mxu0 }
 0x1f0   :  { %2517 = vmatprep.mubr.bf16.mxu1 %v7407_v19  ;;  %v1052_v4 = vmax.f32 %v871_v18, 0.0  ;;  %v875_v6 = vadd.f32 %v874_v53, %v7479_v2 }
 0x1f1   :  { %3005 = vmatmul.mubr.bf16.gmra.mrb[212].mxu0 %v7304_v61  ;;  %v1057_v50 = vmax.f32 %v873_v58, 0.0 }
 0x1f2   :  { %3012 = vmatprep.mubr.bf16.mxu0 %v7327_v32  ;;  %v1058_v29 = vmax.f32 %v875_v6, 0.0 }
 0x1f3   :  { %v7629_v11 = vpack.c.bf16 %v1057_v50, %v1051_v5 }
 0x1f4   :  { %v878_v8 = vpop.f32.mrb[108].mxu0  ;;  %v7631_v7 = vpack.c.bf16 %v1058_v29, %v1052_v4 }
 0x1f5   :  { %v879_v34 = vadd.f32 %v878_v8, %v7475_v3  ;;  %v880_v17 = vpop.f32.mrb[109].mxu0 }
 0x1f6   :  { %v881_v42 = vadd.f32 %v880_v17, %v7479_v2  ;;  %v882_v38 = vpop.f32.mrb[110].mxu0 }
 0x1f7   :  { %2518 = vmatmul.mubr.bf16.gmra.mrb[104].mxu1 %v7404_v37  ;;  %v1063_v9 = vmax.f32 %v879_v34, 0.0  ;;  %v883_v61 = vadd.f32 %v882_v38, %v7475_v3  ;;  %v884_v44 = vpop.f32.mrb[111].mxu0 }
 0x1f8   :  { %2527 = vmatprep.mubr.bf16.mxu1 %v7427_v40  ;;  %v1064_v32 = vmax.f32 %v881_v42, 0.0  ;;  %v885_v15 = vadd.f32 %v884_v44, %v7479_v2  ;;  %v6588_v44 = vld [vmem:[#allocation7 + $0x4] ss:$12 sps:$4 sm:$0xff]  }
 0x1f9   :  { %3013 = vmatmul.mubr.bf16.gmra.mrb[216].mxu0 %v7324_v60  ;;  %v1069_v26 = vmax.f32 %v883_v61, 0.0  ;;  %3895 = vmatprep.subr.bf16.mxu1 %v6588_v44 }
 0x1fa   :  { %3020 = vmatprep.mubr.bf16.mxu0 %v7347_v57  ;;  %v1070_v18 = vmax.f32 %v885_v15, 0.0 }
 0x1fb   :  { %v7641_v25 = vpack.c.bf16 %v1069_v26, %v1063_v9 }
 0x1fc   :  { %v888_v5 = vpop.f32.mrb[112].mxu0  ;;  %v7643_v58 = vpack.c.bf16 %v1070_v18, %v1064_v32 }
 0x1fd   :  { %v889_v53 = vadd.f32 %v888_v5, %v7475_v3  ;;  %v890_v4 = vpop.f32.mrb[113].mxu0 }
 0x1fe   :  { %v891_v6 = vadd.f32 %v890_v4, %v7479_v2  ;;  %v892_v50 = vpop.f32.mrb[114].mxu0 }
 0x1ff   :  { %2528 = vmatmul.mubr.bf16.gmra.mrb[108].mxu1 %v7424_v48  ;;  %v1075_v29 = vmax.f32 %v889_v53, 0.0  ;;  %v893_v60 = vadd.f32 %v892_v50, %v7475_v3  ;;  %v894_v8 = vpop.f32.mrb[115].mxu0 }
 0x200   :  { %2537 = vmatprep.mubr.bf16.mxu1 %v7447_v56  ;;  %v1076_v57 = vmax.f32 %v891_v6, 0.0  ;;  %v895_v34 = vadd.f32 %v894_v8, %v7479_v2 }
 0x201   :  { %3021 = vmatmul.mubr.bf16.gmra.mrb[220].mxu0 %v7344_v55  ;;  %v1081_v17 = vmax.f32 %v893_v60, 0.0 }
 0x202   :  { %3028 = vmatprep.mubr.bf16.mxu0 %v7367_v46  ;;  %v1082_v42 = vmax.f32 %v895_v34, 0.0 }
 0x203   :  { %v7653_v38 = vpack.c.bf16 %v1081_v17, %v1075_v29 }
 0x204   :  { %v898_v9 = vpop.f32.mrb[116].mxu0  ;;  %v7655_v61 = vpack.c.bf16 %v1082_v42, %v1076_v57 }
 0x205   :  { %v899_v32 = vadd.f32 %v898_v9, %v7475_v3  ;;  %v900_v15 = vpop.f32.mrb[117].mxu0 }
 0x206   :  { %v901_v26 = vadd.f32 %v900_v15, %v7479_v2  ;;  %v902_v18 = vpop.f32.mrb[118].mxu0 }
 0x207   :  { %2538 = vmatmul.mubr.bf16.gmra.mrb[112].mxu1 %v7444_v54  ;;  %v1087_v55 = vmax.f32 %v899_v32, 0.0  ;;  %v903_v5 = vadd.f32 %v902_v18, %v7475_v3  ;;  %v904_v46 = vpop.f32.mrb[119].mxu0 }
 0x208   :  { %2547 = vmatprep.mubr.bf16.mxu1 %v7469_v24  ;;  %v1088_v53 = vmax.f32 %v901_v26, 0.0  ;;  %v905_v4 = vadd.f32 %v904_v46, %v7479_v2 }
 0x209   :  { %3029 = vmatmul.mubr.bf16.gmra.mrb[224].mxu0 %v7364_v45  ;;  %v1093_v6 = vmax.f32 %v903_v5, 0.0 }
 0x20a   :  { %3036 = vmatprep.mubr.bf16.mxu0 %v7387_v47  ;;  %v1094_v50 = vmax.f32 %v905_v4, 0.0 }
 0x20b   :  { %v7665_v29 = vpack.c.bf16 %v1093_v6, %v1087_v55 }
 0x20c   :  { %v908_v60 = vpop.f32.mrb[120].mxu0  ;;  %v7667_v8 = vpack.c.bf16 %v1094_v50, %v1088_v53 }
 0x20d   :  { %v909_v57 = vadd.f32 %v908_v60, %v7475_v3  ;;  %v910_v34 = vpop.f32.mrb[121].mxu0 }
 0x20e   :  { %v911_v17 = vadd.f32 %v910_v34, %v7479_v2  ;;  %v912_v42 = vpop.f32.mrb[122].mxu0 }
 0x20f   :  { %2548 = vmatmul.mubr.bf16.gmra.mrb[116].mxu1 %v7466_v28  ;;  %v1099_v9 = vmax.f32 %v909_v57, 0.0  ;;  %v913_v45 = vadd.f32 %v912_v42, %v7475_v3  ;;  %v914_v44 = vpop.f32.mrb[123].mxu0 }
 0x210   :  { %2557 = vmatprep.mubr.bf16.mxu1 %v7497_v21  ;;  %v1100_v47 = vmax.f32 %v911_v17, 0.0  ;;  %v915_v32 = vadd.f32 %v914_v44, %v7479_v2 }
 0x211   :  { %3037 = vmatmul.mubr.bf16.gmra.mrb[228].mxu0 %v7384_v41  ;;  %v1105_v15 = vmax.f32 %v913_v45, 0.0 }
 0x212   :  { %3044 = vmatprep.mubr.bf16.mxu0 %v7407_v19  ;;  %v1106_v26 = vmax.f32 %v915_v32, 0.0 }
 0x213   :  { %v7677_v18 = vpack.c.bf16 %v1105_v15, %v1099_v9 }
 0x214   :  { %v918_v55 = vpop.f32.mrb[124].mxu0  ;;  %v7679_v5 = vpack.c.bf16 %v1106_v26, %v1100_v47  ;;  %v6591_v26 = vld [vmem:[#allocation7 + $0x1c] ss:$12 sps:$4 sm:$0xff]  }
 0x215   :  { %v919_v46 = vadd.f32 %v918_v55, %v7475_v3  ;;  %v920_v53 = vpop.f32.mrb[125].mxu0 }
 0x216   :  { %v921_v4 = vadd.f32 %v920_v53, %v7479_v2  ;;  %v922_v6 = vpop.f32.mrb[126].mxu0 }
 0x217   :  { %2558 = vmatmul.mubr.bf16.gmra.mrb[120].mxu1 %v7493_v49  ;;  %v1111_v50 = vmax.f32 %v919_v46, 0.0  ;;  %v923_v41 = vadd.f32 %v922_v6, %v7475_v3  ;;  %v924_v60 = vpop.f32.mrb[127].mxu0  ;;  %v6589_v6 = vld [vmem:[#allocation7 + $0x18] ss:$12 sps:$4 sm:$0xff]  }
 0x218   :  { %2567 = vmatprep.mubr.bf16.mxu1 %v7517_v22  ;;  %v1112_v19 = vmax.f32 %v921_v4, 0.0  ;;  %v925_v57 = vadd.f32 %v924_v60, %v7479_v2  ;;  %v6597_v60 = vld [vmem:[#allocation7 + $0x4c] ss:$12 sps:$4 sm:$0xff]  }
 0x219   :  { %3045 = vmatmul.mubr.bf16.gmra.mrb[232].mxu0 %v7404_v37  ;;  %v1117_v34 = vmax.f32 %v923_v41, 0.0 }
 0x21a   :  { %3052 = vmatprep.mubr.bf16.mxu0 %v7427_v40  ;;  %v1118_v17 = vmax.f32 %v925_v57, 0.0  ;;  %v6586_v40 = vld [vmem:[#allocation7] ss:$12 sps:$4 sm:$0xff]  }
 0x21b   :  { %v7689_v42 = vpack.c.bf16 %v1117_v34, %v1111_v50  ;;  %v6592_v50 = vld [vmem:[#allocation7 + $0x30] ss:$12 sps:$4 sm:$0xff]  }
 0x21c   :  { %v5376_v9 = vpop.f32.mrb[128].mxu0  ;;  %v7691_v45 = vpack.c.bf16 %v1118_v17, %v1112_v19 }
 0x21d   :  { %v5377_v44 = vpop.f32.mrb[129].mxu0 }
 0x21e   :  { %v7693_v47 = vadd.f32 %v5377_v44, %v5376_v9  ;;  %v5379_v3 = vpop.f32.mrb[130].mxu0  ;;  %v6598_v44 = vld [vmem:[#allocation7 + $0x60] ss:$12 sps:$4 sm:$0xff]  }
 0x21f   :  { %2568 = vmatmul.mubr.bf16.gmra.mrb[124].mxu1 %v7513_v51  ;;  %v5380_v32 = vpop.f32.mrb[131].mxu0 }
 0x220   :  { %v7696_v15 = vadd.f32 %v5380_v32, %v5379_v3  ;;  %2610 = vmatprep.mubr.bf16.mxu1 %v7507_v43  ;;  %v6603_v32 = vld [vmem:[#allocation7 + $0x7c] ss:$12 sps:$4 sm:$0xff]  }
 0x221   :  { %3053 = vmatmul.mubr.bf16.gmra.mrb[236].mxu0 %v7424_v48  ;;  %v6594_v48 = vld [vmem:[#allocation7 + $0x34] ss:$12 sps:$4 sm:$0xff]  }
 0x222   :  { %3060 = vmatprep.mubr.bf16.mxu0 %v7447_v56 }
 0x224   :  { %v5382_v37 = vpop.f32.mrb[132].mxu0 }
 0x225   :  { %v5383_v2 = vpop.f32.mrb[133].mxu0 }
 0x226   :  { %v7701_v55 = vadd.f32 %v5383_v2, %v5382_v37  ;;  %v5385_v46 = vpop.f32.mrb[134].mxu0 }
 0x227   :  { %2611 = vmatmul.mubr.bf16.vlgmr.msra.gmra.mrb[64].mxu1 %v7503_v31  ;;  %v5386_v53 = vpop.f32.mrb[135].mxu0 }
 0x228   :  { %v7704_v4 = vadd.f32 %v5386_v53, %v5385_v46  ;;  %2620 = vmatprep.mubr.bf16.mxu1 %v7523_v39  ;;  %3896 = vmatpush1.bf16.msra.mxu1 %v6586_v40  ;;  %v6604_v53 = vld [vmem:[#allocation7 + $0x90] ss:$12 sps:$4 sm:$0xff]  }
 0x229   :  { %3061 = vmatmul.mubr.bf16.gmra.mrb[240].mxu0 %v7444_v54  ;;  %3897 = vmatprep.subr.bf16.mxu1 %v6591_v26  ;;  %v6595_v54 = vld [vmem:[#allocation7 + $0x48] ss:$12 sps:$4 sm:$0xff]  }
 0x22a   :  { %3068 = vmatprep.mubr.bf16.mxu0 %v7469_v24  ;;  %v6600_v24 = vld [vmem:[#allocation7 + $0x64] ss:$12 sps:$4 sm:$0xff]  }
 0x22c   :  { %v5388_v56 = vpop.f32.mrb[136].mxu0  ;;  %3898 = vmatpush1.bf16.msra.mxu1 %v6589_v6 }
 0x22d   :  { %v5389_v41 = vpop.f32.mrb[137].mxu0  ;;  %3899 = vmatprep.subr.bf16.mxu1 %v6594_v48  ;;  %v6609_v48 = vld [vmem:[#allocation7 + $0xac] ss:$12 sps:$4 sm:$0xff]  }
 0x22e   :  { %v7709_v19 = vadd.f32 %v5389_v41, %v5388_v56  ;;  %v5391_v57 = vpop.f32.mrb[138].mxu0 }
 0x22f   :  { %2621 = vmatmul.mubr.bf16.gmra.mrb[68].mxu1 %v7521_v63  ;;  %v5392_v34 = vpop.f32.mrb[139].mxu0 }
 0x230   :  { %v7712_v17 = vadd.f32 %v5392_v34, %v5391_v57  ;;  %2630 = vmatprep.mubr.bf16.mxu1 %v7535_v62  ;;  %3900 = vmatpush1.bf16.msra.mxu1 %v6592_v50  ;;  %v6610_v57 = vld [vmem:[#allocation7 + $0xc0] ss:$12 sps:$4 sm:$0xff]   ;;  %v6612_v34 = vld [vmem:[#allocation7 + $0xc4] ss:$12 sps:$4 sm:$0xff]  }
 0x231   :  { %3069 = vmatmul.mubr.bf16.gmra.mrb[244].mxu0 %v7466_v28  ;;  %3901 = vmatprep.subr.bf16.mxu1 %v6597_v60  ;;  %v6601_v28 = vld [vmem:[#allocation7 + $0x78] ss:$12 sps:$4 sm:$0xff]  }
 0x232   :  { %3076 = vmatprep.mubr.bf16.mxu0 %v7497_v21  ;;  %v6606_v21 = vld [vmem:[#allocation7 + $0x94] ss:$12 sps:$4 sm:$0xff]  }
 0x234   :  { %v5394_v9 = vpop.f32.mrb[140].mxu0  ;;  %3902 = vmatpush1.bf16.msra.mxu1 %v6595_v54 }
 0x235   :  { %v5395_v3 = vpop.f32.mrb[141].mxu0  ;;  %3903 = vmatprep.subr.bf16.mxu1 %v6600_v24 }
 0x236   :  { %v7717_v37 = vadd.f32 %v5395_v3, %v5394_v9  ;;  %v5397_v40 = vpop.f32.mrb[142].mxu0 }
 0x237   :  { %2631 = vmatmul.mubr.bf16.gmra.mrb[72].mxu1 %v7533_v16  ;;  %v5398_v2 = vpop.f32.mrb[143].mxu0 }
 0x238   :  { %v7720_v26 = vadd.f32 %v5398_v2, %v5397_v40  ;;  %2640 = vmatprep.mubr.bf16.mxu1 %v7547_v0  ;;  %3904 = vmatpush1.bf16.msra.mxu1 %v6598_v44 }
 0x239   :  { %3077 = vmatmul.mubr.bf16.gmra.mrb[248].mxu0 %v7493_v49  ;;  %3905 = vmatprep.subr.bf16.mxu1 %v6603_v32  ;;  %v6607_v49 = vld [vmem:[#allocation7 + $0xa8] ss:$12 sps:$4 sm:$0xff]  }
 0x23a   :  { %3084 = vmatprep.mubr.bf16.mxu0 %v7517_v22  ;;  %v6615_v32 = vld [vmem:[#allocation7 + $0xdc] ss:$12 sps:$4 sm:$0xff]  }
 0x23c   :  { %v5400_v46 = vpop.f32.mrb[144].mxu0  ;;  %3906 = vmatpush1.bf16.msra.mxu1 %v6601_v28 }
 0x23d   :  { %v5401_v6 = vpop.f32.mrb[145].mxu0  ;;  %3907 = vmatprep.subr.bf16.mxu1 %v6606_v21 }
 0x23e   :  { %v7725_v56 = vadd.f32 %v5401_v6, %v5400_v46  ;;  %v5403_v50 = vpop.f32.mrb[146].mxu0 }
 0x23f   :  { %2641 = vmatmul.mubr.bf16.gmra.mrb[76].mxu1 %v7545_v23  ;;  %v5404_v41 = vpop.f32.mrb[147].mxu0 }
 0x240   :  { %v7728_v60 = vadd.f32 %v5404_v41, %v5403_v50  ;;  %2650 = vmatprep.mubr.bf16.mxu1 %v7559_v27  ;;  %3908 = vmatpush1.bf16.msra.mxu1 %v6604_v53  ;;  %v6618_v53 = vld [vmem:[#allocation7 + $0xf4] ss:$12 sps:$4 sm:$0xff]  }
 0x241   :  { %3085 = vmatmul.mubr.bf16.gmra.mrb[252].mxu0 %v7513_v51  ;;  %3909 = vmatprep.subr.bf16.mxu1 %v6609_v48 }
 0x242   :  { %3125 = vmatprep.mubr.bf16.mxu0 %v7507_v43  ;;  %v6613_v43 = vld [vmem:[#allocation7 + $0xd8] ss:$12 sps:$4 sm:$0xff]  }
 0x244   :  { %v5406_v22 = vpop.f32.mrb[148].mxu0  ;;  %3910 = vmatpush1.bf16.msra.mxu1 %v6607_v49 }
 0x245   :  { %v5407_v54 = vpop.f32.mrb[149].mxu0  ;;  %3911 = vmatprep.subr.bf16.mxu1 %v6612_v34 }
 0x246   :  { %v7733_v24 = vadd.f32 %v5407_v54, %v5406_v22  ;;  %v5409_v9 = vpop.f32.mrb[150].mxu0  ;;  %v6621_v22 = vld [vmem:[#allocation7 + $0x10c] ss:$12 sps:$4 sm:$0xff]  }
 0x247   :  { %2651 = vmatmul.mubr.bf16.gmra.mrb[80].mxu1 %v7557_v1  ;;  %v5410_v44 = vpop.f32.mrb[151].mxu0 }
 0x248   :  { %v7736_v3 = vadd.f32 %v5410_v44, %v5409_v9  ;;  %2660 = vmatprep.mubr.bf16.mxu1 %v7571_v33  ;;  %3912 = vmatpush1.bf16.msra.mxu1 %v6610_v57 }
 0x249   :  { %3126 = vmatmul.mubr.bf16.vlgmr.msra.gmra.mrb[0].mxu0 %v7503_v31  ;;  %3913 = vmatprep.subr.bf16.mxu1 %v6615_v32  ;;  %v6626_v32 = vld [vmem:[#allocation7 + $0x124] ss:$12 sps:$4 sm:$0xff]  }
 0x24a   :  { %3133 = vmatprep.mubr.bf16.mxu0 %v7523_v39  ;;  %v6616_v39 = vld [vmem:[#allocation7 + $0xf0] ss:$12 sps:$4 sm:$0xff]  }
 0x24c   :  { %v5412_v51 = vpop.f32.mrb[152].mxu0  ;;  %3914 = vmatpush1.bf16.msra.mxu1 %v6613_v43  ;;  %v6624_v43 = vld [vmem:[#allocation7 + $0x120] ss:$12 sps:$4 sm:$0xff]  }
 0x24d   :  { %v5413_v40 = vpop.f32.mrb[153].mxu0  ;;  %3915 = vmatprep.subr.bf16.mxu1 %v6618_v53 }
 0x24e   :  { %v7741_v2 = vadd.f32 %v5413_v40, %v5412_v51  ;;  %v5415_v28 = vpop.f32.mrb[154].mxu0 }
 0x24f   :  { %2661 = vmatmul.mubr.bf16.gmra.mrb[84].mxu1 %v7569_v35  ;;  %v5416_v21 = vpop.f32.mrb[155].mxu0 }
 0x250   :  { %v7744_v46 = vadd.f32 %v5416_v21, %v5415_v28  ;;  %2670 = vmatprep.mubr.bf16.mxu1 %v7583_v36  ;;  %3916 = vmatpush1.bf16.msra.mxu1 %v6616_v39  ;;  %v6627_v39 = vld [vmem:[#allocation7 + $0xe0] ss:$12 sps:$4 sm:$0xff]  }
 0x251   :  { %3134 = vmatmul.mubr.bf16.gmra.mrb[4].mxu0 %v7521_v63  ;;  %3917 = vmatprep.subr.bf16.mxu1 %v6621_v22 }
 0x252   :  { %3141 = vmatprep.mubr.bf16.mxu0 %v7535_v62  ;;  %v6619_v62 = vld [vmem:[#allocation7 + $0x108] ss:$12 sps:$4 sm:$0xff]  }
 0x254   :  { %v5418_v31 = vpop.f32.mrb[156].mxu0  ;;  %3918 = vmatpush1.bf16.msra.mxu1 %v6619_v62  ;;  %v6633_v62 = vld [vmem:[#allocation7 + $0x38] ss:$12 sps:$4 sm:$0xff]  }
 0x255   :  { %v5419_v6 = vpop.f32.mrb[157].mxu0  ;;  %3919 = vmatprep.subr.bf16.mxu1 %v6626_v32 }
 0x256   :  { %v7749_v48 = vadd.f32 %v5419_v6, %v5418_v31  ;;  %v5421_v50 = vpop.f32.mrb[158].mxu0 }
 0x257   :  { %2671 = vmatmul.mubr.bf16.gmra.mrb[88].mxu1 %v7581_v10  ;;  %v5422_v41 = vpop.f32.mrb[159].mxu0 }
 0x258   :  { %v7752_v49 = vadd.f32 %v5422_v41, %v5421_v50  ;;  %2680 = vmatprep.mubr.bf16.mxu1 %v7595_v13  ;;  %3920 = vmatpush1.bf16.msra.mxu1 %v6624_v43  ;;  %v6629_v50 = vld [vmem:[#allocation7 + $0x138] ss:$12 sps:$4 sm:$0xff]   ;;  %v6631_v41 = vld [vmem:[#allocation7 + $0x13c] ss:$12 sps:$4 sm:$0xff]   ;;  %v6638_v43 = vld [vmem:[#allocation7 + $0x154] ss:$12 sps:$4 sm:$0xff]  }
 0x259   :  { %3142 = vmatmul.mubr.bf16.gmra.mrb[8].mxu0 %v7533_v16  ;;  %v6622_v16 = vld [vmem:[#allocation7 + $0xc8] ss:$12 sps:$4 sm:$0xff]   ;;  %3921 = vmatprep.subr.bf16.mxu1 %v6631_v41 }
 0x25a   :  { %3149 = vmatprep.mubr.bf16.mxu0 %v7547_v0  ;;  %v6623_v0 = vld [vmem:[#allocation7 + $0x8] ss:$12 sps:$4 sm:$0xff]   ;;  %5696 = vmatprep.subr.bf16.mxu0 %v6622_v16 }
 0x25b   :  { %5697 = vmatpush3.bf16.msra.mxu0 %v6623_v0  ;;  %v6639_v16 = vld [vmem:[#allocation7 + $0x128] ss:$12 sps:$4 sm:$0xff]  }
 0x25c   :  { %v5424_v63 = vpop.f32.mrb[160].mxu0  ;;  %5698 = vmatprep.subr.bf16.mxu0 %v6627_v39  ;;  %3922 = vmatpush1.bf16.msra.mxu1 %v6629_v50  ;;  %v6647_v50 = vld [vmem:[#allocation7 + $0x98] ss:$12 sps:$4 sm:$0xff]  }
 0x25d   :  { %v5425_v57 = vpop.f32.mrb[161].mxu0  ;;  %3923 = vmatprep.subr.bf16.mxu1 %v6638_v43 }
 0x25e   :  { %v7757_v34 = vadd.f32 %v5425_v57, %v5424_v63  ;;  %v5427_v54 = vpop.f32.mrb[162].mxu0 }
 0x25f   :  { %2681 = vmatmul.mubr.bf16.gmra.mrb[92].mxu1 %v7593_v59  ;;  %v5428_v9 = vpop.f32.mrb[163].mxu0 }
 0x260   :  { %v7760_v44 = vadd.f32 %v5428_v9, %v5427_v54  ;;  %2690 = vmatprep.mubr.bf16.mxu1 %v7607_v30 }
 0x261   :  { %3150 = vmatmul.mubr.bf16.gmra.mrb[12].mxu0 %v7545_v23  ;;  %v6628_v23 = vld [vmem:[#allocation7 + $0x20] ss:$12 sps:$4 sm:$0xff]  }
 0x262   :  { %3157 = vmatprep.mubr.bf16.mxu0 %v7559_v27  ;;  %5699 = vmatpush3.bf16.msra.mxu0 %v6628_v23  ;;  %v6632_v27 = vld [vmem:[#allocation7 + $0xf8] ss:$12 sps:$4 sm:$0xff]  }
 0x263   :  { %5700 = vmatprep.subr.bf16.mxu0 %v6632_v27  ;;  %v6646_v27 = vld [vmem:[#allocation7 + $0x158] ss:$12 sps:$4 sm:$0xff]  }
 0x264   :  { %v5430_v51 = vpop.f32.mrb[164].mxu0 }
 0x265   :  { %v5431_v40 = vpop.f32.mrb[165].mxu0 }
 0x266   :  { %v7765_v28 = vadd.f32 %v5431_v40, %v5430_v51  ;;  %v5433_v21 = vpop.f32.mrb[166].mxu0  ;;  %5701 = vmatpush3.bf16.msra.mxu0 %v6633_v62  ;;  %v6636_v51 = vld [vmem:[#allocation7 + $0x150] ss:$12 sps:$4 sm:$0xff]   ;;  %v6640_v40 = vld [vmem:[#allocation7 + $0x68] ss:$12 sps:$4 sm:$0xff]  }
 0x267   :  { %2691 = vmatmul.mubr.bf16.gmra.mrb[96].mxu1 %v7605_v12  ;;  %v5434_v31 = vpop.f32.mrb[167].mxu0 }
 0x268   :  { %v7768_v53 = vadd.f32 %v5434_v31, %v5433_v21  ;;  %2700 = vmatprep.mubr.bf16.mxu1 %v7619_v20  ;;  %3924 = vmatpush1.bf16.msra.mxu1 %v6636_v51 }
 0x269   :  { %3158 = vmatmul.mubr.bf16.gmra.mrb[16].mxu0 %v7557_v1  ;;  %v6634_v1 = vld [vmem:[#allocation7 + $0x110] ss:$12 sps:$4 sm:$0xff]  }
 0x26a   :  { %3165 = vmatprep.mubr.bf16.mxu0 %v7571_v33  ;;  %v6635_v33 = vld [vmem:[#allocation7 + $0x50] ss:$12 sps:$4 sm:$0xff]   ;;  %5702 = vmatprep.subr.bf16.mxu0 %v6634_v1 }
 0x26b   :  { %5703 = vmatpush3.bf16.msra.mxu0 %v6635_v33  ;;  %v6648_v1 = vld [vmem:[#allocation7 + $0x170] ss:$12 sps:$4 sm:$0xff]  }
 0x26c   :  { %v5436_v6 = vpop.f32.mrb[168].mxu0  ;;  %5704 = vmatprep.subr.bf16.mxu0 %v6639_v16 }
 0x26d   :  { %v5437_v63 = vpop.f32.mrb[169].mxu0 }
 0x26e   :  { %v7773_v22 = vadd.f32 %v5437_v63, %v5436_v6  ;;  %v5439_v57 = vpop.f32.mrb[170].mxu0 }
 0x26f   :  { %2701 = vmatmul.mubr.bf16.gmra.mrb[100].mxu1 %v7617_v52  ;;  %v5440_v54 = vpop.f32.mrb[171].mxu0  ;;  %5705 = vmatpush3.bf16.msra.mxu0 %v6640_v40 }
 0x270   :  { %v7776_v9 = vadd.f32 %v5440_v54, %v5439_v57  ;;  %2710 = vmatprep.mubr.bf16.mxu1 %v7631_v7  ;;  %v6645_v54 = vld [vmem:[#allocation7 + $0x16c] ss:$12 sps:$4 sm:$0xff]  }
 0x271   :  { %3166 = vmatmul.mubr.bf16.gmra.mrb[20].mxu0 %v7569_v35  ;;  %v6641_v35 = vld [vmem:[#allocation7 + $0x140] ss:$12 sps:$4 sm:$0xff]   ;;  %3925 = vmatprep.subr.bf16.mxu1 %v6645_v54 }
 0x272   :  { %3173 = vmatprep.mubr.bf16.mxu0 %v7583_v36  ;;  %v6642_v36 = vld [vmem:[#allocation7 + $0x80] ss:$12 sps:$4 sm:$0xff]   ;;  %5706 = vmatprep.subr.bf16.mxu0 %v6641_v35 }
 0x273   :  { %5707 = vmatpush3.bf16.msra.mxu0 %v6642_v36 }
 0x274   :  { %v5442_v0 = vpop.f32.mrb[172].mxu0  ;;  %5708 = vmatprep.subr.bf16.mxu0 %v6646_v27 }
 0x275   :  { %v5443_v32 = vpop.f32.mrb[173].mxu0 }
 0x276   :  { %v7781_v21 = vadd.f32 %v5443_v32, %v5442_v0  ;;  %v5445_v31 = vpop.f32.mrb[174].mxu0 }
 0x277   :  { %2711 = vmatmul.mubr.bf16.gmra.mrb[104].mxu1 %v7629_v11  ;;  %v5446_v39 = vpop.f32.mrb[175].mxu0  ;;  %5709 = vmatpush3.bf16.msra.mxu0 %v6647_v50 }
 0x278   :  { %v7784_v23 = vadd.f32 %v5446_v39, %v5445_v31  ;;  %2720 = vmatprep.mubr.bf16.mxu1 %v7643_v58  ;;  %5710 = vmatprep.subr.bf16.mxu0 %v6648_v1 }
 0x279   :  { %3174 = vmatmul.mubr.bf16.gmra.mrb[24].mxu0 %v7581_v10  ;;  %v6643_v10 = vld [vmem:[#allocation7 + $0x168] ss:$12 sps:$4 sm:$0xff]  }
 0x27a   :  { %3181 = vmatprep.mubr.bf16.mxu0 %v7595_v13  ;;  %v6649_v13 = vld [vmem:[#allocation7 + $0xb0] ss:$12 sps:$4 sm:$0xff]   ;;  %3926 = vmatpush1.bf16.msra.mxu1 %v6643_v10 }
 0x27b   :  { %5711 = vmatpush3.bf16.msra.mxu0 %v6649_v13 }
 0x27c   :  { %v5448_v6 = vpop.f32.mrb[176].mxu0 }
 0x27d   :  { %v5449_v41 = vpop.f32.mrb[177].mxu0 }
 0x27e   :  { %v7789_v63 = vadd.f32 %v5449_v41, %v5448_v6  ;;  %v5451_v62 = vpop.f32.mrb[178].mxu0 }
 0x27f   :  { %2721 = vmatmul.mubr.bf16.gmra.mrb[108].mxu1 %v7641_v25  ;;  %v5452_v57 = vpop.f32.mrb[179].mxu0 }
 0x280   :  { %v7792_v33 = vadd.f32 %v5452_v57, %v5451_v62  ;;  %2730 = vmatprep.mubr.bf16.mxu1 %v7655_v61 }
 0x281   :  { %3182 = vmatmul.mubr.bf16.gmra.mrb[28].mxu0 %v7593_v59  ;;  %v6652_v59 = vld [vmem:[#allocation7 + $0x184] ss:$12 sps:$4 sm:$0xff]  }
 0x282   :  { %3189 = vmatprep.mubr.bf16.mxu0 %v7607_v30  ;;  %4088 = vmatprep.subr.bf16.mxu1 %v6652_v59 }
 0x284   :  { %v5454_v16 = vpop.f32.mrb[180].mxu0 }
 0x285   :  { %v5455_v0 = vpop.f32.mrb[181].mxu0 }
 0x286   :  { %v7797_v51 = vadd.f32 %v5455_v0, %v5454_v16  ;;  %v5457_v43 = vpop.f32.mrb[182].mxu0 }
 0x287   :  { %2731 = vmatmul.mubr.bf16.gmra.mrb[112].mxu1 %v7653_v38  ;;  %v5458_v32 = vpop.f32.mrb[183].mxu0 }
 0x288   :  { %v7800_v40 = vadd.f32 %v5458_v32, %v5457_v43  ;;  %2740 = vmatprep.mubr.bf16.mxu1 %v7667_v8 }
 0x289   :  { %3190 = vmatmul.mubr.bf16.gmra.mrb[32].mxu0 %v7605_v12  ;;  %v7816_v12 = vld [vmem:[%s8550_s4] sm:$0x7] }
 0x28a   :  { %3197 = vmatprep.mubr.bf16.mxu0 %v7619_v20  ;;  %v7820_v50 = vrot.slane %v7816_v12, %v7166_v14 }
 0x28c   :  { %v5460_v30 = vpop.f32.mrb[184].mxu0  ;;  %v2806_v13 = vadd.f32 %v7693_v47, %v7820_v50  ;;  %v2814_v47 = vadd.f32 %v7701_v55, %v7820_v50  ;;  %v2822_v55 = vadd.f32 %v7709_v19, %v7820_v50  ;;  %v2830_v19 = vadd.f32 %v7717_v37, %v7820_v50 }
 0x28d   :  { %v5461_v31 = vpop.f32.mrb[185].mxu0  ;;  %v2838_v37 = vadd.f32 %v7725_v56, %v7820_v50 }
 0x28e   :  { %v7805_v39 = vadd.f32 %v5461_v31, %v5460_v30  ;;  %v5463_v35 = vpop.f32.mrb[186].mxu0 }
 0x28f   :  { %2741 = vmatmul.mubr.bf16.gmra.mrb[116].mxu1 %v7665_v29  ;;  %v5464_v36 = vpop.f32.mrb[187].mxu0 }
 0x290   :  { %v7808_v27 = vadd.f32 %v5464_v36, %v5463_v35  ;;  %2750 = vmatprep.mubr.bf16.mxu1 %v7679_v5 }
 0x291   :  { %3198 = vmatmul.mubr.bf16.gmra.mrb[36].mxu0 %v7617_v52 }
 0x292   :  { %3205 = vmatprep.mubr.bf16.mxu0 %v7631_v7 }
 0x294   :  { %v5466_v20 = vpop.f32.mrb[188].mxu0 }
 0x295   :  { %v5467_v6 = vpop.f32.mrb[189].mxu0 }
 0x296   :  { %v5468_v41 = vadd.f32 %v5467_v6, %v5466_v20  ;;  %v5469_v62 = vpop.f32.mrb[190].mxu0 }
 0x297   :  { %2751 = vmatmul.mubr.bf16.gmra.mrb[120].mxu1 %v7677_v18  ;;  %v5470_v57 = vpop.f32.mrb[191].mxu0 }
 0x298   :  { %v7824_v52 = vadd.f32 %v5468_v41, %v7820_v50  ;;  %v5471_v7 = vadd.f32 %v5470_v57, %v5469_v62  ;;  %2760 = vmatprep.mubr.bf16.mxu1 %v7691_v45 }
 0x299   :  { %3206 = vmatmul.mubr.bf16.gmra.mrb[40].mxu0 %v7629_v11  ;;  %v2809_v11 = vadd.f32 %v7696_v15, %v7820_v50  ;;  %v2817_v15 = vadd.f32 %v7704_v4, %v7820_v50  ;;  %v2825_v4 = vadd.f32 %v7712_v17, %v7820_v50  ;;  %v2833_v17 = vadd.f32 %v7720_v26, %v7820_v50 }
 0x29a   :  { %v7829_v54 = vadd.f32 %v5471_v7, %v7820_v50  ;;  %3213 = vmatprep.mubr.bf16.mxu0 %v7643_v58  ;;  %v2841_v26 = vadd.f32 %v7728_v60, %v7820_v50 }
 0x29c   :  { %v5488_v1 = vpop.f32.mrb[192].mxu0 }
 0x29d   :  { %v5489_v10 = vpop.f32.mrb[193].mxu0 }
 0x29e   :  { %v5490_v16 = vadd.f32 %v5489_v10, %v5488_v1  ;;  %v5491_v0 = vpop.f32.mrb[194].mxu0 }
 0x29f   :  { %2761 = vmatmul.mubr.bf16.gmra.mrb[124].mxu1 %v7689_v42  ;;  %v5492_v43 = vpop.f32.mrb[195].mxu0 }
 0x2a0   :  { %v7835_v32 = vadd.f32 %v5490_v16, %v2806_v13  ;;  %v5493_v59 = vadd.f32 %v5492_v43, %v5491_v0 }
 0x2a1   :  { %3214 = vmatmul.mubr.bf16.gmra.mrb[44].mxu0 %v7641_v25 }
 0x2a2   :  { %v7840_v30 = vadd.f32 %v5493_v59, %v2809_v11  ;;  %3221 = vmatprep.mubr.bf16.mxu0 %v7655_v61 }
 0x2a4   :  { %v5494_v58 = vpop.f32.mrb[196].mxu0 }
 0x2a5   :  { %v5495_v31 = vpop.f32.mrb[197].mxu0 }
 0x2a6   :  { %v5496_v35 = vadd.f32 %v5495_v31, %v5494_v58  ;;  %v5497_v36 = vpop.f32.mrb[198].mxu0 }
 0x2a7   :  { %v5498_v20 = vpop.f32.mrb[199].mxu0 }
 0x2a8   :  { %v7845_v6 = vadd.f32 %v5496_v35, %v2814_v47  ;;  %v5499_v41 = vadd.f32 %v5498_v20, %v5497_v36 }
 0x2a9   :  { %3222 = vmatmul.mubr.bf16.gmra.mrb[48].mxu0 %v7653_v38 }
 0x2aa   :  { %v7850_v25 = vadd.f32 %v5499_v41, %v2817_v15  ;;  %3229 = vmatprep.mubr.bf16.mxu0 %v7667_v8 }
 0x2ac   :  { %v5500_v61 = vpop.f32.mrb[200].mxu0 }
 0x2ad   :  { %v5501_v62 = vpop.f32.mrb[201].mxu0 }
 0x2ae   :  { %v5502_v57 = vadd.f32 %v5501_v62, %v5500_v61  ;;  %v5503_v7 = vpop.f32.mrb[202].mxu0  ;;  %v2846_v61 = vadd.f32 %v7733_v24, %v7820_v50 }
 0x2af   :  { %v5504_v1 = vpop.f32.mrb[203].mxu0 }
 0x2b0   :  { %v7855_v10 = vadd.f32 %v5502_v57, %v2822_v55  ;;  %v5505_v13 = vadd.f32 %v5504_v1, %v5503_v7  ;;  %v2849_v7 = vadd.f32 %v7736_v3, %v7820_v50 }
 0x2b1   :  { %3230 = vmatmul.mubr.bf16.gmra.mrb[52].mxu0 %v7665_v29 }
 0x2b2   :  { %v7860_v38 = vadd.f32 %v5505_v13, %v2825_v4  ;;  %3237 = vmatprep.mubr.bf16.mxu0 %v7679_v5  ;;  %v2854_v13 = vadd.f32 %v7741_v2, %v7820_v50 }
 0x2b4   :  { %v5506_v8 = vpop.f32.mrb[204].mxu0 }
 0x2b5   :  { %v5507_v16 = vpop.f32.mrb[205].mxu0 }
 0x2b6   :  { %v5508_v0 = vadd.f32 %v5507_v16, %v5506_v8  ;;  %v5509_v43 = vpop.f32.mrb[206].mxu0 }
 0x2b7   :  { %v5510_v11 = vpop.f32.mrb[207].mxu0 }
 0x2b8   :  { %v7865_v59 = vadd.f32 %v5508_v0, %v2830_v19  ;;  %v5511_v58 = vadd.f32 %v5510_v11, %v5509_v43  ;;  %v2857_v0 = vadd.f32 %v7744_v46, %v7820_v50 }
 0x2b9   :  { %3238 = vmatmul.mubr.bf16.gmra.mrb[56].mxu0 %v7677_v18 }
 0x2ba   :  { %v7870_v29 = vadd.f32 %v5511_v58, %v2833_v17  ;;  %3245 = vmatprep.mubr.bf16.mxu0 %v7691_v45  ;;  %v2862_v58 = vadd.f32 %v7749_v48, %v7820_v50  ;;  %v2873_v48 = vadd.f32 %v7760_v44, %v7820_v50  ;;  %v2881_v44 = vadd.f32 %v7768_v53, %v7820_v50 }
 0x2bc   :  { %v5512_v5 = vpop.f32.mrb[208].mxu0 }
 0x2bd   :  { %v5513_v31 = vpop.f32.mrb[209].mxu0 }
 0x2be   :  { %v5514_v47 = vadd.f32 %v5513_v31, %v5512_v5  ;;  %v5515_v35 = vpop.f32.mrb[210].mxu0 }
 0x2bf   :  { %v5516_v36 = vpop.f32.mrb[211].mxu0 }
 0x2c0   :  { %v7875_v20 = vadd.f32 %v5514_v47, %v2838_v37  ;;  %v5517_v15 = vadd.f32 %v5516_v36, %v5515_v35  ;;  %v2865_v47 = vadd.f32 %v7752_v49, %v7820_v50  ;;  %v7914_v49 = vld [vmem:[#allocation7 + $0x188] ss:$12 sps:$4 sm:$0xff]  }
 0x2c1   :  { %3246 = vmatmul.mubr.bf16.gmra.mrb[60].mxu0 %v7689_v42  ;;  %5884 = vmatprep.subr.bf16.mxu0 %v7914_v49 }
 0x2c2   :  { %v7880_v18 = vadd.f32 %v5517_v15, %v2841_v26  ;;  %v2870_v15 = vadd.f32 %v7757_v34, %v7820_v50  ;;  %v2878_v34 = vadd.f32 %v7765_v28, %v7820_v50  ;;  %v2889_v28 = vadd.f32 %v7776_v9, %v7820_v50 }
 0x2c3   :  { %v2897_v9 = vadd.f32 %v7784_v23, %v7820_v50 }
 0x2c4   :  { %v5518_v41 = vpop.f32.mrb[212].mxu0 }
 0x2c5   :  { %v5519_v45 = vpop.f32.mrb[213].mxu0 }
 0x2c6   :  { %v5520_v62 = vadd.f32 %v5519_v45, %v5518_v41  ;;  %v5521_v56 = vpop.f32.mrb[214].mxu0 }
 0x2c7   :  { %v5522_v55 = vpop.f32.mrb[215].mxu0 }
 0x2c8   :  { %v7884_v57 = vadd.f32 %v5520_v62, %v2846_v61  ;;  %v5523_v1 = vadd.f32 %v5522_v55, %v5521_v56 }
 0x2ca   :  { %v7888_v60 = vadd.f32 %v5523_v1, %v2849_v7 }
 0x2cc   :  { %v5524_v4 = vpop.f32.mrb[216].mxu0 }
 0x2cd   :  { %v5525_v42 = vpop.f32.mrb[217].mxu0 }
 0x2ce   :  { %v5526_v8 = vadd.f32 %v5525_v42, %v5524_v4  ;;  %v5527_v16 = vpop.f32.mrb[218].mxu0 }
 0x2cf   :  { %v5528_v19 = vpop.f32.mrb[219].mxu0 }
 0x2d0   :  { %v7892_v24 = vadd.f32 %v5526_v8, %v2854_v13  ;;  %v5529_v43 = vadd.f32 %v5528_v19, %v5527_v16 }
 0x2d2   :  { %v7896_v11 = vadd.f32 %v5529_v43, %v2857_v0 }
 0x2d4   :  { %v5530_v3 = vpop.f32.mrb[220].mxu0 }
 0x2d5   :  { %v5531_v17 = vpop.f32.mrb[221].mxu0 }
 0x2d6   :  { %v5532_v5 = vadd.f32 %v5531_v17, %v5530_v3  ;;  %v5533_v31 = vpop.f32.mrb[222].mxu0  ;;  %v2886_v3 = vadd.f32 %v7773_v22, %v7820_v50  ;;  %v8566_v22 = vld [vmem:[#allocation13_spill] sm:$0xff] }
 0x2d7   :  { %v5534_v37 = vpop.f32.mrb[223].mxu0 }
 0x2d8   :  { %v7900_v2 = vadd.f32 %v5532_v5, %v2862_v58  ;;  %v5535_v35 = vadd.f32 %v5534_v37, %v5533_v31 }
 0x2da   :  { %v7904_v36 = vadd.f32 %v5535_v35, %v2865_v47 }
 0x2dc   :  { %v5536_v46 = vpop.f32.mrb[224].mxu0 }
 0x2dd   :  { %v5537_v26 = vpop.f32.mrb[225].mxu0 }
 0x2de   :  { %v5538_v41 = vadd.f32 %v5537_v26, %v5536_v46  ;;  %v5539_v45 = vpop.f32.mrb[226].mxu0  ;;  %v2894_v46 = vadd.f32 %v7781_v21, %v7820_v50 }
 0x2df   :  { %v5540_v61 = vpop.f32.mrb[227].mxu0 }
 0x2e0   :  { %v7910_v62 = vadd.f32 %v5538_v41, %v2870_v15  ;;  %v5541_v56 = vadd.f32 %v5540_v61, %v5539_v45  ;;  %v7937_v45 = vrot.slane %v7816_v12, %v8566_v22 }
 0x2e2   :  { %v7912_v55 = vadd.f32 %v5541_v56, %v2873_v48  ;;  %v8567_v56 = vld [vmem:[#allocation14_spill] sm:$0xff] }
 0x2e4   :  { %v5542_v7 = vpop.f32.mrb[228].mxu0 }
 0x2e5   :  { %v5543_v1 = vpop.f32.mrb[229].mxu0 }
 0x2e6   :  { %v5544_v4 = vadd.f32 %v5543_v1, %v5542_v7  ;;  %v5545_v42 = vpop.f32.mrb[230].mxu0  ;;  %v7945_v7 = vrot.slane %v7816_v12, %v8567_v56 }
 0x2e7   :  { %v5546_v13 = vpop.f32.mrb[231].mxu0 }
 0x2e8   :  { %v7921_v8 = vadd.f32 %v5544_v4, %v2878_v34  ;;  %v5547_v16 = vadd.f32 %v5546_v13, %v5545_v42 }
 0x2ea   :  { %v7923_v19 = vadd.f32 %v5547_v16, %v2881_v44 }
 0x2ec   :  { %v5548_v0 = vpop.f32.mrb[232].mxu0 }
 0x2ed   :  { %v5549_v43 = vpop.f32.mrb[233].mxu0 }
 0x2ee   :  { %v5550_v17 = vadd.f32 %v5549_v43, %v5548_v0  ;;  %v5551_v58 = vpop.f32.mrb[234].mxu0  ;;  %v2902_v43 = vadd.f32 %v7789_v63, %v7820_v50 }
 0x2ef   :  { %v5552_v5 = vpop.f32.mrb[235].mxu0 }
 0x2f0   :  { %v7929_v31 = vadd.f32 %v5550_v17, %v2886_v3  ;;  %v5553_v37 = vadd.f32 %v5552_v5, %v5551_v58  ;;  %v2905_v58 = vadd.f32 %v7792_v33, %v7820_v50 }
 0x2f2   :  { %v7931_v53 = vadd.f32 %v5553_v37, %v2889_v28 }
 0x2f4   :  { %v5554_v47 = vpop.f32.mrb[236].mxu0 }
 0x2f5   :  { %v5555_v35 = vpop.f32.mrb[237].mxu0 }
 0x2f6   :  { %v5556_v26 = vadd.f32 %v5555_v35, %v5554_v47  ;;  %v5557_v15 = vpop.f32.mrb[238].mxu0 }
 0x2f7   :  { %v5558_v41 = vpop.f32.mrb[239].mxu0 }
 0x2f8   :  { %v7941_v61 = vadd.f32 %v5556_v26, %v2894_v46  ;;  %v5559_v48 = vadd.f32 %v5558_v41, %v5557_v15 }
 0x2fa   :  { %v7947_v1 = vadd.f32 %v5559_v48, %v2897_v9  ;;  %v2612_v21 = vpop.f32.mrb[64].mxu1  ;;  %v6650_v48 = vld [vmem:[#allocation7 + $0x180] ss:$12 sps:$4 sm:$0xff]  }
 0x2fb   :  { %v6023_v34 = vadd.f32 %v2612_v21, %v7937_v45  ;;  %v2614_v4 = vpop.f32.mrb[65].mxu1 }
 0x2fc   :  { %v6024_v42 = vadd.f32 %v2614_v4, %v7945_v7  ;;  %v2616_v13 = vpop.f32.mrb[66].mxu1  ;;  %v5560_v44 = vpop.f32.mrb[240].mxu0 }
 0x2fd   :  { %v6025_v16 = vadd.f32 %v2616_v13, %v7937_v45  ;;  %v2618_v23 = vpop.f32.mrb[67].mxu1  ;;  %v5561_v0 = vpop.f32.mrb[241].mxu0  ;;  %v3254_v5 = vmax.f32 %v6023_v34, 0.0  ;;  %v6655_v13 = vld [vmem:[#allocation7 + $0x19c] ss:$12 sps:$4 sm:$0xff]  }
 0x2fe   :  { %v6026_v12 = vadd.f32 %v2618_v23, %v7945_v7  ;;  %v5562_v3 = vadd.f32 %v5561_v0, %v5560_v44  ;;  %v5563_v17 = vpop.f32.mrb[242].mxu0  ;;  %v3255_v47 = vmax.f32 %v6024_v42, 0.0  ;;  %v6672_v44 = vld [vmem:[#allocation7 + $0x1a0] ss:$12 sps:$4 sm:$0xff]  }
 0x2ff   :  { %v3257_v28 = vmax.f32 %v6025_v16, 0.0  ;;  %v5564_v37 = vpop.f32.mrb[243].mxu0 }
 0x300   :  { %v3258_v35 = vmax.f32 %v6026_v12, 0.0  ;;  %v7957_v46 = vadd.f32 %v5562_v3, %v2902_v43  ;;  %v5565_v26 = vadd.f32 %v5564_v37, %v5563_v17  ;;  %v2910_v43 = vadd.f32 %v7797_v51, %v7820_v50 }
 0x301   :  { %v3350_v15 = vpack.c.bf16 %v3257_v28, %v3254_v5  ;;  %v6658_v5 = vld [vmem:[#allocation7 + $0x1b4] ss:$12 sps:$4 sm:$0xff]   ;;  %v2913_v28 = vadd.f32 %v7800_v40, %v7820_v50 }
 0x302   :  { %v3351_v41 = vpack.c.bf16 %v3258_v35, %v3255_v47  ;;  %v7959_v9 = vadd.f32 %v5565_v26, %v2905_v58  ;;  %v2622_v63 = vpop.f32.mrb[68].mxu1  ;;  %v6653_v58 = vld [vmem:[#allocation7 + $0x198] ss:$12 sps:$4 sm:$0xff]  }
 0x303   :  { %v6027_v21 = vadd.f32 %v2622_v63, %v7937_v45  ;;  %v2624_v4 = vpop.f32.mrb[69].mxu1  ;;  %v6673_v26 = vld [vmem:[#allocation7 + $0x1b8] ss:$12 sps:$4 sm:$0xff]  }
 0x304   :  { %v6028_v33 = vadd.f32 %v2624_v4, %v7945_v7  ;;  %v2626_v34 = vpop.f32.mrb[70].mxu1  ;;  %v5566_v16 = vpop.f32.mrb[244].mxu0  ;;  %3927 = vmatprep.mubr.bf16.mxu1 %v3351_v41  ;;  %4313 = vmatprep.mubr.bf16.mxu0 %v3351_v41 }
 0x305   :  { %v6029_v42 = vadd.f32 %v2626_v34, %v7937_v45  ;;  %v2628_v23 = vpop.f32.mrb[71].mxu1  ;;  %v5567_v0 = vpop.f32.mrb[245].mxu0  ;;  %3928 = vmatmul.mubr.bf16.vlgmr.msra.gmra.mrb[128].mxu1 %v3350_v15  ;;  %4314 = vmatmul.mubr.bf16.vlgmr.msra.gmra.mrb[64].mxu0 %v3350_v15  ;;  %v3260_v37 = vmax.f32 %v6027_v21, 0.0 }
 0x306   :  { %v6030_v12 = vadd.f32 %v2628_v23, %v7945_v7  ;;  %v5568_v3 = vadd.f32 %v5567_v0, %v5566_v16  ;;  %4089 = vmatpush1.bf16.msra.mxu1 %v6650_v48  ;;  %v5569_v17 = vpop.f32.mrb[246].mxu0  ;;  %5885 = vmatpush3.bf16.msra.mxu0 %v7914_v49  ;;  %v3261_v15 = vmax.f32 %v6028_v33, 0.0  ;;  %v6656_v49 = vld [vmem:[#allocation7 + $0x1b0] ss:$12 sps:$4 sm:$0xff]  }
 0x307   :  { %v3263_v47 = vmax.f32 %v6029_v42, 0.0  ;;  %v5570_v35 = vpop.f32.mrb[247].mxu0  ;;  %4090 = vmatprep.subr.bf16.mxu1 %v6655_v13  ;;  %5886 = vmatprep.subr.bf16.mxu0 %v6672_v44  ;;  %v6661_v13 = vld [vmem:[#allocation7 + $0x1cc] ss:$12 sps:$4 sm:$0xff]   ;;  %v6674_v42 = vld [vmem:[#allocation7 + $0x1d0] ss:$12 sps:$4 sm:$0xff]  }
 0x308   :  { %v3264_v51 = vmax.f32 %v6030_v12, 0.0  ;;  %v7970_v41 = vadd.f32 %v5568_v3, %v2910_v43  ;;  %v5571_v63 = vadd.f32 %v5570_v35, %v5569_v17 }
 0x309   :  { %v3353_v48 = vpack.c.bf16 %v3263_v47, %v3260_v37  ;;  %v6664_v37 = vld [vmem:[#allocation7 + $0x1e4] ss:$12 sps:$4 sm:$0xff]   ;;  %v2921_v47 = vadd.f32 %v7808_v27, %v7820_v50 }
 0x30a   :  { %v3354_v4 = vpack.c.bf16 %v3264_v51, %v3261_v15  ;;  %v7972_v34 = vadd.f32 %v5571_v63, %v2913_v28  ;;  %v2632_v16 = vpop.f32.mrb[72].mxu1  ;;  %4091 = vmatpush1.bf16.msra.mxu1 %v6653_v58  ;;  %5887 = vmatpush3.bf16.msra.mxu0 %v6672_v44  ;;  %v2918_v44 = vadd.f32 %v7805_v39, %v7820_v50  ;;  %v6659_v28 = vld [vmem:[#allocation7 + $0x1c8] ss:$12 sps:$4 sm:$0xff]  }
 0x30b   :  { %v6031_v40 = vadd.f32 %v2632_v16, %v7937_v45  ;;  %v2634_v21 = vpop.f32.mrb[73].mxu1  ;;  %4092 = vmatprep.subr.bf16.mxu1 %v6658_v5  ;;  %5888 = vmatprep.subr.bf16.mxu0 %v6673_v26  ;;  %v6678_v63 = vld [vmem:[#allocation7 + $0x1e8] ss:$12 sps:$4 sm:$0xff]  }
 0x30c   :  { %v6032_v33 = vadd.f32 %v2634_v21, %v7945_v7  ;;  %v2636_v23 = vpop.f32.mrb[74].mxu1  ;;  %v5572_v0 = vpop.f32.mrb[248].mxu0  ;;  %3937 = vmatprep.mubr.bf16.mxu1 %v3354_v4  ;;  %4321 = vmatprep.mubr.bf16.mxu0 %v3354_v4 }
 0x30d   :  { %v6033_v43 = vadd.f32 %v2636_v23, %v7937_v45  ;;  %v2638_v12 = vpop.f32.mrb[75].mxu1  ;;  %v5573_v3 = vpop.f32.mrb[249].mxu0  ;;  %3938 = vmatmul.mubr.bf16.gmra.mrb[132].mxu1 %v3353_v48  ;;  %4322 = vmatmul.mubr.bf16.gmra.mrb[68].mxu0 %v3353_v48  ;;  %v3266_v35 = vmax.f32 %v6031_v40, 0.0  ;;  %v6667_v40 = vld [vmem:[#allocation7 + $0x1fc] ss:$12 sps:$4 sm:$0xff]  }
 0x30e   :  { %v6034_v17 = vadd.f32 %v2638_v12, %v7945_v7  ;;  %v5574_v58 = vadd.f32 %v5573_v3, %v5572_v0  ;;  %v5575_v5 = vpop.f32.mrb[250].mxu0  ;;  %4093 = vmatpush1.bf16.msra.mxu1 %v6656_v49  ;;  %5889 = vmatpush3.bf16.msra.mxu0 %v6673_v26  ;;  %v3267_v48 = vmax.f32 %v6032_v33, 0.0  ;;  %v6662_v26 = vld [vmem:[#allocation7 + $0x1e0] ss:$12 sps:$4 sm:$0xff]  }
 0x30f   :  { %v3269_v15 = vmax.f32 %v6033_v43, 0.0  ;;  %v5576_v51 = vpop.f32.mrb[251].mxu0  ;;  %4094 = vmatprep.subr.bf16.mxu1 %v6661_v13  ;;  %5890 = vmatprep.subr.bf16.mxu0 %v6674_v42  ;;  %v6679_v13 = vld [vmem:[#allocation7 + $0x200] ss:$12 sps:$4 sm:$0xff]  }
 0x310   :  { %v3270_v4 = vmax.f32 %v6034_v17, 0.0  ;;  %v7982_v39 = vadd.f32 %v5574_v58, %v2918_v44  ;;  %v5577_v16 = vadd.f32 %v5576_v51, %v5575_v5  ;;  %v6680_v51 = vld [vmem:[#allocation7 + $0x218] ss:$12 sps:$4 sm:$0xff]  }
 0x311   :  { %v3356_v21 = vpack.c.bf16 %v3269_v15, %v3266_v35 }
 0x312   :  { %v3357_v23 = vpack.c.bf16 %v3270_v4, %v3267_v48  ;;  %v7984_v49 = vadd.f32 %v5577_v16, %v2921_v47  ;;  %v2642_v0 = vpop.f32.mrb[76].mxu1  ;;  %4095 = vmatpush1.bf16.msra.mxu1 %v6659_v28  ;;  %5891 = vmatpush3.bf16.msra.mxu0 %v6674_v42  ;;  %v6665_v28 = vld [vmem:[#allocation7 + $0x1f8] ss:$12 sps:$4 sm:$0xff]  }
 0x313   :  { %v6035_v27 = vadd.f32 %v2642_v0, %v7937_v45  ;;  %v2644_v50 = vpop.f32.mrb[77].mxu1  ;;  %4096 = vmatprep.subr.bf16.mxu1 %v6664_v37  ;;  %5892 = vmatprep.subr.bf16.mxu0 %v6678_v63  ;;  %v6671_v37 = vld [vmem:[#allocation7 + $0x214] ss:$12 sps:$4 sm:$0xff]  }
 0x314   :  { %v6036_v33 = vadd.f32 %v2644_v50, %v7945_v7  ;;  %v2646_v43 = vpop.f32.mrb[78].mxu1  ;;  %v5578_v12 = vpop.f32.mrb[252].mxu0  ;;  %3947 = vmatprep.mubr.bf16.mxu1 %v3357_v23  ;;  %4329 = vmatprep.mubr.bf16.mxu0 %v3357_v23 }
 0x315   :  { %v6037_v3 = vadd.f32 %v2646_v43, %v7937_v45  ;;  %v2648_v44 = vpop.f32.mrb[79].mxu1  ;;  %v5579_v17 = vpop.f32.mrb[253].mxu0  ;;  %3948 = vmatmul.mubr.bf16.gmra.mrb[136].mxu1 %v3356_v21  ;;  %4330 = vmatmul.mubr.bf16.gmra.mrb[72].mxu0 %v3356_v21  ;;  %v3272_v47 = vmax.f32 %v6035_v27, 0.0  ;;  %v6677_v43 = vld [vmem:[#allocation7 + $0x22c] ss:$12 sps:$4 sm:$0xff]  }
 0x316   :  { %v6038_v42 = vadd.f32 %v2648_v44, %v7945_v7  ;;  %v5580_v58 = vadd.f32 %v5579_v17, %v5578_v12  ;;  %v5581_v5 = vpop.f32.mrb[254].mxu0  ;;  %4097 = vmatpush1.bf16.msra.mxu1 %v6662_v26  ;;  %5893 = vmatpush3.bf16.msra.mxu0 %v6678_v63  ;;  %v3273_v48 = vmax.f32 %v6036_v33, 0.0  ;;  %v6669_v63 = vld [vmem:[#allocation7 + $0x210] ss:$12 sps:$4 sm:$0xff]  }
 0x317   :  { %v3275_v35 = vmax.f32 %v6037_v3, 0.0  ;;  %v5582_v15 = vpop.f32.mrb[255].mxu0  ;;  %4098 = vmatprep.subr.bf16.mxu1 %v6667_v40  ;;  %5894 = vmatprep.subr.bf16.mxu0 %v6679_v13  ;;  %v6681_v33 = vld [vmem:[#allocation7 + $0x230] ss:$12 sps:$4 sm:$0xff]  }
 0x318   :  { %v3276_v4 = vmax.f32 %v6038_v42, 0.0  ;;  %v7991_v16 = vadd.f32 %v5580_v58, %v7824_v52  ;;  %v5583_v21 = vadd.f32 %v5582_v15, %v5581_v5  ;;  %v6675_v5 = vld [vmem:[#allocation7 + $0x228] ss:$12 sps:$4 sm:$0xff]  }
 0x319   :  { %v3359_v23 = vpack.c.bf16 %v3275_v35, %v3272_v47 }
 0x31a   :  { %v3360_v0 = vpack.c.bf16 %v3276_v4, %v3273_v48  ;;  %v7994_v50 = vadd.f32 %v5583_v21, %v7829_v54  ;;  %v2652_v26 = vpop.f32.mrb[80].mxu1  ;;  %4099 = vmatpush1.bf16.msra.mxu1 %v6665_v28  ;;  %5895 = vmatpush3.bf16.msra.mxu0 %v6679_v13 }
 0x31b   :  { %v6039_v27 = vadd.f32 %v2652_v26, %v7937_v45  ;;  %v2654_v40 = vpop.f32.mrb[81].mxu1  ;;  %4100 = vmatprep.subr.bf16.mxu1 %v6671_v37  ;;  %5896 = vmatprep.subr.bf16.mxu0 %v6680_v51 }
 0x31c   :  { %v6040_v52 = vadd.f32 %v2654_v40, %v7945_v7  ;;  %v2656_v12 = vpop.f32.mrb[82].mxu1  ;;  %v5600_v3 = vpop.f32.mrb[0].mxu0  ;;  %3957 = vmatprep.mubr.bf16.mxu1 %v3360_v0  ;;  %4337 = vmatprep.mubr.bf16.mxu0 %v3360_v0 }
 0x31d   :  { %v6041_v54 = vadd.f32 %v2656_v12, %v7937_v45  ;;  %v2658_v44 = vpop.f32.mrb[83].mxu1  ;;  %v5601_v17 = vpop.f32.mrb[1].mxu0  ;;  %3958 = vmatmul.mubr.bf16.gmra.mrb[140].mxu1 %v3359_v23  ;;  %4338 = vmatmul.mubr.bf16.gmra.mrb[76].mxu0 %v3359_v23  ;;  %v3278_v28 = vmax.f32 %v6039_v27, 0.0 }
 0x31e   :  { %v6042_v13 = vadd.f32 %v2658_v44, %v7945_v7  ;;  %v5602_v42 = vadd.f32 %v5601_v17, %v5600_v3  ;;  %v5603_v58 = vpop.f32.mrb[2].mxu0  ;;  %4101 = vmatpush1.bf16.msra.mxu1 %v6669_v63  ;;  %5897 = vmatpush3.bf16.msra.mxu0 %v6680_v51  ;;  %v3279_v35 = vmax.f32 %v6040_v52, 0.0 }
 0x31f   :  { %v3281_v37 = vmax.f32 %v6041_v54, 0.0  ;;  %v5604_v47 = vpop.f32.mrb[3].mxu0  ;;  %4102 = vmatprep.subr.bf16.mxu1 %v6677_v43  ;;  %5898 = vmatprep.subr.bf16.mxu0 %v6681_v33 }
 0x320   :  { %v3282_v15 = vmax.f32 %v6042_v13, 0.0  ;;  %v3128_v48 = vadd.f32 %v5602_v42, %v7835_v32  ;;  %v5605_v4 = vadd.f32 %v5604_v47, %v5603_v58 }
 0x321   :  { %v3362_v21 = vpack.c.bf16 %v3281_v37, %v3278_v28 }
 0x322   :  { %v3363_v0 = vpack.c.bf16 %v3282_v15, %v3279_v35  ;;  %v3131_v23 = vadd.f32 %v5605_v4, %v7840_v30  ;;  %v2662_v26 = vpop.f32.mrb[84].mxu1  ;;  %4103 = vmatpush1.bf16.msra.mxu1 %v6675_v5  ;;  %5899 = vmatpush3.bf16.msra.mxu0 %v6681_v33  ;;  %v3256_v27 = vmax.f32 %v3128_v48, 0.0 }
 0x323   :  { %v6043_v63 = vadd.f32 %v2662_v26, %v7937_v45  ;;  %v2664_v51 = vpop.f32.mrb[85].mxu1 }
 0x324   :  { %v3259_v40 = vmax.f32 %v3131_v23, 0.0  ;;  %v6044_v43 = vadd.f32 %v2664_v51, %v7945_v7  ;;  %v2666_v12 = vpop.f32.mrb[86].mxu1  ;;  %v5606_v52 = vpop.f32.mrb[4].mxu0  ;;  %3967 = vmatprep.mubr.bf16.mxu1 %v3363_v0  ;;  %4345 = vmatprep.mubr.bf16.mxu0 %v3363_v0 }
 0x325   :  { %v6045_v32 = vadd.f32 %v2666_v12, %v7937_v45  ;;  %v2668_v3 = vpop.f32.mrb[87].mxu1  ;;  %v5607_v54 = vpop.f32.mrb[5].mxu0  ;;  %3968 = vmatmul.mubr.bf16.gmra.mrb[144].mxu1 %v3362_v21  ;;  %4346 = vmatmul.mubr.bf16.gmra.mrb[80].mxu0 %v3362_v21  ;;  %v3284_v13 = vmax.f32 %v6043_v63, 0.0 }
 0x326   :  { %v6046_v30 = vadd.f32 %v2668_v3, %v7945_v7  ;;  %v5608_v33 = vadd.f32 %v5607_v54, %v5606_v52  ;;  %v5609_v44 = vpop.f32.mrb[6].mxu0  ;;  %v8006_v17 = vpack.c.bf16 %v3259_v40, %v3256_v27  ;;  %v3285_v5 = vmax.f32 %v6044_v43, 0.0 }
 0x327   :  { %v3287_v42 = vmax.f32 %v6045_v32, 0.0  ;;  %v5610_v58 = vpop.f32.mrb[7].mxu0 }
 0x328   :  { %v3288_v28 = vmax.f32 %v6046_v30, 0.0  ;;  %v3136_v37 = vadd.f32 %v5608_v33, %v7845_v6  ;;  %v5611_v47 = vadd.f32 %v5610_v58, %v5609_v44 }
 0x329   :  { %v3365_v35 = vpack.c.bf16 %v3287_v42, %v3284_v13 }
 0x32a   :  { %v3366_v15 = vpack.c.bf16 %v3288_v28, %v3285_v5  ;;  %v3139_v48 = vadd.f32 %v5611_v47, %v7850_v25  ;;  %v2672_v4 = vpop.f32.mrb[88].mxu1  ;;  %v3262_v23 = vmax.f32 %v3136_v37, 0.0 }
 0x32b   :  { %v6047_v21 = vadd.f32 %v2672_v4, %v7937_v45  ;;  %v2674_v0 = vpop.f32.mrb[89].mxu1 }
 0x32c   :  { %v3265_v26 = vmax.f32 %v3139_v48, 0.0  ;;  %v6048_v51 = vadd.f32 %v2674_v0, %v7945_v7  ;;  %v2676_v63 = vpop.f32.mrb[90].mxu1  ;;  %v5612_v27 = vpop.f32.mrb[8].mxu0  ;;  %3977 = vmatprep.mubr.bf16.mxu1 %v3366_v15  ;;  %4353 = vmatprep.mubr.bf16.mxu0 %v3366_v15 }
 0x32d   :  { %v6049_v40 = vadd.f32 %v2676_v63, %v7937_v45  ;;  %v2678_v6 = vpop.f32.mrb[91].mxu1  ;;  %v5613_v43 = vpop.f32.mrb[9].mxu0  ;;  %3978 = vmatmul.mubr.bf16.gmra.mrb[148].mxu1 %v3365_v35  ;;  %4354 = vmatmul.mubr.bf16.gmra.mrb[84].mxu0 %v3365_v35  ;;  %v3290_v3 = vmax.f32 %v6047_v21, 0.0 }
 0x32e   :  { %v8013_v12 = vpack.c.bf16 %v3265_v26, %v3262_v23  ;;  %v6050_v25 = vadd.f32 %v2678_v6, %v7945_v7  ;;  %v5614_v52 = vadd.f32 %v5613_v43, %v5612_v27  ;;  %v5615_v32 = vpop.f32.mrb[10].mxu0  ;;  %v3291_v33 = vmax.f32 %v6048_v51, 0.0 }
 0x32f   :  { %v3293_v54 = vmax.f32 %v6049_v40, 0.0  ;;  %v5616_v30 = vpop.f32.mrb[11].mxu0 }
 0x330   :  { %v3294_v44 = vmax.f32 %v6050_v25, 0.0  ;;  %v3144_v13 = vadd.f32 %v5614_v52, %v7855_v10  ;;  %v5617_v42 = vadd.f32 %v5616_v30, %v5615_v32 }
 0x331   :  { %v3368_v58 = vpack.c.bf16 %v3293_v54, %v3290_v3 }
 0x332   :  { %v3369_v5 = vpack.c.bf16 %v3294_v44, %v3291_v33  ;;  %v3147_v28 = vadd.f32 %v5617_v42, %v7860_v38  ;;  %v2682_v37 = vpop.f32.mrb[92].mxu1  ;;  %v3268_v15 = vmax.f32 %v3144_v13, 0.0 }
 0x333   :  { %v6051_v47 = vadd.f32 %v2682_v37, %v7937_v45  ;;  %v2684_v35 = vpop.f32.mrb[93].mxu1 }
 0x334   :  { %v3271_v48 = vmax.f32 %v3147_v28, 0.0  ;;  %v6052_v4 = vadd.f32 %v2684_v35, %v7945_v7  ;;  %v2686_v21 = vpop.f32.mrb[94].mxu1  ;;  %v5618_v0 = vpop.f32.mrb[12].mxu0  ;;  %3987 = vmatprep.mubr.bf16.mxu1 %v3369_v5  ;;  %4361 = vmatprep.mubr.bf16.mxu0 %v3369_v5 }
 0x335   :  { %v6053_v23 = vadd.f32 %v2686_v21, %v7937_v45  ;;  %v2688_v10 = vpop.f32.mrb[95].mxu1  ;;  %v5619_v26 = vpop.f32.mrb[13].mxu0  ;;  %3988 = vmatmul.mubr.bf16.gmra.mrb[152].mxu1 %v3368_v58  ;;  %4362 = vmatmul.mubr.bf16.gmra.mrb[88].mxu0 %v3368_v58  ;;  %v3296_v40 = vmax.f32 %v6051_v47, 0.0 }
 0x336   :  { %v6054_v38 = vadd.f32 %v2688_v10, %v7945_v7  ;;  %v5620_v51 = vadd.f32 %v5619_v26, %v5618_v0  ;;  %v5621_v63 = vpop.f32.mrb[14].mxu0  ;;  %v8022_v27 = vpack.c.bf16 %v3271_v48, %v3268_v15  ;;  %v3297_v25 = vmax.f32 %v6052_v4, 0.0 }
 0x337   :  { %v3299_v6 = vmax.f32 %v6053_v23, 0.0  ;;  %v5622_v43 = vpop.f32.mrb[15].mxu0 }
 0x338   :  { %v3300_v52 = vmax.f32 %v6054_v38, 0.0  ;;  %v3152_v32 = vadd.f32 %v5620_v51, %v7865_v59  ;;  %v5623_v3 = vadd.f32 %v5622_v43, %v5621_v63 }
 0x339   :  { %v3371_v54 = vpack.c.bf16 %v3299_v6, %v3296_v40 }
 0x33a   :  { %v3372_v30 = vpack.c.bf16 %v3300_v52, %v3297_v25  ;;  %v3155_v33 = vadd.f32 %v5623_v3, %v7870_v29  ;;  %v2692_v44 = vpop.f32.mrb[96].mxu1  ;;  %v3274_v58 = vmax.f32 %v3152_v32, 0.0 }
 0x33b   :  { %v6055_v13 = vadd.f32 %v2692_v44, %v7937_v45  ;;  %v2694_v42 = vpop.f32.mrb[97].mxu1 }
 0x33c   :  { %v3277_v5 = vmax.f32 %v3155_v33, 0.0  ;;  %v6056_v28 = vadd.f32 %v2694_v42, %v7945_v7  ;;  %v2696_v37 = vpop.f32.mrb[98].mxu1  ;;  %v5624_v47 = vpop.f32.mrb[16].mxu0  ;;  %3997 = vmatprep.mubr.bf16.mxu1 %v3372_v30  ;;  %4369 = vmatprep.mubr.bf16.mxu0 %v3372_v30 }
 0x33d   :  { %v6057_v35 = vadd.f32 %v2696_v37, %v7937_v45  ;;  %v2698_v59 = vpop.f32.mrb[99].mxu1  ;;  %v5625_v15 = vpop.f32.mrb[17].mxu0  ;;  %3998 = vmatmul.mubr.bf16.gmra.mrb[156].mxu1 %v3371_v54  ;;  %4370 = vmatmul.mubr.bf16.gmra.mrb[92].mxu0 %v3371_v54  ;;  %v3302_v0 = vmax.f32 %v6055_v13, 0.0 }
 0x33e   :  { %v8029_v48 = vpack.c.bf16 %v3277_v5, %v3274_v58  ;;  %v6058_v29 = vadd.f32 %v2698_v59, %v7945_v7  ;;  %v5626_v4 = vadd.f32 %v5625_v15, %v5624_v47  ;;  %v5627_v21 = vpop.f32.mrb[18].mxu0  ;;  %v3303_v26 = vmax.f32 %v6056_v28, 0.0 }
 0x33f   :  { %v3305_v23 = vmax.f32 %v6057_v35, 0.0  ;;  %v5628_v10 = vpop.f32.mrb[19].mxu0 }
 0x340   :  { %v3306_v38 = vmax.f32 %v6058_v29, 0.0  ;;  %v3160_v51 = vadd.f32 %v5626_v4, %v7875_v20  ;;  %v5629_v63 = vadd.f32 %v5628_v10, %v5627_v21 }
 0x341   :  { %v3374_v40 = vpack.c.bf16 %v3305_v23, %v3302_v0 }
 0x342   :  { %v3375_v6 = vpack.c.bf16 %v3306_v38, %v3303_v26  ;;  %v3163_v43 = vadd.f32 %v5629_v63, %v7880_v18  ;;  %v2702_v25 = vpop.f32.mrb[100].mxu1  ;;  %v3280_v3 = vmax.f32 %v3160_v51, 0.0 }
 0x343   :  { %v6059_v52 = vadd.f32 %v2702_v25, %v7937_v45  ;;  %v2704_v32 = vpop.f32.mrb[101].mxu1 }
 0x344   :  { %v3283_v54 = vmax.f32 %v3163_v43, 0.0  ;;  %v6060_v30 = vadd.f32 %v2704_v32, %v7945_v7  ;;  %v2706_v33 = vpop.f32.mrb[102].mxu1  ;;  %v5630_v44 = vpop.f32.mrb[20].mxu0  ;;  %4007 = vmatprep.mubr.bf16.mxu1 %v3375_v6  ;;  %4377 = vmatprep.mubr.bf16.mxu0 %v3375_v6 }
 0x345   :  { %v6061_v13 = vadd.f32 %v2706_v33, %v7937_v45  ;;  %v2708_v20 = vpop.f32.mrb[103].mxu1  ;;  %v5631_v42 = vpop.f32.mrb[21].mxu0  ;;  %4008 = vmatmul.mubr.bf16.gmra.mrb[160].mxu1 %v3374_v40  ;;  %4378 = vmatmul.mubr.bf16.gmra.mrb[96].mxu0 %v3374_v40  ;;  %v3308_v37 = vmax.f32 %v6059_v52, 0.0 }
 0x346   :  { %v6062_v18 = vadd.f32 %v2708_v20, %v7945_v7  ;;  %v5632_v58 = vadd.f32 %v5631_v42, %v5630_v44  ;;  %v5633_v5 = vpop.f32.mrb[22].mxu0  ;;  %v8038_v28 = vpack.c.bf16 %v3283_v54, %v3280_v3  ;;  %v3309_v59 = vmax.f32 %v6060_v30, 0.0 }
 0x347   :  { %v3311_v47 = vmax.f32 %v6061_v13, 0.0  ;;  %v5634_v35 = vpop.f32.mrb[23].mxu0 }
 0x348   :  { %v3312_v15 = vmax.f32 %v6062_v18, 0.0  ;;  %v3168_v29 = vadd.f32 %v5632_v58, %v7884_v57  ;;  %v5635_v4 = vadd.f32 %v5634_v35, %v5633_v5 }
 0x349   :  { %v3377_v21 = vpack.c.bf16 %v3311_v47, %v3308_v37 }
 0x34a   :  { %v3378_v0 = vpack.c.bf16 %v3312_v15, %v3309_v59  ;;  %v3171_v23 = vadd.f32 %v5635_v4, %v7888_v60  ;;  %v2712_v10 = vpop.f32.mrb[104].mxu1  ;;  %v3286_v51 = vmax.f32 %v3168_v29, 0.0 }
 0x34b   :  { %v6063_v26 = vadd.f32 %v2712_v10, %v7937_v45  ;;  %v2714_v38 = vpop.f32.mrb[105].mxu1 }
 0x34c   :  { %v3289_v63 = vmax.f32 %v3171_v23, 0.0  ;;  %v6064_v40 = vadd.f32 %v2714_v38, %v7945_v7  ;;  %v2716_v6 = vpop.f32.mrb[106].mxu1  ;;  %v5636_v43 = vpop.f32.mrb[24].mxu0  ;;  %4017 = vmatprep.mubr.bf16.mxu1 %v3378_v0  ;;  %4385 = vmatprep.mubr.bf16.mxu0 %v3378_v0 }
 0x34d   :  { %v6065_v25 = vadd.f32 %v2716_v6, %v7937_v45  ;;  %v2718_v57 = vpop.f32.mrb[107].mxu1  ;;  %v5637_v52 = vpop.f32.mrb[25].mxu0  ;;  %4018 = vmatmul.mubr.bf16.gmra.mrb[164].mxu1 %v3377_v21  ;;  %4386 = vmatmul.mubr.bf16.gmra.mrb[100].mxu0 %v3377_v21  ;;  %v3314_v30 = vmax.f32 %v6063_v26, 0.0 }
 0x34e   :  { %v8045_v32 = vpack.c.bf16 %v3289_v63, %v3286_v51  ;;  %v6066_v60 = vadd.f32 %v2718_v57, %v7945_v7  ;;  %v5638_v3 = vadd.f32 %v5637_v52, %v5636_v43  ;;  %v5639_v54 = vpop.f32.mrb[26].mxu0  ;;  %v3315_v13 = vmax.f32 %v6064_v40, 0.0 }
 0x34f   :  { %v3317_v33 = vmax.f32 %v6065_v25, 0.0  ;;  %v5640_v44 = vpop.f32.mrb[27].mxu0 }
 0x350   :  { %v3318_v20 = vmax.f32 %v6066_v60, 0.0  ;;  %v3176_v42 = vadd.f32 %v5638_v3, %v7892_v24  ;;  %v5641_v18 = vadd.f32 %v5640_v44, %v5639_v54 }
 0x351   :  { %v3380_v58 = vpack.c.bf16 %v3317_v33, %v3314_v30 }
 0x352   :  { %v3381_v5 = vpack.c.bf16 %v3318_v20, %v3315_v13  ;;  %v3179_v37 = vadd.f32 %v5641_v18, %v7896_v11  ;;  %v2722_v47 = vpop.f32.mrb[108].mxu1  ;;  %v3292_v15 = vmax.f32 %v3176_v42, 0.0 }
 0x353   :  { %v6067_v35 = vadd.f32 %v2722_v47, %v7937_v45  ;;  %v2724_v59 = vpop.f32.mrb[109].mxu1 }
 0x354   :  { %v3295_v29 = vmax.f32 %v3179_v37, 0.0  ;;  %v6068_v4 = vadd.f32 %v2724_v59, %v7945_v7  ;;  %v2726_v21 = vpop.f32.mrb[110].mxu1  ;;  %v5642_v0 = vpop.f32.mrb[28].mxu0  ;;  %4027 = vmatprep.mubr.bf16.mxu1 %v3381_v5  ;;  %4393 = vmatprep.mubr.bf16.mxu0 %v3381_v5 }
 0x355   :  { %v6069_v23 = vadd.f32 %v2726_v21, %v7937_v45  ;;  %v2728_v24 = vpop.f32.mrb[111].mxu1  ;;  %v5643_v10 = vpop.f32.mrb[29].mxu0  ;;  %4028 = vmatmul.mubr.bf16.gmra.mrb[168].mxu1 %v3380_v58  ;;  %4394 = vmatmul.mubr.bf16.gmra.mrb[104].mxu0 %v3380_v58  ;;  %v3320_v63 = vmax.f32 %v6067_v35, 0.0 }
 0x356   :  { %v6070_v11 = vadd.f32 %v2728_v24, %v7945_v7  ;;  %v5644_v26 = vadd.f32 %v5643_v10, %v5642_v0  ;;  %v5645_v38 = vpop.f32.mrb[30].mxu0  ;;  %v8054_v51 = vpack.c.bf16 %v3295_v29, %v3292_v15  ;;  %v3321_v43 = vmax.f32 %v6068_v4, 0.0 }
 0x357   :  { %v3323_v40 = vmax.f32 %v6069_v23, 0.0  ;;  %v5646_v6 = vpop.f32.mrb[31].mxu0 }
 0x358   :  { %v3324_v25 = vmax.f32 %v6070_v11, 0.0  ;;  %v3184_v57 = vadd.f32 %v5644_v26, %v7900_v2  ;;  %v5647_v52 = vadd.f32 %v5646_v6, %v5645_v38 }
 0x359   :  { %v3383_v60 = vpack.c.bf16 %v3323_v40, %v3320_v63 }
 0x35a   :  { %v3384_v3 = vpack.c.bf16 %v3324_v25, %v3321_v43  ;;  %v3187_v54 = vadd.f32 %v5647_v52, %v7904_v36  ;;  %v2732_v30 = vpop.f32.mrb[112].mxu1  ;;  %v3298_v13 = vmax.f32 %v3184_v57, 0.0 }
 0x35b   :  { %v6071_v33 = vadd.f32 %v2732_v30, %v7937_v45  ;;  %v2734_v44 = vpop.f32.mrb[113].mxu1 }
 0x35c   :  { %v3301_v20 = vmax.f32 %v3187_v54, 0.0  ;;  %v6072_v42 = vadd.f32 %v2734_v44, %v7945_v7  ;;  %v2736_v18 = vpop.f32.mrb[114].mxu1  ;;  %v5648_v58 = vpop.f32.mrb[32].mxu0  ;;  %4037 = vmatprep.mubr.bf16.mxu1 %v3384_v3  ;;  %4401 = vmatprep.mubr.bf16.mxu0 %v3384_v3 }
 0x35d   :  { %v6073_v5 = vadd.f32 %v2736_v18, %v7937_v45  ;;  %v2738_v2 = vpop.f32.mrb[115].mxu1  ;;  %v5649_v37 = vpop.f32.mrb[33].mxu0  ;;  %4038 = vmatmul.mubr.bf16.gmra.mrb[172].mxu1 %v3383_v60  ;;  %4402 = vmatmul.mubr.bf16.gmra.mrb[108].mxu0 %v3383_v60  ;;  %v3326_v15 = vmax.f32 %v6071_v33, 0.0 }
 0x35e   :  { %v8061_v47 = vpack.c.bf16 %v3301_v20, %v3298_v13  ;;  %v6074_v36 = vadd.f32 %v2738_v2, %v7945_v7  ;;  %v5650_v35 = vadd.f32 %v5649_v37, %v5648_v58  ;;  %v5651_v59 = vpop.f32.mrb[34].mxu0  ;;  %v3327_v21 = vmax.f32 %v6072_v42, 0.0 }
 0x35f   :  { %v3329_v29 = vmax.f32 %v6073_v5, 0.0  ;;  %v5652_v4 = vpop.f32.mrb[35].mxu0 }
 0x360   :  { %v3330_v0 = vmax.f32 %v6074_v36, 0.0  ;;  %v3192_v23 = vadd.f32 %v5650_v35, %v7910_v62  ;;  %v5653_v24 = vadd.f32 %v5652_v4, %v5651_v59 }
 0x361   :  { %v3386_v10 = vpack.c.bf16 %v3329_v29, %v3326_v15 }
 0x362   :  { %v3387_v11 = vpack.c.bf16 %v3330_v0, %v3327_v21  ;;  %v3195_v26 = vadd.f32 %v5653_v24, %v7912_v55  ;;  %v2742_v38 = vpop.f32.mrb[116].mxu1  ;;  %v3304_v6 = vmax.f32 %v3192_v23, 0.0 }
 0x363   :  { %v6075_v63 = vadd.f32 %v2742_v38, %v7937_v45  ;;  %v2744_v40 = vpop.f32.mrb[117].mxu1 }
 0x364   :  { %v3307_v43 = vmax.f32 %v3195_v26, 0.0  ;;  %v6076_v25 = vadd.f32 %v2744_v40, %v7945_v7  ;;  %v2746_v57 = vpop.f32.mrb[118].mxu1  ;;  %v5654_v52 = vpop.f32.mrb[36].mxu0  ;;  %4047 = vmatprep.mubr.bf16.mxu1 %v3387_v11  ;;  %4409 = vmatprep.mubr.bf16.mxu0 %v3387_v11 }
 0x365   :  { %v6077_v60 = vadd.f32 %v2746_v57, %v7937_v45  ;;  %v2748_v62 = vpop.f32.mrb[119].mxu1  ;;  %v5655_v3 = vpop.f32.mrb[37].mxu0  ;;  %4048 = vmatmul.mubr.bf16.gmra.mrb[176].mxu1 %v3386_v10  ;;  %4410 = vmatmul.mubr.bf16.gmra.mrb[112].mxu0 %v3386_v10  ;;  %v3332_v44 = vmax.f32 %v6075_v63, 0.0 }
 0x366   :  { %v6078_v55 = vadd.f32 %v2748_v62, %v7945_v7  ;;  %v5656_v54 = vadd.f32 %v5655_v3, %v5654_v52  ;;  %v5657_v30 = vpop.f32.mrb[38].mxu0  ;;  %v8070_v33 = vpack.c.bf16 %v3307_v43, %v3304_v6  ;;  %v3333_v42 = vmax.f32 %v6076_v25, 0.0 }
 0x367   :  { %v3335_v13 = vmax.f32 %v6077_v60, 0.0  ;;  %v5658_v20 = vpop.f32.mrb[39].mxu0 }
 0x368   :  { %v3336_v18 = vmax.f32 %v6078_v55, 0.0  ;;  %v3200_v58 = vadd.f32 %v5656_v54, %v7921_v8  ;;  %v5659_v5 = vadd.f32 %v5658_v20, %v5657_v30 }
 0x369   :  { %v3389_v2 = vpack.c.bf16 %v3335_v13, %v3332_v44 }
 0x36a   :  { %v3390_v37 = vpack.c.bf16 %v3336_v18, %v3333_v42  ;;  %v3203_v36 = vadd.f32 %v5659_v5, %v7923_v19  ;;  %v2752_v35 = vpop.f32.mrb[120].mxu1  ;;  %v3310_v29 = vmax.f32 %v3200_v58, 0.0 }
 0x36b   :  { %v6079_v59 = vadd.f32 %v2752_v35, %v7937_v45  ;;  %v2754_v15 = vpop.f32.mrb[121].mxu1 }
 0x36c   :  { %v3313_v4 = vmax.f32 %v3203_v36, 0.0  ;;  %v6080_v21 = vadd.f32 %v2754_v15, %v7945_v7  ;;  %v2756_v0 = vpop.f32.mrb[122].mxu1  ;;  %v5660_v23 = vpop.f32.mrb[40].mxu0  ;;  %4057 = vmatprep.mubr.bf16.mxu1 %v3390_v37  ;;  %4417 = vmatprep.mubr.bf16.mxu0 %v3390_v37 }
 0x36d   :  { %v6081_v24 = vadd.f32 %v2756_v0, %v7937_v45  ;;  %v2758_v8 = vpop.f32.mrb[123].mxu1  ;;  %v5661_v10 = vpop.f32.mrb[41].mxu0  ;;  %4058 = vmatmul.mubr.bf16.gmra.mrb[180].mxu1 %v3389_v2  ;;  %4418 = vmatmul.mubr.bf16.gmra.mrb[116].mxu0 %v3389_v2  ;;  %v3338_v63 = vmax.f32 %v6079_v59, 0.0 }
 0x36e   :  { %v8077_v11 = vpack.c.bf16 %v3313_v4, %v3310_v29  ;;  %v6082_v19 = vadd.f32 %v2758_v8, %v7945_v7  ;;  %v5662_v26 = vadd.f32 %v5661_v10, %v5660_v23  ;;  %v5663_v38 = vpop.f32.mrb[42].mxu0  ;;  %v3339_v43 = vmax.f32 %v6080_v21, 0.0 }
 0x36f   :  { %v3341_v40 = vmax.f32 %v6081_v24, 0.0  ;;  %v5664_v6 = vpop.f32.mrb[43].mxu0 }
 0x370   :  { %v3342_v25 = vmax.f32 %v6082_v19, 0.0  ;;  %v3208_v57 = vadd.f32 %v5662_v26, %v7929_v31  ;;  %v5665_v52 = vadd.f32 %v5664_v6, %v5663_v38 }
 0x371   :  { %v3392_v60 = vpack.c.bf16 %v3341_v40, %v3338_v63 }
 0x372   :  { %v3393_v62 = vpack.c.bf16 %v3342_v25, %v3339_v43  ;;  %v3211_v3 = vadd.f32 %v5665_v52, %v7931_v53  ;;  %v2762_v55 = vpop.f32.mrb[124].mxu1  ;;  %v3316_v44 = vmax.f32 %v3208_v57, 0.0 }
 0x373   :  { %v6083_v54 = vadd.f32 %v2762_v55, %v7937_v45  ;;  %v2764_v30 = vpop.f32.mrb[125].mxu1 }
 0x374   :  { %v3319_v13 = vmax.f32 %v3211_v3, 0.0  ;;  %v6084_v20 = vadd.f32 %v2764_v30, %v7945_v7  ;;  %v2766_v42 = vpop.f32.mrb[126].mxu1  ;;  %v5666_v18 = vpop.f32.mrb[44].mxu0  ;;  %4067 = vmatprep.mubr.bf16.mxu1 %v3393_v62  ;;  %4425 = vmatprep.mubr.bf16.mxu0 %v3393_v62 }
 0x375   :  { %v6085_v58 = vadd.f32 %v2766_v42, %v7937_v45  ;;  %v2768_v31 = vpop.f32.mrb[127].mxu1  ;;  %v5667_v5 = vpop.f32.mrb[45].mxu0  ;;  %4068 = vmatmul.mubr.bf16.gmra.mrb[184].mxu1 %v3392_v60  ;;  %4426 = vmatmul.mubr.bf16.gmra.mrb[120].mxu0 %v3392_v60  ;;  %v3344_v35 = vmax.f32 %v6083_v54, 0.0 }
 0x376   :  { %v6086_v53 = vadd.f32 %v2768_v31, %v7945_v7  ;;  %v5668_v2 = vadd.f32 %v5667_v5, %v5666_v18  ;;  %v5669_v37 = vpop.f32.mrb[46].mxu0  ;;  %v8086_v36 = vpack.c.bf16 %v3319_v13, %v3316_v44  ;;  %v3345_v29 = vmax.f32 %v6084_v20, 0.0 }
 0x377   :  { %v3347_v59 = vmax.f32 %v6085_v58, 0.0  ;;  %v5670_v15 = vpop.f32.mrb[47].mxu0 }
 0x378   :  { %v3348_v4 = vmax.f32 %v6086_v53, 0.0  ;;  %v3216_v21 = vadd.f32 %v5668_v2, %v7941_v61  ;;  %v5671_v0 = vadd.f32 %v5670_v15, %v5669_v37  ;;  %v8568_v61 = vmov 0  }
 0x379   :  { %v3395_v23 = vpack.c.bf16 %v3347_v59, %v3344_v35 }
 0x37a   :  { %v3396_v45 = vpack.c.bf16 %v3348_v4, %v3345_v29  ;;  %v3219_v24 = vadd.f32 %v5671_v0, %v7947_v1  ;;  %v3322_v8 = vmax.f32 %v3216_v21, 0.0 }
 0x37c   :  { %v3325_v10 = vmax.f32 %v3219_v24, 0.0  ;;  %v5672_v19 = vpop.f32.mrb[48].mxu0  ;;  %4077 = vmatprep.mubr.bf16.mxu1 %v3396_v45  ;;  %4433 = vmatprep.mubr.bf16.mxu0 %v3396_v45 }
 0x37d   :  { %v5673_v7 = vpop.f32.mrb[49].mxu0  ;;  %4078 = vmatmul.mubr.bf16.gmra.mrb[188].mxu1 %v3395_v23  ;;  %4434 = vmatmul.mubr.bf16.gmra.mrb[124].mxu0 %v3395_v23 }
 0x37e   :  { %v8090_v26 = vpack.c.bf16 %v3325_v10, %v3322_v8  ;;  %v5674_v38 = vadd.f32 %v5673_v7, %v5672_v19  ;;  %v5675_v63 = vpop.f32.mrb[50].mxu0  ;;  %5900 = vmatprep.mubr.bf16.mxu0 %v8006_v17  ;;  %4120 = vmatprep.mubr.bf16.mxu1 %v8568_v61 }
 0x37f   :  { %v5676_v40 = vpop.f32.mrb[51].mxu0 }
 0x380   :  { %v3224_v6 = vadd.f32 %v5674_v38, %v7957_v46  ;;  %v5677_v1 = vadd.f32 %v5676_v40, %v5675_v63  ;;  %v4845_v38 = vld [vmem:[%s8553_s7 + $0x80] sm:$0xff]  ;;  %v4846_v63 = vld [vmem:[%s8553_s7 + $0x88] sm:$0xff] }
 0x381   :  { %v5967_v40 = vpack.c.bf16 %v4846_v63, %v4845_v38 }
 0x382   :  { %v3227_v43 = vadd.f32 %v5677_v1, %v7959_v9  ;;  %v3328_v25 = vmax.f32 %v3224_v6, 0.0  ;;  %v4829_v6 = vld [vmem:[%s8553_s7] sm:$0xff]  ;;  %v4830_v1 = vld [vmem:[%s8553_s7 + $0x8] sm:$0xff] }
 0x383   :  { %5968 = vmatprep.subr.bf16.mxu1 %v5967_v40 }
 0x384   :  { %v3331_v57 = vmax.f32 %v3227_v43, 0.0  ;;  %v5678_v52 = vpop.f32.mrb[52].mxu0 }
 0x385   :  { %v5679_v60 = vpop.f32.mrb[53].mxu0  ;;  %4121 = vmatmul.mubr.bf16.vlgmr.msra.gmra.mrb[128].mxu1 %v8006_v17  ;;  %5901 = vmatmul.mubr.bf16.vlgmr.msra.gmra.mrb[128].mxu0 %v8013_v12 }
 0x386   :  { %v5680_v62 = vadd.f32 %v5679_v60, %v5678_v52  ;;  %v5681_v3 = vpop.f32.mrb[54].mxu0  ;;  %5904 = vmatprep.mubr.bf16.mxu0 %v8022_v27  ;;  %4130 = vmatprep.mubr.bf16.mxu1 %v8568_v61  ;;  %v8100_v55 = vpack.c.bf16 %v3331_v57, %v3328_v25  ;;  %v5969_v25 = vpack.c.bf16 %v4830_v1, %v4829_v6  ;;  %v4851_v1 = vld [vmem:[%s8553_s7 + $0xb0] sm:$0xff] }
 0x387   :  { %v5682_v46 = vpop.f32.mrb[55].mxu0 }
 0x388   :  { %v3232_v54 = vadd.f32 %v5680_v62, %v7970_v41  ;;  %v5683_v9 = vadd.f32 %v5682_v46, %v5681_v3  ;;  %5970 = vmatpush3.bf16.msra.mxu1 %v5969_v25  ;;  %v4835_v25 = vld [vmem:[%s8553_s7 + $0x30] sm:$0xff] }
 0x38a   :  { %v3235_v30 = vadd.f32 %v5683_v9, %v7972_v34  ;;  %v3334_v44 = vmax.f32 %v3232_v54, 0.0 }
 0x38c   :  { %v3337_v13 = vmax.f32 %v3235_v30, 0.0  ;;  %v5684_v20 = vpop.f32.mrb[56].mxu0 }
 0x38d   :  { %v5685_v17 = vpop.f32.mrb[57].mxu0  ;;  %4131 = vmatmul.mubr.bf16.gmra.mrb[132].mxu1 %v8013_v12  ;;  %5905 = vmatmul.mubr.bf16.gmra.mrb[132].mxu0 %v8029_v48 }
 0x38e   :  { %v8106_v42 = vpack.c.bf16 %v3337_v13, %v3334_v44  ;;  %v5686_v18 = vadd.f32 %v5685_v17, %v5684_v20  ;;  %v5687_v58 = vpop.f32.mrb[58].mxu0  ;;  %5908 = vmatprep.mubr.bf16.mxu0 %v8038_v28  ;;  %4140 = vmatprep.mubr.bf16.mxu1 %v8568_v61 }
 0x38f   :  { %v5688_v41 = vpop.f32.mrb[59].mxu0 }
 0x390   :  { %v3240_v31 = vadd.f32 %v5686_v18, %v7982_v39  ;;  %v5689_v34 = vadd.f32 %v5688_v41, %v5687_v58  ;;  %v4847_v18 = vld [vmem:[%s8553_s7 + $0x90] sm:$0xff] }
 0x391   :  { %v4831_v58 = vld [vmem:[%s8553_s7 + $0x10] sm:$0xff] }
 0x392   :  { %v3243_v5 = vadd.f32 %v5689_v34, %v7984_v49  ;;  %v3340_v53 = vmax.f32 %v3240_v31, 0.0  ;;  %v4832_v34 = vld [vmem:[%s8553_s7 + $0x18] sm:$0xff] }
 0x394   :  { %v3343_v2 = vmax.f32 %v3243_v5, 0.0  ;;  %v5690_v37 = vpop.f32.mrb[60].mxu0 }
 0x395   :  { %v5691_v12 = vpop.f32.mrb[61].mxu0  ;;  %4141 = vmatmul.mubr.bf16.gmra.mrb[136].mxu1 %v8022_v27  ;;  %5909 = vmatmul.mubr.bf16.gmra.mrb[136].mxu0 %v8045_v32 }
 0x396   :  { %v5692_v35 = vadd.f32 %v5691_v12, %v5690_v37  ;;  %v5693_v59 = vpop.f32.mrb[62].mxu0  ;;  %5912 = vmatprep.mubr.bf16.mxu0 %v8054_v51  ;;  %4150 = vmatprep.mubr.bf16.mxu1 %v8568_v61  ;;  %v8116_v15 = vpack.c.bf16 %v3343_v2, %v3340_v53  ;;  %v5973_v53 = vpack.c.bf16 %v4832_v34, %v4831_v58 }
 0x397   :  { %v5694_v39 = vpop.f32.mrb[63].mxu0 }
 0x398   :  { %v3248_v29 = vadd.f32 %v5692_v35, %v7991_v16  ;;  %v5695_v49 = vadd.f32 %v5694_v39, %v5693_v59  ;;  %v4849_v39 = vld [vmem:[%s8553_s7 + $0xa0] sm:$0xff] }
 0x39a   :  { %v3251_v4 = vadd.f32 %v5695_v49, %v7994_v50  ;;  %v3346_v21 = vmax.f32 %v3248_v29, 0.0  ;;  %v4850_v29 = vld [vmem:[%s8553_s7 + $0xa8] sm:$0xff] }
 0x39b   :  { %v5975_v49 = vpack.c.bf16 %v4850_v29, %v4849_v39 }
 0x39c   :  { %v3349_v0 = vmax.f32 %v3251_v4, 0.0  ;;  %v4833_v4 = vld [vmem:[%s8553_s7 + $0x20] sm:$0xff] }
 0x39d   :  { %4151 = vmatmul.mubr.bf16.gmra.mrb[140].mxu1 %v8029_v48  ;;  %5913 = vmatmul.mubr.bf16.gmra.mrb[140].mxu0 %v8061_v47 }
 0x39e   :  { %v8122_v27 = vpack.c.bf16 %v3349_v0, %v3346_v21  ;;  %5916 = vmatprep.mubr.bf16.mxu0 %v8070_v33  ;;  %4160 = vmatprep.mubr.bf16.mxu1 %v8568_v61  ;;  %v4834_v21 = vld [vmem:[%s8553_s7 + $0x28] sm:$0xff] }
 0x3a5   :  { %4161 = vmatmul.mubr.bf16.gmra.mrb[144].mxu1 %v8038_v28  ;;  %5917 = vmatmul.mubr.bf16.gmra.mrb[144].mxu0 %v8077_v11 }
 0x3a6   :  { %5920 = vmatprep.mubr.bf16.mxu0 %v8086_v36  ;;  %4170 = vmatprep.mubr.bf16.mxu1 %v8568_v61 }
 0x3ad   :  { %4171 = vmatmul.mubr.bf16.gmra.mrb[148].mxu1 %v8045_v32  ;;  %5921 = vmatmul.mubr.bf16.gmra.mrb[148].mxu0 %v8090_v26 }
 0x3ae   :  { %5924 = vmatprep.mubr.bf16.mxu0 %v8100_v55  ;;  %4180 = vmatprep.mubr.bf16.mxu1 %v8568_v61 }
 0x3b5   :  { %4181 = vmatmul.mubr.bf16.gmra.mrb[152].mxu1 %v8054_v51  ;;  %5925 = vmatmul.mubr.bf16.gmra.mrb[152].mxu0 %v8106_v42 }
 0x3b6   :  { %5928 = vmatprep.mubr.bf16.mxu0 %v8116_v15  ;;  %4190 = vmatprep.mubr.bf16.mxu1 %v8568_v61 }
 0x3bd   :  { %4191 = vmatmul.mubr.bf16.gmra.mrb[156].mxu1 %v8061_v47  ;;  %5929 = vmatmul.mubr.bf16.gmra.mrb[156].mxu0 %v8122_v27 }
 0x3be   :  { %4200 = vmatprep.mubr.bf16.mxu1 %v8568_v61 }
 0x3c5   :  { %4201 = vmatmul.mubr.bf16.gmra.mrb[160].mxu1 %v8070_v33 }
 0x3c6   :  { %4210 = vmatprep.mubr.bf16.mxu1 %v8568_v61 }
 0x3cd   :  { %4211 = vmatmul.mubr.bf16.gmra.mrb[164].mxu1 %v8077_v11 }
 0x3ce   :  { %4220 = vmatprep.mubr.bf16.mxu1 %v8568_v61 }
 0x3d5   :  { %4221 = vmatmul.mubr.bf16.gmra.mrb[168].mxu1 %v8086_v36 }
 0x3d6   :  { %4230 = vmatprep.mubr.bf16.mxu1 %v8568_v61 }
 0x3d8   :  { %v5712_v16 = vpop.f32.mrb[64].mxu0 }
 0x3d9   :  { %v5713_v50 = vpop.f32.mrb[65].mxu0 }
 0x3da   :  { %v8147_v48 = vadd.f32 %v5713_v50, %v5712_v16  ;;  %v5715_v28 = vpop.f32.mrb[66].mxu0 }
 0x3db   :  { %v5716_v32 = vpop.f32.mrb[67].mxu0 }
 0x3dc   :  { %v8149_v51 = vadd.f32 %v5716_v32, %v5715_v28 }
 0x3dd   :  { %4231 = vmatmul.mubr.bf16.gmra.mrb[172].mxu1 %v8090_v26 }
 0x3de   :  { %4240 = vmatprep.mubr.bf16.mxu1 %v8568_v61 }
 0x3e0   :  { %v5718_v47 = vpop.f32.mrb[68].mxu0 }
 0x3e1   :  { %v5719_v33 = vpop.f32.mrb[69].mxu0 }
 0x3e2   :  { %v8153_v11 = vadd.f32 %v5719_v33, %v5718_v47  ;;  %v5721_v23 = vpop.f32.mrb[70].mxu0 }
 0x3e3   :  { %v5722_v36 = vpop.f32.mrb[71].mxu0 }
 0x3e4   :  { %v8155_v45 = vadd.f32 %v5722_v36, %v5721_v23 }
 0x3e5   :  { %4241 = vmatmul.mubr.bf16.gmra.mrb[176].mxu1 %v8100_v55 }
 0x3e6   :  { %4250 = vmatprep.mubr.bf16.mxu1 %v8568_v61 }
 0x3e8   :  { %v5724_v24 = vpop.f32.mrb[72].mxu0 }
 0x3e9   :  { %v5725_v8 = vpop.f32.mrb[73].mxu0 }
 0x3ea   :  { %v8159_v10 = vadd.f32 %v5725_v8, %v5724_v24  ;;  %v5727_v19 = vpop.f32.mrb[74].mxu0 }
 0x3eb   :  { %v5728_v7 = vpop.f32.mrb[75].mxu0 }
 0x3ec   :  { %v8161_v26 = vadd.f32 %v5728_v7, %v5727_v19 }
 0x3ed   :  { %4251 = vmatmul.mubr.bf16.gmra.mrb[180].mxu1 %v8106_v42 }
 0x3ee   :  { %4260 = vmatprep.mubr.bf16.mxu1 %v8568_v61 }
 0x3f0   :  { %v5730_v43 = vpop.f32.mrb[76].mxu0 }
 0x3f1   :  { %v5731_v57 = vpop.f32.mrb[77].mxu0 }
 0x3f2   :  { %v8177_v52 = vadd.f32 %v5731_v57, %v5730_v43  ;;  %v5733_v60 = vpop.f32.mrb[78].mxu0  ;;  %v4852_v43 = vld [vmem:[%s8553_s7 + $0xb8] sm:$0xff] }
 0x3f3   :  { %v5734_v62 = vpop.f32.mrb[79].mxu0 }
 0x3f4   :  { %v8179_v3 = vadd.f32 %v5734_v62, %v5733_v60  ;;  %v5979_v60 = vpack.c.bf16 %v4852_v43, %v4851_v1  ;;  %v4836_v62 = vld [vmem:[%s8553_s7 + $0x38] sm:$0xff] }
 0x3f5   :  { %4261 = vmatmul.mubr.bf16.gmra.mrb[184].mxu1 %v8116_v15 }
 0x3f6   :  { %4270 = vmatprep.mubr.bf16.mxu1 %v8568_v61  ;;  %v4848_v61 = vld [vmem:[%s8553_s7 + $0x98] sm:$0xff] }
 0x3f7   :  { %v5971_v31 = vpack.c.bf16 %v4848_v61, %v4847_v18  ;;  %v4853_v18 = vld [vmem:[%s8553_s7 + $0xc0] sm:$0xff]  ;;  %v4854_v61 = vld [vmem:[%s8553_s7 + $0xc8] sm:$0xff] }
 0x3f8   :  { %v5736_v55 = vpop.f32.mrb[80].mxu0  ;;  %v5983_v58 = vpack.c.bf16 %v4854_v61, %v4853_v18  ;;  %v4841_v18 = vld [vmem:[%s8553_s7 + $0x60] sm:$0xff]  ;;  %v4842_v61 = vld [vmem:[%s8553_s7 + $0x68] sm:$0xff] }
 0x3f9   :  { %v5737_v46 = vpop.f32.mrb[81].mxu0  ;;  %5972 = vmatprep.subr.bf16.mxu1 %v5971_v31  ;;  %v4838_v31 = vld [vmem:[%s8553_s7 + $0x48] sm:$0xff] }
 0x3fa   :  { %v8183_v54 = vadd.f32 %v5737_v46, %v5736_v55  ;;  %v5739_v9 = vpop.f32.mrb[82].mxu0  ;;  %5974 = vmatpush3.bf16.msra.mxu1 %v5973_v53  ;;  %v5981_v55 = vpack.c.bf16 %v4836_v62, %v4835_v25 }
 0x3fb   :  { %v5740_v30 = vpop.f32.mrb[83].mxu0  ;;  %5976 = vmatprep.subr.bf16.mxu1 %v5975_v49 }
 0x3fc   :  { %v8185_v44 = vadd.f32 %v5740_v30, %v5739_v9 }
 0x3fd   :  { %4271 = vmatmul.mubr.bf16.gmra.mrb[188].mxu1 %v8122_v27  ;;  %v5977_v27 = vpack.c.bf16 %v4834_v21, %v4833_v4 }
 0x3ff   :  { %5978 = vmatpush3.bf16.msra.mxu1 %v5977_v27 }
 0x400   :  { %v5742_v13 = vpop.f32.mrb[84].mxu0  ;;  %5980 = vmatprep.subr.bf16.mxu1 %v5979_v60 }
 0x401   :  { %v5743_v20 = vpop.f32.mrb[85].mxu0 }
 0x402   :  { %v8188_v17 = vadd.f32 %v5743_v20, %v5742_v13  ;;  %v5745_v42 = vpop.f32.mrb[86].mxu0 }
 0x403   :  { %v5746_v41 = vpop.f32.mrb[87].mxu0  ;;  %5982 = vmatpush3.bf16.msra.mxu1 %v5981_v55 }
 0x404   :  { %v8202_v5 = vadd.f32 %v5746_v41, %v5745_v42  ;;  %v4837_v41 = vld [vmem:[%s8553_s7 + $0x40] sm:$0xff]  ;;  %5984 = vmatprep.subr.bf16.mxu1 %v5983_v58 }
 0x405   :  { %v5985_v53 = vpack.c.bf16 %v4838_v31, %v4837_v41  ;;  %v5993_v41 = vpack.c.bf16 %v4842_v61, %v4841_v18 }
 0x407   :  { %5986 = vmatpush3.bf16.msra.mxu1 %v5985_v53 }
 0x408   :  { %v5748_v2 = vpop.f32.mrb[88].mxu0 }
 0x409   :  { %v5749_v37 = vpop.f32.mrb[89].mxu0 }
 0x40a   :  { %v8204_v12 = vadd.f32 %v5749_v37, %v5748_v2  ;;  %v5751_v35 = vpop.f32.mrb[90].mxu0 }
 0x40b   :  { %v5752_v59 = vpop.f32.mrb[91].mxu0 }
 0x40c   :  { %v8206_v15 = vadd.f32 %v5752_v59, %v5751_v35 }
 0x410   :  { %v5754_v0 = vpop.f32.mrb[92].mxu0 }
 0x411   :  { %v5755_v16 = vpop.f32.mrb[93].mxu0 }
 0x412   :  { %v8220_v50 = vadd.f32 %v5755_v16, %v5754_v0  ;;  %v5757_v28 = vpop.f32.mrb[94].mxu0  ;;  %v4855_v16 = vld [vmem:[%s8553_s7 + $0xd0] sm:$0xff] }
 0x413   :  { %v5758_v32 = vpop.f32.mrb[95].mxu0 }
 0x414   :  { %v8222_v47 = vadd.f32 %v5758_v32, %v5757_v28  ;;  %v4856_v28 = vld [vmem:[%s8553_s7 + $0xd8] sm:$0xff] }
 0x415   :  { %v5987_v32 = vpack.c.bf16 %v4856_v28, %v4855_v16 }
 0x417   :  { %5988 = vmatprep.subr.bf16.mxu1 %v5987_v32 }
 0x418   :  { %v5760_v33 = vpop.f32.mrb[96].mxu0 }
 0x419   :  { %v5761_v23 = vpop.f32.mrb[97].mxu0 }
 0x41a   :  { %v8224_v36 = vadd.f32 %v5761_v23, %v5760_v33  ;;  %v5763_v24 = vpop.f32.mrb[98].mxu0  ;;  %v4839_v33 = vld [vmem:[%s8553_s7 + $0x50] sm:$0xff]  ;;  %v4840_v23 = vld [vmem:[%s8553_s7 + $0x58] sm:$0xff] }
 0x41b   :  { %v5764_v8 = vpop.f32.mrb[99].mxu0 }
 0x41c   :  { %v8226_v19 = vadd.f32 %v5764_v8, %v5763_v24  ;;  %v5989_v8 = vpack.c.bf16 %v4840_v23, %v4839_v33 }
 0x41e   :  { %5990 = vmatpush3.bf16.msra.mxu1 %v5989_v8 }
 0x420   :  { %v5766_v7 = vpop.f32.mrb[100].mxu0 }
 0x421   :  { %v5767_v38 = vpop.f32.mrb[101].mxu0 }
 0x422   :  { %v8228_v63 = vadd.f32 %v5767_v38, %v5766_v7  ;;  %v5769_v40 = vpop.f32.mrb[102].mxu0 }
 0x423   :  { %v5770_v6 = vpop.f32.mrb[103].mxu0 }
 0x424   :  { %v8239_v57 = vadd.f32 %v5770_v6, %v5769_v40 }
 0x428   :  { %v5772_v46 = vpop.f32.mrb[104].mxu0 }
 0x429   :  { %v5773_v9 = vpop.f32.mrb[105].mxu0 }
 0x42a   :  { %v8244_v30 = vadd.f32 %v5773_v9, %v5772_v46  ;;  %v5775_v13 = vpop.f32.mrb[106].mxu0  ;;  %v4857_v9 = vld [vmem:[%s8553_s7 + $0xe0] sm:$0xff] }
 0x42b   :  { %v5776_v20 = vpop.f32.mrb[107].mxu0 }
 0x42c   :  { %v8246_v42 = vadd.f32 %v5776_v20, %v5775_v13  ;;  %v4858_v13 = vld [vmem:[%s8553_s7 + $0xe8] sm:$0xff] }
 0x42d   :  { %v5991_v20 = vpack.c.bf16 %v4858_v13, %v4857_v9 }
 0x42f   :  { %5992 = vmatprep.subr.bf16.mxu1 %v5991_v20 }
 0x430   :  { %v5778_v34 = vpop.f32.mrb[108].mxu0  ;;  %5994 = vmatpush3.bf16.msra.mxu1 %v5993_v41 }
 0x431   :  { %v5779_v2 = vpop.f32.mrb[109].mxu0 }
 0x432   :  { %v8260_v37 = vadd.f32 %v5779_v2, %v5778_v34  ;;  %v5781_v35 = vpop.f32.mrb[110].mxu0  ;;  %v3494_v34 = vld [vmem:[%s8552_s6] sm:$0x7] }
 0x433   :  { %v5782_v59 = vpop.f32.mrb[111].mxu0  ;;  %v8315_v28 = vrot.slane %v3494_v34, %v8566_v22 }
 0x434   :  { %v8262_v39 = vadd.f32 %v5782_v59, %v5781_v35 }
 0x438   :  { %v5784_v29 = vpop.f32.mrb[112].mxu0 }
 0x439   :  { %v5785_v49 = vpop.f32.mrb[113].mxu0 }
 0x43a   :  { %v8264_v4 = vadd.f32 %v5785_v49, %v5784_v29  ;;  %v5787_v21 = vpop.f32.mrb[114].mxu0  ;;  %v8308_v29 = vrot.slane %v3494_v34, %v7166_v14  ;;  %v8320_v14 = vrot.slane %v3494_v34, %v8567_v56 }
 0x43b   :  { %v5788_v0 = vpop.f32.mrb[115].mxu0 }
 0x43c   :  { %v8266_v27 = vadd.f32 %v5788_v0, %v5787_v21  ;;  %v4324_v49 = vadd.f32 %v8153_v11, %v8308_v29  ;;  %v4316_v16 = vadd.f32 %v8147_v48, %v8308_v29  ;;  %v4335_v34 = vadd.f32 %v8161_v26, %v8308_v29 }
 0x440   :  { %v5790_v24 = vpop.f32.mrb[116].mxu0 }
 0x441   :  { %v5791_v7 = vpop.f32.mrb[117].mxu0 }
 0x442   :  { %v8280_v38 = vadd.f32 %v5791_v7, %v5790_v24  ;;  %v5793_v40 = vpop.f32.mrb[118].mxu0  ;;  %v4327_v24 = vadd.f32 %v8155_v45, %v8308_v29 }
 0x443   :  { %v5794_v6 = vpop.f32.mrb[119].mxu0 }
 0x444   :  { %v8282_v1 = vadd.f32 %v5794_v6, %v5793_v40  ;;  %v4319_v40 = vadd.f32 %v8149_v51, %v8308_v29  ;;  %v4340_v51 = vadd.f32 %v8177_v52, %v8308_v29 }
 0x448   :  { %v5796_v43 = vpop.f32.mrb[120].mxu0 }
 0x449   :  { %v5797_v25 = vpop.f32.mrb[121].mxu0 }
 0x44a   :  { %v8284_v60 = vadd.f32 %v5797_v25, %v5796_v43  ;;  %v5799_v62 = vpop.f32.mrb[122].mxu0 }
 0x44b   :  { %v5800_v55 = vpop.f32.mrb[123].mxu0 }
 0x44c   :  { %v8286_v46 = vadd.f32 %v5800_v55, %v5799_v62 }
 0x450   :  { %v5802_v58 = vpop.f32.mrb[124].mxu0 }
 0x451   :  { %v5803_v31 = vpop.f32.mrb[125].mxu0 }
 0x452   :  { %v8303_v53 = vadd.f32 %v5803_v31, %v5802_v58  ;;  %v5805_v2 = vpop.f32.mrb[126].mxu0  ;;  %v4332_v31 = vadd.f32 %v8159_v10, %v8308_v29 }
 0x453   :  { %v5806_v35 = vpop.f32.mrb[127].mxu0 }
 0x454   :  { %v8305_v59 = vadd.f32 %v5806_v35, %v5805_v2 }
 0x458   :  { %v4122_v21 = vpop.f32.mrb[128].mxu1  ;;  %v5902_v0 = vpop.f32.mrb[128].mxu0 }
 0x459   :  { %v4485_v32 = vadd.f32 %v5902_v0, %v4324_v49  ;;  %v4124_v33 = vpop.f32.mrb[129].mxu1  ;;  %v4476_v23 = vpop.f32.mrb[129].mxu0  ;;  %v6087_v55 = vadd.f32 %v4122_v21, %v8315_v28 }
 0x45a   :  { %v4477_v8 = vadd.f32 %v4476_v23, %v4316_v16  ;;  %v4126_v7 = vpop.f32.mrb[130].mxu1  ;;  %v5903_v11 = vpop.f32.mrb[130].mxu0  ;;  %v6088_v45 = vadd.f32 %v4124_v33, %v8320_v14  ;;  %v4343_v16 = vadd.f32 %v8179_v3, %v8308_v29  ;;  %v4860_v3 = vld [vmem:[%s8553_s7 + $0xf8] sm:$0xff] }
 0x45b   :  { %v4611_v6 = vmax.f32 %v4485_v32, 0.0  ;;  %v4488_v48 = vadd.f32 %v5903_v11, %v4327_v24  ;;  %v4128_v43 = vpop.f32.mrb[131].mxu1  ;;  %v4479_v22 = vpop.f32.mrb[131].mxu0  ;;  %v6089_v56 = vadd.f32 %v4126_v7, %v8315_v28  ;;  %v4603_v2 = vmax.f32 %v6087_v55, 0.0  ;;  %v4843_v55 = vld [vmem:[%s8553_s7 + $0x70] sm:$0xff] }
 0x45c   :  { %v4605_v25 = vmax.f32 %v4477_v8, 0.0  ;;  %v4480_v62 = vadd.f32 %v4479_v22, %v4319_v40  ;;  %v6090_v18 = vadd.f32 %v4128_v43, %v8320_v14  ;;  %v4604_v32 = vmax.f32 %v6088_v45, 0.0 }
 0x45d   :  { %v4614_v9 = vmax.f32 %v4488_v48, 0.0  ;;  %v4606_v52 = vmax.f32 %v6089_v56, 0.0  ;;  %v4859_v48 = vld [vmem:[%s8553_s7 + $0xf0] sm:$0xff] }
 0x45e   :  { %v4741_v13 = vmax.f32 %v4605_v25, %v4611_v6  ;;  %v4608_v20 = vmax.f32 %v4480_v62, 0.0  ;;  %v4607_v10 = vmax.f32 %v6090_v18, 0.0  ;;  %v5995_v18 = vpack.c.bf16 %v4860_v3, %v4859_v48 }
 0x460   :  { %v4742_v61 = vmax.f32 %v4608_v20, %v4614_v9  ;;  %v4132_v58 = vpop.f32.mrb[132].mxu1  ;;  %v5906_v41 = vpop.f32.mrb[132].mxu0  ;;  %v4844_v9 = vld [vmem:[%s8553_s7 + $0x78] sm:$0xff]  ;;  %5996 = vmatprep.subr.bf16.mxu1 %v5995_v18 }
 0x461   :  { %v6091_v35 = vadd.f32 %v4132_v58, %v8315_v28  ;;  %v4501_v49 = vadd.f32 %v5906_v41, %v4340_v51  ;;  %v4134_v21 = vpop.f32.mrb[133].mxu1  ;;  %v4492_v0 = vpop.f32.mrb[133].mxu0 }
 0x462   :  { %v6092_v33 = vadd.f32 %v4134_v21, %v8320_v14  ;;  %v4493_v23 = vadd.f32 %v4492_v0, %v4332_v31  ;;  %v4136_v24 = vpop.f32.mrb[134].mxu1  ;;  %v5907_v8 = vpop.f32.mrb[134].mxu0  ;;  %v4348_v21 = vadd.f32 %v8183_v54, %v8308_v29  ;;  %v5997_v0 = vpack.c.bf16 %v4844_v9, %v4843_v55 }
 0x463   :  { %v4609_v7 = vmax.f32 %v6091_v35, 0.0  ;;  %v6093_v26 = vadd.f32 %v4136_v24, %v8315_v28  ;;  %v4504_v11 = vadd.f32 %v5907_v8, %v4343_v16  ;;  %v4138_v40 = vpop.f32.mrb[135].mxu1  ;;  %v4495_v6 = vpop.f32.mrb[135].mxu0  ;;  %v4623_v56 = vmax.f32 %v4501_v49, 0.0 }
 0x464   :  { %v4610_v43 = vmax.f32 %v6092_v33, 0.0  ;;  %v4617_v22 = vmax.f32 %v4493_v23, 0.0  ;;  %v6094_v25 = vadd.f32 %v4138_v40, %v8320_v14  ;;  %v4496_v62 = vadd.f32 %v4495_v6, %v4335_v34  ;;  %5998 = vmatpush3.bf16.msra.mxu1 %v5997_v0 }
 0x465   :  { %v4699_v45 = vmax.f32 %v4603_v2, %v4609_v7  ;;  %v4612_v20 = vmax.f32 %v6093_v26, 0.0  ;;  %v4356_v34 = vadd.f32 %v8188_v17, %v8308_v29  ;;  %v4626_v16 = vmax.f32 %v4504_v11, 0.0 }
 0x466   :  { %v4720_v51 = vmax.f32 %v4604_v32, %v4610_v43  ;;  %v4743_v58 = vmax.f32 %v4741_v13, %v4617_v22  ;;  %v4613_v41 = vmax.f32 %v6094_v25, 0.0  ;;  %v4620_v31 = vmax.f32 %v4496_v62, 0.0 }
 0x467   :  { %v4700_v35 = vmax.f32 %v4606_v52, %v4612_v20  ;;  %v4359_v52 = vadd.f32 %v8202_v5, %v8308_v29  ;;  %v6785_v11 = vmov 0.0|0.0  }
 0x468   :  { %v4721_v33 = vmax.f32 %v4607_v10, %v4613_v41  ;;  %v4744_v23 = vmax.f32 %v4742_v61, %v4620_v31  ;;  %v4142_v2 = vpop.f32.mrb[136].mxu1  ;;  %v5910_v49 = vpop.f32.mrb[136].mxu0  ;;  %v4745_v24 = vmax.f32 %v4743_v58, %v4623_v56  ;;  %v4351_v61 = vadd.f32 %v8185_v44, %v8308_v29  ;;  %5999 = vmatprep.subr.bf16.mxu1 %v6785_v11 }
 0x469   :  { %v6095_v32 = vadd.f32 %v4142_v2, %v8315_v28  ;;  %v4517_v13 = vadd.f32 %v5910_v49, %v4356_v34  ;;  %v4144_v8 = vpop.f32.mrb[137].mxu1  ;;  %v4508_v7 = vpop.f32.mrb[137].mxu0  ;;  %v4372_v34 = vadd.f32 %v8220_v50, %v8308_v29 }
 0x46a   :  { %v6096_v17 = vadd.f32 %v4144_v8, %v8320_v14  ;;  %v4509_v54 = vadd.f32 %v4508_v7, %v4348_v21  ;;  %v4146_v26 = vpop.f32.mrb[138].mxu1  ;;  %v5911_v40 = vpop.f32.mrb[138].mxu0  ;;  %v4746_v10 = vmax.f32 %v4744_v23, %v4626_v16  ;;  %v4364_v21 = vadd.f32 %v8204_v12, %v8308_v29 }
 0x46b   :  { %v4615_v6 = vmax.f32 %v6095_v32, 0.0  ;;  %v6097_v48 = vadd.f32 %v4146_v26, %v8315_v28  ;;  %v4520_v3 = vadd.f32 %v5911_v40, %v4359_v52  ;;  %v4148_v43 = vpop.f32.mrb[139].mxu1  ;;  %v4511_v22 = vpop.f32.mrb[139].mxu0  ;;  %v4635_v56 = vmax.f32 %v4517_v13, 0.0 }
 0x46c   :  { %v4616_v5 = vmax.f32 %v6096_v17, 0.0  ;;  %v4629_v25 = vmax.f32 %v4509_v54, 0.0  ;;  %v6098_v62 = vadd.f32 %v4148_v43, %v8320_v14  ;;  %v4512_v55 = vadd.f32 %v4511_v22, %v4351_v61 }
 0x46d   :  { %v4701_v9 = vmax.f32 %v4699_v45, %v4615_v6  ;;  %v4618_v20 = vmax.f32 %v6097_v48, 0.0  ;;  %v4638_v0 = vmax.f32 %v4520_v3, 0.0  ;;  %v4367_v12 = vadd.f32 %v8206_v15, %v8308_v29 }
 0x46e   :  { %v4722_v18 = vmax.f32 %v4720_v51, %v4616_v5  ;;  %v4747_v44 = vmax.f32 %v4745_v24, %v4629_v25  ;;  %v4619_v58 = vmax.f32 %v6098_v62, 0.0  ;;  %v4632_v41 = vmax.f32 %v4512_v55, 0.0 }
 0x46f   :  { %v4702_v31 = vmax.f32 %v4700_v35, %v4618_v20  ;;  %v4375_v35 = vadd.f32 %v8222_v47, %v8308_v29  ;;  %v4380_v20 = vadd.f32 %v8224_v36, %v8308_v29 }
 0x470   :  { %v4723_v16 = vmax.f32 %v4721_v33, %v4619_v58  ;;  %v4748_v23 = vmax.f32 %v4746_v10, %v4632_v41  ;;  %v4152_v2 = vpop.f32.mrb[140].mxu1  ;;  %v5914_v49 = vpop.f32.mrb[140].mxu0  ;;  %v4749_v32 = vmax.f32 %v4747_v44, %v4635_v56  ;;  %v4388_v56 = vadd.f32 %v8228_v63, %v8308_v29 }
 0x471   :  { %v6099_v45 = vadd.f32 %v4152_v2, %v8315_v28  ;;  %v4533_v13 = vadd.f32 %v5914_v49, %v4372_v34  ;;  %v4154_v51 = vpop.f32.mrb[141].mxu1  ;;  %v4524_v24 = vpop.f32.mrb[141].mxu0 }
 0x472   :  { %v6100_v8 = vadd.f32 %v4154_v51, %v8320_v14  ;;  %v4525_v50 = vadd.f32 %v4524_v24, %v4364_v21  ;;  %v4156_v7 = vpop.f32.mrb[142].mxu1  ;;  %v5915_v52 = vpop.f32.mrb[142].mxu0  ;;  %v4750_v33 = vmax.f32 %v4748_v23, %v4638_v0 }
 0x473   :  { %v4621_v17 = vmax.f32 %v6099_v45, 0.0  ;;  %v6101_v54 = vadd.f32 %v4156_v7, %v8315_v28  ;;  %v4536_v26 = vadd.f32 %v5915_v52, %v4375_v35  ;;  %v4158_v40 = vpop.f32.mrb[143].mxu1  ;;  %v4527_v61 = vpop.f32.mrb[143].mxu0  ;;  %v4647_v43 = vmax.f32 %v4533_v13, 0.0 }
 0x474   :  { %v4622_v10 = vmax.f32 %v6100_v8, 0.0  ;;  %v4641_v6 = vmax.f32 %v4525_v50, 0.0  ;;  %v6102_v48 = vadd.f32 %v4158_v40, %v8320_v14  ;;  %v4528_v47 = vadd.f32 %v4527_v61, %v4367_v12 }
 0x475   :  { %v4703_v3 = vmax.f32 %v4701_v9, %v4621_v17  ;;  %v4624_v22 = vmax.f32 %v6101_v54, 0.0  ;;  %v4650_v58 = vmax.f32 %v4536_v26, 0.0 }
 0x476   :  { %v4724_v5 = vmax.f32 %v4722_v18, %v4622_v10  ;;  %v4751_v25 = vmax.f32 %v4749_v32, %v4641_v6  ;;  %v4625_v62 = vmax.f32 %v6102_v48, 0.0  ;;  %v4644_v55 = vmax.f32 %v4528_v47, 0.0 }
 0x477   :  { %v4704_v15 = vmax.f32 %v4702_v31, %v4624_v22  ;;  %v4391_v31 = vadd.f32 %v8239_v57, %v8308_v29  ;;  %v4404_v48 = vadd.f32 %v8260_v37, %v8308_v29 }
 0x478   :  { %v4753_v44 = vmax.f32 %v4751_v25, %v4647_v43  ;;  %v4725_v41 = vmax.f32 %v4723_v16, %v4625_v62  ;;  %v4752_v34 = vmax.f32 %v4750_v33, %v4644_v55  ;;  %v4162_v21 = vpop.f32.mrb[144].mxu1  ;;  %v5918_v0 = vpop.f32.mrb[144].mxu0  ;;  %v4383_v16 = vadd.f32 %v8226_v19, %v8308_v29 }
 0x479   :  { %v6103_v9 = vadd.f32 %v4162_v21, %v8315_v28  ;;  %v4549_v23 = vadd.f32 %v5918_v0, %v4388_v56  ;;  %v4164_v18 = vpop.f32.mrb[145].mxu1  ;;  %v4540_v2 = vpop.f32.mrb[145].mxu0  ;;  %v4396_v25 = vadd.f32 %v8244_v30, %v8308_v29 }
 0x47a   :  { %v4754_v49 = vmax.f32 %v4752_v34, %v4650_v58  ;;  %v6104_v63 = vadd.f32 %v4164_v18, %v8320_v14  ;;  %v4541_v32 = vadd.f32 %v4540_v2, %v4380_v20  ;;  %v4166_v45 = vpop.f32.mrb[146].mxu1  ;;  %v5919_v36 = vpop.f32.mrb[146].mxu0 }
 0x47b   :  { %v4627_v13 = vmax.f32 %v6103_v9, 0.0  ;;  %v4659_v51 = vmax.f32 %v4549_v23, 0.0  ;;  %v6105_v24 = vadd.f32 %v4166_v45, %v8315_v28  ;;  %v4552_v35 = vadd.f32 %v5919_v36, %v4391_v31  ;;  %v4168_v8 = vpop.f32.mrb[147].mxu1  ;;  %v4543_v50 = vpop.f32.mrb[147].mxu0 }
 0x47c   :  { %v8388_v7 = vmax.f32 %v4753_v44, %v4754_v49  ;;  %v4628_v52 = vmax.f32 %v6104_v63, 0.0  ;;  %v4653_v57 = vmax.f32 %v4541_v32, 0.0  ;;  %v6106_v12 = vadd.f32 %v4168_v8, %v8320_v14 }
 0x47d   :  { %v4705_v33 = vmax.f32 %v4703_v3, %v4627_v13  ;;  %v4630_v17 = vmax.f32 %v6105_v24, 0.0  ;;  %v4662_v54 = vmax.f32 %v4552_v35, 0.0  ;;  %v4544_v26 = vadd.f32 %v4543_v50, %v4383_v16 }
 0x47e   :  { %v4726_v40 = vmax.f32 %v4724_v5, %v4628_v52  ;;  %v4804_v61 = vmax.f32 %v4653_v57, %v4659_v51  ;;  %v4631_v19 = vmax.f32 %v6106_v12, 0.0  ;;  %v4407_v5 = vadd.f32 %v8262_v39, %v8308_v29 }
 0x47f   :  { %v4706_v10 = vmax.f32 %v4704_v15, %v4630_v17  ;;  %v4656_v6 = vmax.f32 %v4544_v26, 0.0  ;;  %v4412_v51 = vadd.f32 %v8264_v4, %v8308_v29  ;;  %v4423_v26 = vadd.f32 %v8282_v1, %v8308_v29 }
 0x480   :  { %v4727_v47 = vmax.f32 %v4725_v41, %v4631_v19  ;;  %v4172_v43 = vpop.f32.mrb[148].mxu1  ;;  %v5922_v22 = vpop.f32.mrb[148].mxu0  ;;  %v4399_v41 = vadd.f32 %v8246_v42, %v8308_v29  ;;  %v4420_v42 = vadd.f32 %v8280_v38, %v8308_v29  ;;  %v4415_v4 = vadd.f32 %v8266_v27, %v8308_v29 }
 0x481   :  { %v4805_v62 = vmax.f32 %v4656_v6, %v4662_v54  ;;  %v6107_v3 = vadd.f32 %v4172_v43, %v8315_v28  ;;  %v4565_v55 = vadd.f32 %v5922_v22, %v4404_v48  ;;  %v4174_v56 = vpop.f32.mrb[149].mxu1  ;;  %v4556_v20 = vpop.f32.mrb[149].mxu0 }
 0x482   :  { %v6108_v15 = vadd.f32 %v4174_v56, %v8320_v14  ;;  %v4557_v44 = vadd.f32 %v4556_v20, %v4396_v25  ;;  %v4176_v58 = vpop.f32.mrb[150].mxu1  ;;  %v5923_v37 = vpop.f32.mrb[150].mxu0 }
 0x483   :  { %v4633_v34 = vmax.f32 %v6107_v3, 0.0  ;;  %v6109_v30 = vadd.f32 %v4176_v58, %v8315_v28  ;;  %v4568_v21 = vadd.f32 %v5923_v37, %v4407_v5  ;;  %v4178_v0 = vpop.f32.mrb[151].mxu1  ;;  %v4559_v9 = vpop.f32.mrb[151].mxu0  ;;  %v4671_v49 = vmax.f32 %v4565_v55, 0.0 }
 0x484   :  { %v4634_v23 = vmax.f32 %v6108_v15, 0.0  ;;  %v4665_v18 = vmax.f32 %v4557_v44, 0.0  ;;  %v6110_v2 = vadd.f32 %v4178_v0, %v8320_v14  ;;  %v4560_v31 = vadd.f32 %v4559_v9, %v4399_v41 }
 0x485   :  { %v4707_v39 = vmax.f32 %v4705_v33, %v4633_v34  ;;  %v4636_v63 = vmax.f32 %v6109_v30, 0.0  ;;  %v4674_v24 = vmax.f32 %v4568_v21, 0.0  ;;  %v4436_v37 = vadd.f32 %v8303_v53, %v8308_v29 }
 0x486   :  { %v4728_v32 = vmax.f32 %v4726_v40, %v4634_v23  ;;  %v4806_v45 = vmax.f32 %v4804_v61, %v4665_v18  ;;  %v4637_v36 = vmax.f32 %v6110_v2, 0.0  ;;  %v4668_v16 = vmax.f32 %v4560_v31, 0.0 }
 0x487   :  { %v4708_v13 = vmax.f32 %v4706_v10, %v4636_v63  ;;  %v4428_v41 = vadd.f32 %v8284_v60, %v8308_v29  ;;  %v4431_v60 = vadd.f32 %v8286_v46, %v8308_v29 }
 0x488   :  { %v4729_v35 = vmax.f32 %v4727_v47, %v4637_v36  ;;  %v4807_v8 = vmax.f32 %v4805_v62, %v4668_v16  ;;  %v4182_v50 = vpop.f32.mrb[152].mxu1  ;;  %v5926_v52 = vpop.f32.mrb[152].mxu0  ;;  %v4808_v57 = vmax.f32 %v4806_v45, %v4671_v49  ;;  %v4439_v49 = vadd.f32 %v8305_v59, %v8308_v29 }
 0x489   :  { %v6111_v12 = vadd.f32 %v4182_v50, %v8315_v28  ;;  %v4581_v33 = vadd.f32 %v5926_v52, %v4420_v42  ;;  %v4184_v17 = vpop.f32.mrb[153].mxu1  ;;  %v4572_v54 = vpop.f32.mrb[153].mxu0  ;;  %v4756_v16 = vrot.slane %v8388_v7, 4 }
 0x48a   :  { %v6112_v40 = vadd.f32 %v4184_v17, %v8320_v14  ;;  %v4573_v38 = vadd.f32 %v4572_v54, %v4412_v51  ;;  %v4186_v61 = vpop.f32.mrb[154].mxu1  ;;  %v5927_v19 = vpop.f32.mrb[154].mxu0  ;;  %v4809_v10 = vmax.f32 %v4807_v8, %v4674_v24 }
 0x48b   :  { %v4639_v6 = vmax.f32 %v6111_v12, 0.0  ;;  %v6113_v48 = vadd.f32 %v4186_v61, %v8315_v28  ;;  %v4584_v47 = vadd.f32 %v5927_v19, %v4423_v26  ;;  %v4188_v43 = vpop.f32.mrb[155].mxu1  ;;  %v4575_v22 = vpop.f32.mrb[155].mxu0  ;;  %v4683_v56 = vmax.f32 %v4581_v33, 0.0 }
 0x48c   :  { %v4640_v25 = vmax.f32 %v6112_v40, 0.0  ;;  %v4677_v62 = vmax.f32 %v4573_v38, 0.0  ;;  %v6114_v3 = vadd.f32 %v4188_v43, %v8320_v14  ;;  %v4576_v1 = vadd.f32 %v4575_v22, %v4415_v4 }
 0x48d   :  { %v4709_v55 = vmax.f32 %v4707_v39, %v4639_v6  ;;  %v4642_v20 = vmax.f32 %v6113_v48, 0.0  ;;  %v4686_v34 = vmax.f32 %v4584_v47, 0.0  ;;  %v4757_v26 = vmax.f32 %v8388_v7, %v4756_v16 }
 0x48e   :  { %v4730_v5 = vmax.f32 %v4728_v32, %v4640_v25  ;;  %v4810_v15 = vmax.f32 %v4808_v57, %v4677_v62  ;;  %v4643_v44 = vmax.f32 %v6114_v3, 0.0  ;;  %v4680_v58 = vmax.f32 %v4576_v1, 0.0 }
 0x48f   :  { %v4710_v27 = vmax.f32 %v4708_v13, %v4642_v20  ;;  %v4758_v25 = vrot.slane %v4757_v26, 2 }
 0x490   :  { %v4731_v30 = vmax.f32 %v4729_v35, %v4643_v44  ;;  %v4811_v21 = vmax.f32 %v4809_v10, %v4680_v58  ;;  %v4192_v0 = vpop.f32.mrb[156].mxu1  ;;  %v5930_v9 = vpop.f32.mrb[156].mxu0  ;;  %v4812_v23 = vmax.f32 %v4810_v15, %v4683_v56 }
 0x491   :  { %v6115_v18 = vadd.f32 %v4192_v0, %v8315_v28  ;;  %v4597_v2 = vadd.f32 %v5930_v9, %v4436_v37  ;;  %v4194_v31 = vpop.f32.mrb[157].mxu1  ;;  %v4588_v39 = vpop.f32.mrb[157].mxu0  ;;  %v4759_v7 = vmax.f32 %v4757_v26, %v4758_v25 }
 0x492   :  { %v6116_v63 = vadd.f32 %v4194_v31, %v8320_v14  ;;  %v4589_v53 = vadd.f32 %v4588_v39, %v4428_v41  ;;  %v4196_v32 = vpop.f32.mrb[158].mxu1  ;;  %v5931_v45 = vpop.f32.mrb[158].mxu0  ;;  %v4813_v36 = vmax.f32 %v4811_v21, %v4686_v34 }
 0x493   :  { %v4645_v13 = vmax.f32 %v6115_v18, 0.0  ;;  %v6117_v42 = vadd.f32 %v4196_v32, %v8315_v28  ;;  %v4600_v51 = vadd.f32 %v5931_v45, %v4439_v49  ;;  %v4198_v24 = vpop.f32.mrb[159].mxu1  ;;  %v4591_v35 = vpop.f32.mrb[159].mxu0  ;;  %v4695_v12 = vmax.f32 %v4597_v2, 0.0 }
 0x494   :  { %v4646_v8 = vmax.f32 %v6116_v63, 0.0  ;;  %v4689_v50 = vmax.f32 %v4589_v53, 0.0  ;;  %v6118_v59 = vadd.f32 %v4198_v24, %v8320_v14  ;;  %v4592_v52 = vadd.f32 %v4591_v35, %v4431_v60 }
 0x495   :  { %v4711_v57 = vmax.f32 %v4709_v55, %v4645_v13  ;;  %v4648_v33 = vmax.f32 %v6117_v42, 0.0  ;;  %v4698_v61 = vmax.f32 %v4600_v51, 0.0 }
 0x496   :  { %v4732_v17 = vmax.f32 %v4730_v5, %v4646_v8  ;;  %v4814_v54 = vmax.f32 %v4812_v23, %v4689_v50  ;;  %v4649_v46 = vmax.f32 %v6118_v59, 0.0  ;;  %v4692_v29 = vmax.f32 %v4592_v52, 0.0 }
 0x497   :  { %v4712_v40 = vmax.f32 %v4710_v27, %v4648_v33  ;;  %v4760_v23 = vrot.slane %v4759_v7, 1 }
 0x498   :  { %v4816_v38 = vmax.f32 %v4814_v54, %v4695_v12  ;;  %v4733_v19 = vmax.f32 %v4731_v30, %v4649_v46  ;;  %v4815_v4 = vmax.f32 %v4813_v36, %v4692_v29  ;;  %v4202_v10 = vpop.f32.mrb[160].mxu1 }
 0x499   :  { %v8429_v6 = vmax.f32 %v4711_v57, %v4712_v40  ;;  %v4204_v48 = vpop.f32.mrb[161].mxu1  ;;  %v6119_v55 = vadd.f32 %v4202_v10, %v8315_v28  ;;  %v4761_v51 = vmax.f32 %v4759_v7, %v4760_v23 }
 0x49a   :  { %v8431_v47 = vmax.f32 %v4732_v17, %v4733_v19  ;;  %v4817_v43 = vmax.f32 %v4815_v4, %v4698_v61  ;;  %v4206_v22 = vpop.f32.mrb[162].mxu1  ;;  %v6120_v20 = vadd.f32 %v4204_v48, %v8320_v14 }
 0x49b   :  { %v4208_v62 = vpop.f32.mrb[163].mxu1  ;;  %v6121_v15 = vadd.f32 %v4206_v22, %v8315_v28  ;;  %v4651_v30 = vmax.f32 %v6119_v55, 0.0 }
 0x49c   :  { %v4818_v3 = vmax.f32 %v4816_v38, %v4817_v43  ;;  %v6122_v37 = vadd.f32 %v4208_v62, %v8320_v14  ;;  %v4652_v18 = vmax.f32 %v6120_v20, 0.0 }
 0x49d   :  { %v4654_v49 = vmax.f32 %v6121_v15, 0.0 }
 0x49e   :  { %v4819_v1 = vrot.slane %v4818_v3, 4  ;;  %v4655_v32 = vmax.f32 %v6122_v37, 0.0 }
 0x4a0   :  { %v4820_v56 = vmax.f32 %v4818_v3, %v4819_v1  ;;  %v4212_v5 = vpop.f32.mrb[164].mxu1 }
 0x4a1   :  { %v6123_v44 = vadd.f32 %v4212_v5, %v8315_v28  ;;  %v4214_v58 = vpop.f32.mrb[165].mxu1 }
 0x4a2   :  { %v4821_v27 = vrot.slane %v4820_v56, 2  ;;  %v6124_v41 = vadd.f32 %v4214_v58, %v8320_v14  ;;  %v4216_v34 = vpop.f32.mrb[166].mxu1 }
 0x4a3   :  { %v4657_v21 = vmax.f32 %v6123_v44, 0.0  ;;  %v6125_v0 = vadd.f32 %v4216_v34, %v8315_v28  ;;  %v4218_v9 = vpop.f32.mrb[167].mxu1 }
 0x4a4   :  { %v4658_v2 = vmax.f32 %v6124_v41, 0.0  ;;  %v6126_v31 = vadd.f32 %v4218_v9, %v8320_v14  ;;  %v4822_v39 = vmax.f32 %v4820_v56, %v4821_v27 }
 0x4a5   :  { %v4762_v63 = vmax.f32 %v4651_v30, %v4657_v21  ;;  %v4660_v53 = vmax.f32 %v6125_v0, 0.0 }
 0x4a6   :  { %v4783_v45 = vmax.f32 %v4652_v18, %v4658_v2  ;;  %v4661_v60 = vmax.f32 %v6126_v31, 0.0  ;;  %v4823_v36 = vrot.slane %v4822_v39, 1 }
 0x4a7   :  { %v4763_v16 = vmax.f32 %v4654_v49, %v4660_v53 }
 0x4a8   :  { %v4784_v13 = vmax.f32 %v4655_v32, %v4661_v60  ;;  %v4222_v42 = vpop.f32.mrb[168].mxu1  ;;  %v4824_v24 = vmax.f32 %v4822_v39, %v4823_v36 }
 0x4a9   :  { %v6127_v35 = vadd.f32 %v4222_v42, %v8315_v28  ;;  %v4224_v8 = vpop.f32.mrb[169].mxu1 }
 0x4aa   :  { %v6128_v50 = vadd.f32 %v4224_v8, %v8320_v14  ;;  %v4226_v59 = vpop.f32.mrb[170].mxu1  ;;  %v8444_v52 = vsel %vm4825_vm1, %v4761_v51, %v4824_v24 }
 0x4ab   :  { %v4663_v57 = vmax.f32 %v6127_v35, 0.0  ;;  %v6129_v12 = vadd.f32 %v4226_v59, %v8315_v28  ;;  %v4228_v33 = vpop.f32.mrb[171].mxu1 }
 0x4ac   :  { %v4664_v17 = vmax.f32 %v6128_v50, 0.0  ;;  %v6130_v54 = vadd.f32 %v4228_v33, %v8320_v14 }
 0x4ad   :  { %v4764_v46 = vmax.f32 %v4762_v63, %v4663_v57  ;;  %v4666_v29 = vmax.f32 %v6129_v12, 0.0 }
 0x4ae   :  { %v4785_v26 = vmax.f32 %v4783_v45, %v4664_v17  ;;  %v4667_v40 = vmax.f32 %v6130_v54, 0.0 }
 0x4af   :  { %v4765_v38 = vmax.f32 %v4763_v16, %v4666_v29 }
 0x4b0   :  { %v4786_v61 = vmax.f32 %v4784_v13, %v4667_v40  ;;  %v4232_v19 = vpop.f32.mrb[172].mxu1 }
 0x4b1   :  { %v6131_v4 = vadd.f32 %v4232_v19, %v8315_v28  ;;  %v4234_v10 = vpop.f32.mrb[173].mxu1 }
 0x4b2   :  { %v6132_v48 = vadd.f32 %v4234_v10, %v8320_v14  ;;  %v4236_v43 = vpop.f32.mrb[174].mxu1 }
 0x4b3   :  { %v4669_v22 = vmax.f32 %v6131_v4, 0.0  ;;  %v6133_v25 = vadd.f32 %v4236_v43, %v8315_v28  ;;  %v4238_v62 = vpop.f32.mrb[175].mxu1 }
 0x4b4   :  { %v4670_v3 = vmax.f32 %v6132_v48, 0.0  ;;  %v6134_v1 = vadd.f32 %v4238_v62, %v8320_v14  ;;  %v4714_v62 = vrot.slane %v8429_v6, 4 }
 0x4b5   :  { %v4766_v55 = vmax.f32 %v4764_v46, %v4669_v22  ;;  %v4672_v7 = vmax.f32 %v6133_v25, 0.0 }
 0x4b6   :  { %v4787_v56 = vmax.f32 %v4785_v26, %v4670_v3  ;;  %v4673_v20 = vmax.f32 %v6134_v1, 0.0 }
 0x4b7   :  { %v4767_v5 = vmax.f32 %v4765_v38, %v4672_v7 }
 0x4b8   :  { %v4788_v15 = vmax.f32 %v4786_v61, %v4673_v20  ;;  %v4242_v44 = vpop.f32.mrb[176].mxu1 }
 0x4b9   :  { %v6135_v58 = vadd.f32 %v4242_v44, %v8315_v28  ;;  %v4244_v27 = vpop.f32.mrb[177].mxu1 }
 0x4ba   :  { %v6136_v37 = vadd.f32 %v4244_v27, %v8320_v14  ;;  %v4246_v41 = vpop.f32.mrb[178].mxu1  ;;  %v4715_v27 = vmax.f32 %v8429_v6, %v4714_v62  ;;  %v4873_v62 = vld [vmem:[%s8553_s7 + $0x160] sm:$0xff] }
 0x4bb   :  { %v4675_v34 = vmax.f32 %v6135_v58, 0.0  ;;  %v6137_v30 = vadd.f32 %v4246_v41, %v8315_v28  ;;  %v4248_v21 = vpop.f32.mrb[179].mxu1 }
 0x4bc   :  { %v4676_v0 = vmax.f32 %v6136_v37, 0.0  ;;  %v6138_v9 = vadd.f32 %v4248_v21, %v8320_v14 }
 0x4bd   :  { %v4768_v23 = vmax.f32 %v4766_v55, %v4675_v34  ;;  %v4678_v18 = vmax.f32 %v6137_v30, 0.0  ;;  %v4735_v55 = vrot.slane %v8431_v47, 4 }
 0x4be   :  { %v4789_v2 = vmax.f32 %v4787_v56, %v4676_v0  ;;  %v4679_v31 = vmax.f32 %v6138_v9, 0.0 }
 0x4bf   :  { %v4769_v39 = vmax.f32 %v4767_v5, %v4678_v18  ;;  %v4736_v34 = vmax.f32 %v8431_v47, %v4735_v55  ;;  %v4875_v55 = vld [vmem:[%s8553_s7 + $0x170] sm:$0xff] }
 0x4c0   :  { %v4790_v49 = vmax.f32 %v4788_v15, %v4679_v31  ;;  %v4252_v63 = vpop.f32.mrb[180].mxu1 }
 0x4c1   :  { %v6139_v53 = vadd.f32 %v4252_v63, %v8315_v28  ;;  %v4254_v32 = vpop.f32.mrb[181].mxu1 }
 0x4c2   :  { %v6140_v45 = vadd.f32 %v4254_v32, %v8320_v14  ;;  %v4256_v60 = vpop.f32.mrb[182].mxu1 }
 0x4c3   :  { %v4681_v36 = vmax.f32 %v6139_v53, 0.0  ;;  %v6141_v16 = vadd.f32 %v4256_v60, %v8315_v28  ;;  %v4258_v13 = vpop.f32.mrb[183].mxu1 }
 0x4c4   :  { %v4682_v42 = vmax.f32 %v6140_v45, 0.0  ;;  %v6142_v51 = vadd.f32 %v4258_v13, %v8320_v14 }
 0x4c5   :  { %v4770_v24 = vmax.f32 %v4768_v23, %v4681_v36  ;;  %v4684_v35 = vmax.f32 %v6141_v16, 0.0  ;;  %v4716_v23 = vrot.slane %v4715_v27, 2 }
 0x4c6   :  { %v4791_v8 = vmax.f32 %v4789_v2, %v4682_v42  ;;  %v4685_v50 = vmax.f32 %v6142_v51, 0.0  ;;  %v4737_v2 = vrot.slane %v4736_v34, 2  ;;  %v4861_v42 = vld [vmem:[%s8553_s7 + $0x100] sm:$0xff]  ;;  %v4862_v51 = vld [vmem:[%s8553_s7 + $0x108] sm:$0xff] }
 0x4c7   :  { %v4771_v59 = vmax.f32 %v4769_v39, %v4684_v35 }
 0x4c8   :  { %v4792_v57 = vmax.f32 %v4790_v49, %v4685_v50  ;;  %v4262_v12 = vpop.f32.mrb[184].mxu1  ;;  %v4717_v49 = vmax.f32 %v4715_v27, %v4716_v23 }
 0x4c9   :  { %v6143_v33 = vadd.f32 %v4262_v12, %v8315_v28  ;;  %v4264_v17 = vpop.f32.mrb[185].mxu1 }
 0x4ca   :  { %v6144_v54 = vadd.f32 %v4264_v17, %v8320_v14  ;;  %v4266_v46 = vpop.f32.mrb[186].mxu1  ;;  %v4718_v45 = vrot.slane %v4717_v49, 1  ;;  %v4864_v17 = vld [vmem:[%s8553_s7 + $0x118] sm:$0xff] }
 0x4cb   :  { %v4687_v29 = vmax.f32 %v6143_v33, 0.0  ;;  %v6145_v26 = vadd.f32 %v4266_v46, %v8315_v28  ;;  %v4268_v40 = vpop.f32.mrb[187].mxu1  ;;  %v4863_v33 = vld [vmem:[%s8553_s7 + $0x110] sm:$0xff]  ;;  %v6787_v46 = vmov 0.0  }
 0x4cc   :  { %v4688_v38 = vmax.f32 %v6144_v54, 0.0  ;;  %v6146_v61 = vadd.f32 %v4268_v40, %v8320_v14  ;;  %v6003_v54 = vpack.c.bf16 %v4864_v17, %v4863_v33 }
 0x4cd   :  { %v4772_v19 = vmax.f32 %v4770_v24, %v4687_v29  ;;  %v4690_v4 = vmax.f32 %v6145_v26, 0.0  ;;  %v4719_v24 = vmax.f32 %v4717_v49, %v4718_v45  ;;  %v4865_v29 = vld [vmem:[%s8553_s7 + $0x120] sm:$0xff]  ;;  %v4866_v26 = vld [vmem:[%s8553_s7 + $0x128] sm:$0xff] }
 0x4ce   :  { %v4793_v10 = vmax.f32 %v4791_v8, %v4688_v38  ;;  %v4691_v48 = vmax.f32 %v6146_v61, 0.0  ;;  %v6006_v40 = vpack.c.bf16 %v4866_v26, %v4865_v29  ;;  %v4867_v38 = vld [vmem:[%s8553_s7 + $0x130] sm:$0xff]  ;;  %v4868_v61 = vld [vmem:[%s8553_s7 + $0x138] sm:$0xff] }
 0x4cf   :  { %v4773_v43 = vmax.f32 %v4771_v59, %v4690_v4  ;;  %v4869_v4 = vld [vmem:[%s8553_s7 + $0x140] sm:$0xff] }
 0x4d0   :  { %v4794_v22 = vmax.f32 %v4792_v57, %v4691_v48  ;;  %v4272_v25 = vpop.f32.mrb[188].mxu1  ;;  %v6000_v57 = vpack.c.bf16 %v4862_v51, %v4861_v42 }
 0x4d1   :  { %v6147_v3 = vadd.f32 %v4272_v25, %v8315_v28  ;;  %v4274_v1 = vpop.f32.mrb[189].mxu1 }
 0x4d2   :  { %v6148_v7 = vadd.f32 %v4274_v1, %v8320_v14  ;;  %v4276_v56 = vpop.f32.mrb[190].mxu1 }
 0x4d3   :  { %v4693_v20 = vmax.f32 %v6147_v3, 0.0  ;;  %v6149_v5 = vadd.f32 %v4276_v56, %v8315_v28  ;;  %v4278_v15 = vpop.f32.mrb[191].mxu1  ;;  %v4874_v3 = vld [vmem:[%s8553_s7 + $0x168] sm:$0xff] }
 0x4d4   :  { %v4694_v44 = vmax.f32 %v6148_v7, 0.0  ;;  %v6150_v58 = vadd.f32 %v4278_v15, %v8320_v14  ;;  %v4738_v14 = vmax.f32 %v4736_v34, %v4737_v2  ;;  %v6018_v1 = vpack.c.bf16 %v4874_v3, %v4873_v62  ;;  %v4876_v7 = vld [vmem:[%s8553_s7 + $0x178] sm:$0xff]  ;;  %v8569_v34 = vld [vmem:[#allocation12_spill] sm:$0xff] }
 0x4d5   :  { %v4774_v37 = vmax.f32 %v4772_v19, %v4693_v20  ;;  %v4696_v41 = vmax.f32 %v6149_v5, 0.0  ;;  %v6009_v19 = vpack.c.bf16 %v4868_v61, %v4867_v38  ;;  %v6021_v56 = vpack.c.bf16 %v4876_v7, %v4875_v55 }
 0x4d6   :  { %v4795_v30 = vmax.f32 %v4793_v10, %v4694_v44  ;;  %v4697_v21 = vmax.f32 %v6150_v58, 0.0  ;;  %v4739_v36 = vrot.slane %v4738_v14, 1  ;;  %v4870_v10 = vld [vmem:[%s8553_s7 + $0x148] sm:$0xff]  ;;  %v6788_v44 = vmov 1966171168  }
 0x4d7   :  { %v4775_v0 = vmax.f32 %v4773_v43, %v4696_v41  ;;  %v6012_v48 = vpack.c.bf16 %v4870_v10, %v4869_v4  ;;  %v4871_v43 = vld [vmem:[%s8553_s7 + $0x150] sm:$0xff]  ;;  %v5026_v58 = vunpack.c.l.s4 %v6788_v44 }
 0x4d8   :  { %v4796_v9 = vmax.f32 %v4794_v22, %v4697_v21  ;;  %v4740_v8 = vmax.f32 %v4738_v14, %v4739_v36  ;;  %v4872_v22 = vld [vmem:[%s8553_s7 + $0x158] sm:$0xff]  ;;  %s6789_s7 = smov [#allocation8]  }
 0x4d9   :  { %v4776_v18 = vmax.f32 %v4774_v37, %v4775_v0  ;;  %v6015_v25 = vpack.c.bf16 %v4872_v22, %v4871_v43  ;;  %v5027_v27 = vunpack.c.0.s8 %v5026_v58  ;;  %v5357_v37 = vld [vmem:[%s8554_s8] ss:$0 sm:$0xff]  ;;  %s5056_s15 = sshll.u32 %s6789_s7, 4  ;;  %s5057_s15 = int_to_ptr.vmem [resolvable:$true] %s5056_s15 }
 0x4da   :  { %v4797_v31 = vmax.f32 %v4795_v30, %v4796_v9  ;;  %s6749_s16 = scalar_lea.vmem %s5057_s15, 32  ;;  %p6754_p11 = scmp.lt.s32.totalorder %s5057_s15, %s5057_s15 }
 0x4db   :  { %v4777_v39 = vrot.slane %v4776_v18, 4  ;;  %v5030_v30 = vsub.s32 %v5027_v27, %v8569_v34  ;;  %p6750_p10 = scmp.ne.s32.totalorder %s5057_s15, %s6749_s16  ;;  %p6755_p12 = scmp.lt.s32.totalorder %s6749_s16, %s6749_s16 }
 0x4dc   :  { %v4798_v28 = vrot.slane %v4797_v31, 4 }
 0x4dd   :  { %v4778_v63 = vmax.f32 %v4776_v18, %v4777_v39  ;;  %p6756_p13 = por %p6755_p12, %p6754_p11 }
 0x4de   :  { %v4799_v53 = vmax.f32 %v4797_v31, %v4798_v28 }
 0x4df   :  { %v4779_v32 = vrot.slane %v4778_v63, 2  ;;  %p6757_p0 = pnand %p6756_p13, %p6750_p10 }
 0x4e0   :  { %v4800_v6 = vrot.slane %v4799_v53, 2 }
 0x4e1   :  { %v4780_v60 = vmax.f32 %v4778_v63, %v4779_v32 }
 0x4e2   :  { %v4801_v47 = vmax.f32 %v4799_v53, %v4800_v6 }
 0x4e3   :  { %v4781_v16 = vrot.slane %v4780_v60, 1 }
 0x4e4   :  { %v4802_v13 = vrot.slane %v4801_v47, 1 }
 0x4e5   :  { %v4782_v35 = vmax.f32 %v4780_v60, %v4781_v16 }
 0x4e6   :  { %v4803_v50 = vmax.f32 %v4801_v47, %v4802_v13 }
 0x4e7   :  { %v4826_v59 = vsel %vm4825_vm1, %v4719_v24, %v4782_v35 }
 0x4e8   :  { %v4827_v12 = vsel %vm4825_vm1, %v4740_v8, %v4803_v50 }
 0x4e9   :  { %4948 = vmatprep.mubr.f32.mxu1 %v4827_v12 }
 0x4ea   :  { %4949 = vmatmul.mubr.f32.vlgmr.msra.gmra.mrb[192].mxu1 %v4826_v59 }
 0x4eb   :  { %6001 = vmatpush3.bf16.msra.mxu1 %v6000_v57  ;;  %5964 = vmatprep.mubr.msk.f32.mxu1 %vm6786_vm2, %v6787_v46 }
 0x4ec   :  { %6002 = vmatprep.subr.bf16.mxu1 %v6785_v11 }
 0x4ef   :  { %6004 = vmatpush3.bf16.msra.mxu1 %v6003_v54 }
 0x4f0   :  { %6005 = vmatprep.subr.bf16.mxu1 %v6785_v11 }
 0x4f3   :  { %6007 = vmatpush3.bf16.msra.mxu1 %v6006_v40 }
 0x4f4   :  { %6008 = vmatprep.subr.bf16.mxu1 %v6785_v11 }
 0x4f7   :  { %6010 = vmatpush3.bf16.msra.mxu1 %v6009_v19 }
 0x4f8   :  { %6011 = vmatprep.subr.bf16.mxu1 %v6785_v11 }
 0x4fb   :  { %6013 = vmatpush3.bf16.msra.mxu1 %v6012_v48 }
 0x4fc   :  { %6014 = vmatprep.subr.bf16.mxu1 %v6785_v11 }
 0x4ff   :  { %6016 = vmatpush3.bf16.msra.mxu1 %v6015_v25 }
 0x500   :  { %6017 = vmatprep.subr.bf16.mxu1 %v6785_v11 }
 0x503   :  { %6019 = vmatpush3.bf16.msra.mxu1 %v6018_v1 }
 0x504   :  { %6020 = vmatprep.subr.bf16.mxu1 %v6785_v11 }
 0x507   :  { %6022 = vmatpush3.bf16.msra.mxu1 %v6021_v56 }
 0x50a   :  { %5965 = vmatmul.mubr.f32.vlgmr.msra.gmra.mrb[194].mxu1 %v8444_v52 }
 0x5bd   :  { %v5864_v20 = vpop.f32.mrb[192].mxu1 }
 0x5be   :  { %v5865_v5 = vpop.f32.mrb[193].mxu1 }
 0x5bf   :  { %v5866_v15 = vadd.f32 %v5865_v5, %v5864_v20 }
 0x5c1   :  { %v4951_v41 = vadd.f32 %v5866_v15, %v5357_v37 }
 0x5dd   :  { %v5020_v21 = vpop.f32.mrb[194].mxu1 }
 0x5de   :  { %v5021_v0 = vadd.f32 %v5020_v21, %v4951_v41  ;;  %v5966_v9 = vpop.f32.mrb[195].mxu1 }
 0x5e0   :  { %v5031_v11 = vrot.slane %v5021_v0, %v5030_v30 }
 0x5e2   :  { %v5032_v52 = vcombine.high %v5031_v11, %v5031_v11  ;;  %5358 = vst.sshfl [vmem:[#allocation8] sm:$0x1 pattern:$0x73625140] %v5031_v11 }
 0x5e4   :  { %5359 = vst.sshfl [vmem:[#allocation8 + $0x1] sm:$0x1 pattern:$0x73625140] %v5032_v52 }
 0x5e5   :  { %6760 = shalt.err (!%p6757_p0)
}
 0x5e6   :  { %s6761_s18 = scalar_lea.hbm %s8555_s9, 32 }
 0x5e7   :  { %p6762_p1 = scmp.ne.s32.totalorder %s8555_s9, %s6761_s18  ;;  %p6765_p2 = scmp.lt.u32.totalorder %s6761_s18, %s8555_s9 }
 0x5e9   :  { %p6767_p3 = pnand %p6765_p2, %p6762_p1 }
 0x5eb   :  { %6770 = shalt.err (!%p6767_p3)
}
 0x5ec   :  { %s6790_s2 = smov 16   ;;  %s6791_s25 = smov 1  }
 0x5ed   :  { %5062 = dma.vmem_to_hbm [thread:$0]  %s5057_s15, 32, %s8555_s9, [#allocation4], %s6790_s2, %s6790_s2, %s6791_s25  }
 0x5ee   :  { %6775 = dma.done.wait [#allocation4], 32  }
 0x5ef   :  { %6776 = vsyncadd [#allocation4], 4294967264 }
 0x5f0   :  { %5066 = vsyncpa [#allocation3], 1 }
 0x5f1   :  { %5067 = vsyncpa [#allocation6], 1 }
 0x5f2   :  { %5068 = vsyncpa [#allocation4], 1 }

</bundles_post_ra>
